<compile_context>
chip_gen: v7x
topology: tpu7x:2x2x1
jax: 0.10.0
libtpu: 0.0.40
codegen_flags: <defaults>
</compile_context>

<pallas_src>
import functools

import jax
import jax.numpy as jnp
from jax.experimental import pallas as pl
from jax.experimental.pallas import tpu as pltpu

# small shapes consistent with how the module is used (tokens of a 4x4x4 volume)
B = 2
N_TOK = 64
DIM = 32
NUM_HEADS = 4
HEAD_DIM = DIM // NUM_HEADS


# ---------------------------------------------------------------------------
# Fused attention kernel: operates on a (bb, N, C) block of windows.
# ---------------------------------------------------------------------------
def _attention_kernel(x_ref, wq_ref, wk_ref, wv_ref, wp_ref, bp_ref, out_ref, *,
                      num_heads):
    bb, n, c = x_ref.shape
    h = num_heads
    d = c // h
    t = bb * n
    mm_dtype = x_ref.dtype          # matmul operand dtype (f32, or bf16 on v6e/v7x)

    # (tokens, C) slab; merges only leading dims (n is a multiple of 8 -> cheap).
    x2 = x_ref[...].reshape(t, c)
    xh = jnp.broadcast_to(x2, (h, t, c))     # head batch axis -- no lane slicing

    # Per-head q/k/v: the head split lives entirely in the (H, C, d) weight
    # layout; each einsum is a natural-order batched matmul (no transposes).
    # The 1/sqrt(d) scale is already folded into wq on the host.
    q = jnp.einsum('htc,hcd->htd', xh, wq_ref[...],
                   preferred_element_type=jnp.float32).astype(mm_dtype)
    k = jnp.einsum('htc,hcd->htd', xh, wk_ref[...],
                   preferred_element_type=jnp.float32).astype(mm_dtype)
    v = jnp.einsum('htc,hcd->htd', xh, wv_ref[...],
                   preferred_element_type=jnp.float32).astype(mm_dtype)

    # Regroup tokens per attention window: (H, bb*n, d) -> (H*bb, n, d).
    # Sublane-aligned split (n % 8 == 0) + leading-dim merge.
    g = h * bb
    q = q.reshape(g, n, d)
    k = k.reshape(g, n, d)
    v = v.reshape(g, n, d)

    # Scores + exact, numerically-stable softmax in f32 (matches torch).
    s = jnp.einsum('gnd,gmd->gnm', q, k, preferred_element_type=jnp.float32)
    s = s - jnp.max(s, axis=-1, keepdims=True)
    p = jnp.exp(s)
    p = p / jnp.sum(p, axis=-1, keepdims=True)

    o = jnp.einsum('gnm,gmd->gnd', p.astype(mm_dtype), v,
                   preferred_element_type=jnp.float32).astype(mm_dtype)

    # Head merge fused into the output projection: per-head (T,d)@(d,C) matmuls
    # accumulated in f32, then a cheap sum over heads.  No lane concatenation.
    o = o.reshape(h, t, d)
    y = jnp.einsum('htd,hdc->htc', o, wp_ref[...],
                   preferred_element_type=jnp.float32)    # (H, T, C) f32
    y = jnp.sum(y, axis=0) + bp_ref[...]                  # (T, C) + (1, C)
    out_ref[...] = y.reshape(bb, n, c).astype(out_ref.dtype)


# ---------------------------------------------------------------------------
# Host-side (one-time) weight re-layout: per-head tensors, scale folded into Wq.
# ---------------------------------------------------------------------------
def _prepare_weights(w_qkv, w_proj, b_proj, *, num_heads, compute_dtype=None):
    c = w_proj.shape[0]
    d = c // num_heads
    scale = d ** (-0.5)
    # stored (in, out): y = x @ W.  (Real torch nn.Linear weights need a
    # transpose (out, in) -> (in, out) when importing.)
    wq = (w_qkv[:, 0 * c:1 * c] * scale).reshape(c, num_heads, d).transpose(1, 0, 2)
    wk = w_qkv[:, 1 * c:2 * c].reshape(c, num_heads, d).transpose(1, 0, 2)
    wv = w_qkv[:, 2 * c:3 * c].reshape(c, num_heads, d).transpose(1, 0, 2)
    wp = w_proj.reshape(num_heads, d, c)                  # (H, d, C)
    bp = b_proj.reshape(1, c).astype(jnp.float32)
    if compute_dtype is not None:
        wq, wk, wv, wp = (w.astype(compute_dtype) for w in (wq, wk, wv, wp))
    return wq, wk, wv, wp, bp


def attention(x, w_qkv, w_proj, b_proj, *, num_heads, batch_block=None,
              compute_dtype=None):
    """x: (B, N, C) f32; w_qkv: (C, 3C); w_proj: (C, C); b_proj: (C,).

    compute_dtype=jnp.bfloat16 casts matmul operands (HBM/vreg savings on
    v6e/v7x); softmax and accumulation stay f32.  Leave None on v5e.
    """
    b, n, c = x.shape
    assert c % num_heads == 0 and n % 8 == 0
    d = c // num_heads
    wq, wk, wv, wp, bp = _prepare_weights(
        w_qkv, w_proj, b_proj, num_heads=num_heads, compute_dtype=compute_dtype)
    if compute_dtype is not None:
        x = x.astype(compute_dtype)

    # Default: whole batch in one grid step (the call is overhead-bound at these
    # sizes; VMEM footprint is << budget on all generations).  Pass batch_block
    # < B to split windows across grid steps / TensorCores when batching many
    # windows per call, so per-core work amortizes the ~0.35us/step overhead.
    if batch_block is None:
        batch_block = b
    assert b % batch_block == 0
    grid = (b // batch_block,)

    kernel = functools.partial(_attention_kernel, num_heads=num_heads)
    return pl.pallas_call(
        kernel,
        out_shape=jax.ShapeDtypeStruct((b, n, c), jnp.float32),
        grid=grid,
        in_specs=[
            pl.BlockSpec((batch_block, n, c), lambda i: (i, 0, 0)),  # tokens
            pl.BlockSpec((num_heads, c, d), lambda i: (0, 0, 0)),    # Wq (scaled)
            pl.BlockSpec((num_heads, c, d), lambda i: (0, 0, 0)),    # Wk
            pl.BlockSpec((num_heads, c, d), lambda i: (0, 0, 0)),    # Wv
            pl.BlockSpec((num_heads, d, c), lambda i: (0, 0, 0)),    # Wproj
            pl.BlockSpec((1, c), lambda i: (0, 0)),                  # proj bias
        ],
        out_specs=pl.BlockSpec((batch_block, n, c), lambda i: (i, 0, 0)),
        compiler_params=pltpu.CompilerParams(dimension_semantics=("parallel",)),
    )(x, wq, wk, wv, wp, bp)


# ---------------------------------------------------------------------------
# Pure-JAX reference (mirrors the PyTorch forward) for a correctness check.
# ---------------------------------------------------------------------------
def attention_ref(x, w_qkv, w_proj, b_proj, *, num_heads):
    b, n, c = x.shape
    d = c // num_heads
    qkv = x @ w_qkv                                           # (b, n, 3c)
    qkv = qkv.reshape(b, n, 3, num_heads, d).transpose(2, 0, 3, 1, 4)
    q, k, v = qkv[0], qkv[1], qkv[2]                          # (b, h, n, d)
    attn = jnp.einsum("bhnd,bhmd->bhnm", q, k) * (d ** (-0.5))
    attn = jax.nn.softmax(attn, axis=-1)
    o = jnp.einsum("bhnm,bhmd->bhnd", attn, v)
    o = o.transpose(0, 2, 1, 3).reshape(b, n, c)
    return o @ w_proj + b_proj


# ---------------------------------------------------------------------------
if __name__ == "__main__":
    key = jax.random.PRNGKey(0)
    k0, k1, k2, k3 = jax.random.split(key, 4)

    x = jax.random.normal(k0, (B, N_TOK, DIM), dtype=jnp.float32)
    # stored (in, out): x @ W.  (Real torch weights need a transpose on load.)
    w_qkv = 0.1 * jax.random.normal(k1, (DIM, 3 * DIM), dtype=jnp.float32)  # qkv_bias=False
    w_proj = 0.1 * jax.random.normal(k2, (DIM, DIM), dtype=jnp.float32)
    b_proj = 0.1 * jax.random.normal(k3, (DIM,), dtype=jnp.float32)

    ref = attention_ref(x, w_qkv, w_proj, b_proj, num_heads=NUM_HEADS)

    # f32 path (default; exact softmax): tight parity with the torch forward.
    out = attention(x, w_qkv, w_proj, b_proj, num_heads=NUM_HEADS)
    jax.block_until_ready(out)
    assert out.shape == (B, N_TOK, DIM)
    err = float(jnp.max(jnp.abs(out - ref)))
    assert err < 1e-3, f"f32 max abs error {err}"

    # bf16 matmul-operand path (v6e/v7x byte savings); softmax stays f32.
    out_bf16 = attention(x, w_qkv, w_proj, b_proj, num_heads=NUM_HEADS,
                         compute_dtype=jnp.bfloat16)
    jax.block_until_ready(out_bf16)
    err_bf16 = float(jnp.max(jnp.abs(out_bf16 - ref)))
    assert err_bf16 < 5e-2, f"bf16 max abs error {err_bf16}"

    print("KERNEL_OK")
</pallas_src>

<mosaic_0001>
module attributes {stable_mosaic.version = 11 : i64} {
  func.func @_attention_kernel(%arg0: i32, %arg1: memref<2x64x32xf32, #tpu.memory_space<vmem>>, %arg2: memref<4x32x8xf32, #tpu.memory_space<vmem>>, %arg3: memref<4x32x8xf32, #tpu.memory_space<vmem>>, %arg4: memref<4x32x8xf32, #tpu.memory_space<vmem>>, %arg5: memref<4x8x32xf32, #tpu.memory_space<vmem>>, %arg6: memref<1x32xf32, #tpu.memory_space<vmem>>, %arg7: memref<2x64x32xf32, #tpu.memory_space<vmem>>) attributes {dimension_semantics = [#tpu.dimension_semantics<parallel>], iteration_bounds = array<i64: 1>, scalar_prefetch = 0 : i64, scratch_operands = 0 : i64, tpu.core_type = #tpu.core_type<tc>, window_params = [{transform_indices = @transform_0, window_bounds = array<i64: 2, 64, 32>}, {pipeline_mode = #tpu.pipeline_mode<synchronous>, transform_indices = @transform_1, window_bounds = array<i64: 4, 32, 8>}, {pipeline_mode = #tpu.pipeline_mode<synchronous>, transform_indices = @transform_2, window_bounds = array<i64: 4, 32, 8>}, {pipeline_mode = #tpu.pipeline_mode<synchronous>, transform_indices = @transform_3, window_bounds = array<i64: 4, 32, 8>}, {pipeline_mode = #tpu.pipeline_mode<synchronous>, transform_indices = @transform_4, window_bounds = array<i64: 4, 8, 32>}, {pipeline_mode = #tpu.pipeline_mode<synchronous>, transform_indices = @transform_5, window_bounds = array<i64: 1, 32>}, {transform_indices = @transform_6, window_bounds = array<i64: 2, 64, 32>}]} {
    %c0 = arith.constant 0 : index
    %c0_0 = arith.constant 0 : index
    %c0_1 = arith.constant 0 : index
    %0 = vector.load %arg1[%c0, %c0_0, %c0_1] : memref<2x64x32xf32, #tpu.memory_space<vmem>>, vector<2x64x32xf32>
    %1 = vector.shape_cast %0 : vector<2x64x32xf32> to vector<128x32xf32>
    %2 = vector.shape_cast %1 : vector<128x32xf32> to vector<1x128x32xf32>
    %3 = vector.broadcast %2 : vector<1x128x32xf32> to vector<4x128x32xf32>
    %c0_2 = arith.constant 0 : index
    %c0_3 = arith.constant 0 : index
    %c0_4 = arith.constant 0 : index
    %4 = vector.load %arg2[%c0_2, %c0_3, %c0_4] : memref<4x32x8xf32, #tpu.memory_space<vmem>>, vector<4x32x8xf32>
    "tpu.trace_start"() <{level = 10 : i32, message = "htc,hcd->htd"}> : () -> ()
    %cst = arith.constant dense<0.000000e+00> : vector<4x128x8xf32>
    %5 = tpu.matmul %3, %4, %cst {dimension_numbers = #tpu.dot_dimension_numbers<[2], [1], [1], [2], [0, 0, 0, 1, 1, 2], [0], [0]>} : vector<4x128x32xf32>, vector<4x32x8xf32>, vector<4x128x8xf32> -> vector<4x128x8xf32>
    "tpu.trace_stop"() : () -> ()
    %c0_5 = arith.constant 0 : index
    %c0_6 = arith.constant 0 : index
    %c0_7 = arith.constant 0 : index
    %6 = vector.load %arg3[%c0_5, %c0_6, %c0_7] : memref<4x32x8xf32, #tpu.memory_space<vmem>>, vector<4x32x8xf32>
    "tpu.trace_start"() <{level = 10 : i32, message = "htc,hcd->htd"}> : () -> ()
    %cst_8 = arith.constant dense<0.000000e+00> : vector<4x128x8xf32>
    %7 = tpu.matmul %3, %6, %cst_8 {dimension_numbers = #tpu.dot_dimension_numbers<[2], [1], [1], [2], [0, 0, 0, 1, 1, 2], [0], [0]>} : vector<4x128x32xf32>, vector<4x32x8xf32>, vector<4x128x8xf32> -> vector<4x128x8xf32>
    "tpu.trace_stop"() : () -> ()
    %c0_9 = arith.constant 0 : index
    %c0_10 = arith.constant 0 : index
    %c0_11 = arith.constant 0 : index
    %8 = vector.load %arg4[%c0_9, %c0_10, %c0_11] : memref<4x32x8xf32, #tpu.memory_space<vmem>>, vector<4x32x8xf32>
    "tpu.trace_start"() <{level = 10 : i32, message = "htc,hcd->htd"}> : () -> ()
    %cst_12 = arith.constant dense<0.000000e+00> : vector<4x128x8xf32>
    %9 = tpu.matmul %3, %8, %cst_12 {dimension_numbers = #tpu.dot_dimension_numbers<[2], [1], [1], [2], [0, 0, 0, 1, 1, 2], [0], [0]>} : vector<4x128x32xf32>, vector<4x32x8xf32>, vector<4x128x8xf32> -> vector<4x128x8xf32>
    "tpu.trace_stop"() : () -> ()
    %10 = vector.shape_cast %5 : vector<4x128x8xf32> to vector<8x64x8xf32>
    %11 = vector.shape_cast %7 : vector<4x128x8xf32> to vector<8x64x8xf32>
    %12 = vector.shape_cast %9 : vector<4x128x8xf32> to vector<8x64x8xf32>
    "tpu.trace_start"() <{level = 10 : i32, message = "gnd,gmd->gnm"}> : () -> ()
    %cst_13 = arith.constant dense<0.000000e+00> : vector<8x64x64xf32>
    %13 = tpu.matmul %10, %11, %cst_13 {dimension_numbers = #tpu.dot_dimension_numbers<[2], [2], [1], [1], [0, 0, 0, 1, 1, 1], [0], [0]>} : vector<8x64x8xf32>, vector<8x64x8xf32>, vector<8x64x64xf32> -> vector<8x64x64xf32>
    "tpu.trace_stop"() : () -> ()
    %cst_14 = arith.constant dense<0xFF800000> : vector<8x64xf32>
    %14 = vector.multi_reduction <maximumf>, %13, %cst_14 [2] : vector<8x64x64xf32> to vector<8x64xf32>
    %15 = vector.shape_cast %14 : vector<8x64xf32> to vector<8x64x1xf32>
    %16 = vector.broadcast %15 : vector<8x64x1xf32> to vector<8x64x64xf32>
    %17 = arith.subf %13, %16 : vector<8x64x64xf32>
    %18 = math.exp %17 : vector<8x64x64xf32>
    %cst_15 = arith.constant dense<0.000000e+00> : vector<8x64xf32>
    %19 = vector.multi_reduction <add>, %18, %cst_15 [2] : vector<8x64x64xf32> to vector<8x64xf32>
    %20 = vector.shape_cast %19 : vector<8x64xf32> to vector<8x64x1xf32>
    %21 = vector.broadcast %20 : vector<8x64x1xf32> to vector<8x64x64xf32>
    %22 = arith.divf %18, %21 : vector<8x64x64xf32>
    "tpu.trace_start"() <{level = 10 : i32, message = "gnm,gmd->gnd"}> : () -> ()
    %cst_16 = arith.constant dense<0.000000e+00> : vector<8x64x8xf32>
    %23 = tpu.matmul %22, %12, %cst_16 {dimension_numbers = #tpu.dot_dimension_numbers<[2], [1], [1], [2], [0, 0, 0, 1, 1, 2], [0], [0]>} : vector<8x64x64xf32>, vector<8x64x8xf32>, vector<8x64x8xf32> -> vector<8x64x8xf32>
    "tpu.trace_stop"() : () -> ()
    %24 = vector.shape_cast %23 : vector<8x64x8xf32> to vector<4x128x8xf32>
    %c0_17 = arith.constant 0 : index
    %c0_18 = arith.constant 0 : index
    %c0_19 = arith.constant 0 : index
    %25 = vector.load %arg5[%c0_17, %c0_18, %c0_19] : memref<4x8x32xf32, #tpu.memory_space<vmem>>, vector<4x8x32xf32>
    "tpu.trace_start"() <{level = 10 : i32, message = "htd,hdc->htc"}> : () -> ()
    %cst_20 = arith.constant dense<0.000000e+00> : vector<4x128x32xf32>
    %26 = tpu.matmul %24, %25, %cst_20 {dimension_numbers = #tpu.dot_dimension_numbers<[2], [1], [1], [2], [0, 0, 0, 1, 1, 2], [0], [0]>} : vector<4x128x8xf32>, vector<4x8x32xf32>, vector<4x128x32xf32> -> vector<4x128x32xf32>
    "tpu.trace_stop"() : () -> ()
    %cst_21 = arith.constant dense<0.000000e+00> : vector<128x32xf32>
    %27 = vector.multi_reduction <add>, %26, %cst_21 [0] : vector<4x128x32xf32> to vector<128x32xf32>
    %c0_22 = arith.constant 0 : index
    %c0_23 = arith.constant 0 : index
    %28 = vector.load %arg6[%c0_22, %c0_23] : memref<1x32xf32, #tpu.memory_space<vmem>>, vector<1x32xf32>
    %29 = vector.broadcast %28 : vector<1x32xf32> to vector<128x32xf32>
    %30 = arith.addf %27, %29 : vector<128x32xf32>
    %31 = vector.shape_cast %30 : vector<128x32xf32> to vector<2x64x32xf32>
    %c0_24 = arith.constant 0 : index
    %c0_25 = arith.constant 0 : index
    %c0_26 = arith.constant 0 : index
    %32 = vector.load %arg7[%c0_24, %c0_25, %c0_26] : memref<2x64x32xf32, #tpu.memory_space<vmem>>, vector<2x64x32xf32>
    tpu.vector_store %arg7[%c0_24, %c0_25, %c0_26], %31 {strides = array<i32>} : memref<2x64x32xf32, #tpu.memory_space<vmem>>, vector<2x64x32xf32>,
    return
  }
  func.func @transform_0(%arg0: i32) -> (i32, i32, i32) {
    %c0_i32 = arith.constant 0 : i32
    %c0_i32_0 = arith.constant 0 : i32
    %c0_i32_1 = arith.constant 0 : i32
    return %arg0, %c0_i32, %c0_i32_0 : i32, i32, i32
  }
  func.func @transform_1(%arg0: i32) -> (i32, i32, i32) {
    %c0_i32 = arith.constant 0 : i32
    %c0_i32_0 = arith.constant 0 : i32
    %c0_i32_1 = arith.constant 0 : i32
    %c0_i32_2 = arith.constant 0 : i32
    return %c0_i32, %c0_i32_0, %c0_i32_1 : i32, i32, i32
  }
  func.func @transform_2(%arg0: i32) -> (i32, i32, i32) {
    %c0_i32 = arith.constant 0 : i32
    %c0_i32_0 = arith.constant 0 : i32
    %c0_i32_1 = arith.constant 0 : i32
    %c0_i32_2 = arith.constant 0 : i32
    return %c0_i32, %c0_i32_0, %c0_i32_1 : i32, i32, i32
  }
  func.func @transform_3(%arg0: i32) -> (i32, i32, i32) {
    %c0_i32 = arith.constant 0 : i32
    %c0_i32_0 = arith.constant 0 : i32
    %c0_i32_1 = arith.constant 0 : i32
    %c0_i32_2 = arith.constant 0 : i32
    return %c0_i32, %c0_i32_0, %c0_i32_1 : i32, i32, i32
  }
  func.func @transform_4(%arg0: i32) -> (i32, i32, i32) {
    %c0_i32 = arith.constant 0 : i32
    %c0_i32_0 = arith.constant 0 : i32
    %c0_i32_1 = arith.constant 0 : i32
    %c0_i32_2 = arith.constant 0 : i32
    return %c0_i32, %c0_i32_0, %c0_i32_1 : i32, i32, i32
  }
  func.func @transform_5(%arg0: i32) -> (i32, i32) {
    %c0_i32 = arith.constant 0 : i32
    %c0_i32_0 = arith.constant 0 : i32
    %c0_i32_1 = arith.constant 0 : i32
    return %c0_i32, %c0_i32_0 : i32, i32
  }
  func.func @transform_6(%arg0: i32) -> (i32, i32, i32) {
    %c0_i32 = arith.constant 0 : i32
    %c0_i32_0 = arith.constant 0 : i32
    %c0_i32_1 = arith.constant 0 : i32
    return %arg0, %c0_i32, %c0_i32_0 : i32, i32, i32
  }
}

</mosaic_0001>

<bundles_post_ra>
// kernel: tpu_custom_call.1
= control target key start
LH: loop header
LB: loop body
LE: loop exit
PB: predicated region body
PF: predicated region fallthrough
CT: control target
= control target key end

     0   :  { %vm55_vm0 = vcmask 261120   ;;  %vm1876_vm1 = vcmask 64512   ;;  %vm3101_vm3 = vcmask 523264   ;;  %s10584_s1 = inlined_call_operand.vmem [shape: f32[4,32,8], index: 1, kind: input, shape index: {}]   ;;  %s10585_s0 = inlined_call_operand.vmem [shape: f32[2,64,32], index: 0, kind: input, shape index: {}]   ;;  %s10586_s2 = inlined_call_operand.vmem [shape: f32[4,32,8], index: 2, kind: input, shape index: {}]   ;;  %s10587_s3 = inlined_call_operand.vmem [shape: f32[4,32,8], index: 3, kind: input, shape index: {}]   ;;  %s10588_s4 = inlined_call_operand.vmem [shape: f32[4,8,32], index: 4, kind: input, shape index: {}]   ;;  %s10589_s5 = inlined_call_operand.vmem [shape: f32[1,32], index: 5, kind: input, shape index: {}]   ;;  %s10590_s6 = inlined_call_operand.vmem [shape: f32[2,64,32], index: 6, kind: output, shape index: {}]  }
   0x1   :  { %v39_v0 = vld [vmem:[%s10584_s1] sm:$0xff]  ;;  %v40_v1 = vld [vmem:[%s10584_s1 + $0x8] sm:$0xff]  ;;  %v41_v2 = vld [vmem:[%s10584_s1 + $0x10] sm:$0xff] }
   0x2   :  { %v7718_v3 = vpack.c.bf16 %v40_v1, %v39_v0  ;;  %v42_v4 = vld [vmem:[%s10584_s1 + $0x18] sm:$0xff]  ;;  %v8440_v5 = vld [vmem:[%s10585_s0] sm:$0xff]  ;;  %v48_v8 = vld [vmem:[%s10584_s1 + $0x48] sm:$0xff] }
   0x3   :  { %v7722_v6 = vpack.c.bf16 %v42_v4, %v41_v2  ;;  %6790 = vmatprep.mubr.msk.f32.mxu0 %vm55_vm0, %v8440_v5  ;;  %v47_v7 = vld [vmem:[%s10584_s1 + $0x40] sm:$0xff]  ;;  %6822 = vmatprep.mubr.msk.f32.mxu1 %vm55_vm0, %v8440_v5  ;;  %v49_v10 = vld [vmem:[%s10584_s1 + $0x50] sm:$0xff]  ;;  %v50_v11 = vld [vmem:[%s10584_s1 + $0x58] sm:$0xff] }
   0x4   :  { %7719 = vmatprep.subr.bf16.mxu0 %v7718_v3  ;;  %v7734_v9 = vpack.c.bf16 %v48_v8, %v47_v7  ;;  %v43_v12 = vld [vmem:[%s10584_s1 + $0x20] sm:$0xff]  ;;  %v44_v13 = vld [vmem:[%s10584_s1 + $0x28] sm:$0xff]  ;;  %v45_v16 = vld [vmem:[%s10584_s1 + $0x30] sm:$0xff]  ;;  %v7738_v18 = vpack.c.bf16 %v50_v11, %v49_v10 }
   0x5   :  { %7721 = vmatpush3.bf16.msra.mxu0 %v7718_v3  ;;  %v8467_v14 = vld [vmem:[%s10585_s0 + $0x8] sm:$0xff]  ;;  %v7726_v15 = vpack.c.bf16 %v44_v13, %v43_v12  ;;  %v8475_v17 = vld [vmem:[%s10585_s0 + $0x10] sm:$0xff]  ;;  %v46_v19 = vld [vmem:[%s10584_s1 + $0x38] sm:$0xff] }
   0x6   :  { %7723 = vmatprep.subr.bf16.mxu0 %v7722_v6  ;;  %v51_v20 = vld [vmem:[%s10584_s1 + $0x60] sm:$0xff]  ;;  %v7730_v21 = vpack.c.bf16 %v46_v19, %v45_v16  ;;  %v52_v22 = vld [vmem:[%s10584_s1 + $0x68] sm:$0xff]  ;;  %v8499_v25 = vld [vmem:[%s10585_s0 + $0x18] sm:$0xff] }
   0x7   :  { %7727 = vmatprep.subr.bf16.mxu1 %v7726_v15  ;;  %v684_v23 = vld [vmem:[%s10586_s2] sm:$0xff]  ;;  %v685_v24 = vld [vmem:[%s10586_s2 + $0x8] sm:$0xff]  ;;  %v7742_v27 = vpack.c.bf16 %v52_v22, %v51_v20  ;;  %v53_v29 = vld [vmem:[%s10584_s1 + $0x70] sm:$0xff] }
   0x8   :  { %7729 = vmatpush3.bf16.msra.mxu1 %v7726_v15  ;;  %v8504_v26 = vld [vmem:[%s10585_s0 + $0x20] sm:$0xff]  ;;  %v7750_v28 = vpack.c.bf16 %v685_v24, %v684_v23  ;;  %v54_v30 = vld [vmem:[%s10584_s1 + $0x78] sm:$0xff]  ;;  %v8519_v31 = vld [vmem:[%s10585_s0 + $0x28] sm:$0xff] }
   0x9   :  { %7725 = vmatpush3.bf16.msra.mxu0 %v7722_v6  ;;  %7731 = vmatprep.subr.bf16.mxu1 %v7730_v21  ;;  %v8524_v32 = vld [vmem:[%s10585_s0 + $0x30] sm:$0xff]  ;;  %v7746_v33 = vpack.c.bf16 %v54_v30, %v53_v29  ;;  %v688_v34 = vld [vmem:[%s10586_s2 + $0x20] sm:$0xff]  ;;  %v689_v35 = vld [vmem:[%s10586_s2 + $0x28] sm:$0xff] }
   0xa   :  { %7735 = vmatprep.subr.bf16.mxu0 %v7734_v9  ;;  %v8541_v36 = vld [vmem:[%s10585_s0 + $0x38] sm:$0xff]  ;;  %v8548_v37 = vld [vmem:[%s10585_s0 + $0x40] sm:$0xff]  ;;  %v7758_v38 = vpack.c.bf16 %v689_v35, %v688_v34  ;;  %v8561_v39 = vld [vmem:[%s10585_s0 + $0x48] sm:$0xff] }
   0xb   :  { %v8566_v40 = vld [vmem:[%s10585_s0 + $0x50] sm:$0xff]  ;;  %v8579_v41 = vld [vmem:[%s10585_s0 + $0x58] sm:$0xff]  ;;  %v8584_v42 = vld [vmem:[%s10585_s0 + $0x60] sm:$0xff] }
   0xc   :  { %6791 = vmatmul.mubr.msk.f32.vlgmr.msra.gmra.mrb[0].mxu0 %vm55_vm0, %v8467_v14  ;;  %7733 = vmatpush3.bf16.msra.mxu1 %v7730_v21  ;;  %v8597_v43 = vld [vmem:[%s10585_s0 + $0x68] sm:$0xff]  ;;  %v8602_v44 = vld [vmem:[%s10585_s0 + $0x70] sm:$0xff]  ;;  %v8615_v45 = vld [vmem:[%s10585_s0 + $0x78] sm:$0xff] }
   0xd   :  { %7737 = vmatpush3.bf16.msra.mxu0 %v7734_v9  ;;  %6793 = vmatprep.mubr.msk.f32.mxu0 %vm55_vm0, %v8475_v17  ;;  %v686_v46 = vld [vmem:[%s10586_s2 + $0x10] sm:$0xff]  ;;  %v687_v47 = vld [vmem:[%s10586_s2 + $0x18] sm:$0xff]  ;;  %v692_v49 = vld [vmem:[%s10586_s2 + $0x40] sm:$0xff] }
   0xe   :  { %7739 = vmatprep.subr.bf16.mxu0 %v7738_v18  ;;  %7743 = vmatprep.subr.bf16.mxu1 %v7742_v27  ;;  %v7754_v48 = vpack.c.bf16 %v687_v47, %v686_v46  ;;  %v693_v50 = vld [vmem:[%s10586_s2 + $0x48] sm:$0xff]  ;;  %v690_v52 = vld [vmem:[%s10586_s2 + $0x30] sm:$0xff]  ;;  %v691_v53 = vld [vmem:[%s10586_s2 + $0x38] sm:$0xff] }
   0xf   :  { %6823 = vmatmul.mubr.msk.f32.vlgmr.msra.gmra.mrb[0].mxu1 %vm55_vm0, %v8467_v14  ;;  %v7766_v51 = vpack.c.bf16 %v693_v50, %v692_v49  ;;  %v7762_v54 = vpack.c.bf16 %v691_v53, %v690_v52  ;;  %v696_v55 = vld [vmem:[%s10586_s2 + $0x60] sm:$0xff]  ;;  %v697_v56 = vld [vmem:[%s10586_s2 + $0x68] sm:$0xff]  ;;  %v694_v58 = vld [vmem:[%s10586_s2 + $0x50] sm:$0xff] }
  0x10   :  { %6794 = vmatmul.mubr.msk.f32.gmra.mrb[2].mxu0 %vm55_vm0, %v8499_v25  ;;  %7745 = vmatpush3.bf16.msra.mxu1 %v7742_v27  ;;  %v7774_v57 = vpack.c.bf16 %v697_v56, %v696_v55  ;;  %v695_v59 = vld [vmem:[%s10586_s2 + $0x58] sm:$0xff]  ;;  %v1280_v61 = vld [vmem:[%s10587_s3] sm:$0xff]  ;;  %v1281_v62 = vld [vmem:[%s10587_s3 + $0x8] sm:$0xff] }
  0x11   :  { %6796 = vmatprep.mubr.msk.f32.mxu0 %vm55_vm0, %v8504_v26  ;;  %7741 = vmatpush3.bf16.msra.mxu0 %v7738_v18  ;;  %v7770_v60 = vpack.c.bf16 %v695_v59, %v694_v58  ;;  %v7782_v63 = vpack.c.bf16 %v1281_v62, %v1280_v61  ;;  %v698_v0 = vld [vmem:[%s10586_s2 + $0x70] sm:$0xff]  ;;  %v699_v1 = vld [vmem:[%s10586_s2 + $0x78] sm:$0xff]  ;;  %v1284_v3 = vld [vmem:[%s10587_s3 + $0x20] sm:$0xff] }
  0x12   :  { %7751 = vmatprep.subr.bf16.mxu0 %v7750_v28  ;;  %6825 = vmatprep.mubr.msk.f32.mxu1 %vm55_vm0, %v8475_v17  ;;  %v7778_v2 = vpack.c.bf16 %v699_v1, %v698_v0  ;;  %v1285_v4 = vld [vmem:[%s10587_s3 + $0x28] sm:$0xff]  ;;  %v1282_v7 = vld [vmem:[%s10587_s3 + $0x10] sm:$0xff]  ;;  %v1283_v8 = vld [vmem:[%s10587_s3 + $0x18] sm:$0xff] }
  0x13   :  { %7747 = vmatprep.subr.bf16.mxu1 %v7746_v33  ;;  %6826 = vmatmul.mubr.msk.f32.gmra.mrb[2].mxu1 %vm55_vm0, %v8499_v25  ;;  %v7790_v6 = vpack.c.bf16 %v1285_v4, %v1284_v3  ;;  %v7786_v9 = vpack.c.bf16 %v1283_v8, %v1282_v7  ;;  %v1288_v10 = vld [vmem:[%s10587_s3 + $0x40] sm:$0xff]  ;;  %v1289_v11 = vld [vmem:[%s10587_s3 + $0x48] sm:$0xff]  ;;  %v1286_v13 = vld [vmem:[%s10587_s3 + $0x30] sm:$0xff] }
  0x14   :  { %6797 = vmatmul.mubr.msk.f32.gmra.mrb[4].mxu0 %vm55_vm0, %v8519_v31  ;;  %6828 = vmatprep.mubr.msk.f32.mxu1 %vm55_vm0, %v8504_v26  ;;  %v7798_v12 = vpack.c.bf16 %v1289_v11, %v1288_v10  ;;  %v1287_v15 = vld [vmem:[%s10587_s3 + $0x38] sm:$0xff]  ;;  %v1292_v18 = vld [vmem:[%s10587_s3 + $0x60] sm:$0xff]  ;;  %v1293_v19 = vld [vmem:[%s10587_s3 + $0x68] sm:$0xff] }
  0x15   :  { %6799 = vmatprep.mubr.msk.f32.mxu0 %vm55_vm0, %v8524_v32  ;;  %7749 = vmatpush3.bf16.msra.mxu1 %v7746_v33  ;;  %v7794_v16 = vpack.c.bf16 %v1287_v15, %v1286_v13  ;;  %v7806_v20 = vpack.c.bf16 %v1293_v19, %v1292_v18  ;;  %v1290_v21 = vld [vmem:[%s10587_s3 + $0x50] sm:$0xff]  ;;  %v1291_v22 = vld [vmem:[%s10587_s3 + $0x58] sm:$0xff]  ;;  %vm9157_vm2 = vmpackc.low %vm1876_vm1, %vm1876_vm1 }
  0x16   :  { %7759 = vmatprep.subr.bf16.mxu1 %v7758_v38  ;;  %v7802_v23 = vpack.c.bf16 %v1291_v22, %v1290_v21  ;;  %v1294_v24 = vld [vmem:[%s10587_s3 + $0x70] sm:$0xff]  ;;  %v1295_v27 = vld [vmem:[%s10587_s3 + $0x78] sm:$0xff] }
  0x17   :  { %6829 = vmatmul.mubr.msk.f32.gmra.mrb[4].mxu1 %vm55_vm0, %v8519_v31 }
  0x18   :  { %6800 = vmatmul.mubr.msk.f32.gmra.mrb[6].mxu0 %vm55_vm0, %v8541_v36  ;;  %6831 = vmatprep.mubr.msk.f32.mxu1 %vm55_vm0, %v8524_v32 }
  0x19   :  { %6802 = vmatprep.mubr.msk.f32.mxu0 %vm55_vm0, %v8548_v37 }
  0x1b   :  { %6832 = vmatmul.mubr.msk.f32.gmra.mrb[6].mxu1 %vm55_vm0, %v8541_v36 }
  0x1c   :  { %6803 = vmatmul.mubr.msk.f32.gmra.mrb[8].mxu0 %vm55_vm0, %v8561_v39  ;;  %6834 = vmatprep.mubr.msk.f32.mxu1 %vm55_vm0, %v8548_v37 }
  0x1d   :  { %6805 = vmatprep.mubr.msk.f32.mxu0 %vm55_vm0, %v8566_v40 }
  0x1f   :  { %6835 = vmatmul.mubr.msk.f32.gmra.mrb[8].mxu1 %vm55_vm0, %v8561_v39 }
  0x20   :  { %6806 = vmatmul.mubr.msk.f32.gmra.mrb[10].mxu0 %vm55_vm0, %v8579_v41  ;;  %6837 = vmatprep.mubr.msk.f32.mxu1 %vm55_vm0, %v8566_v40 }
  0x21   :  { %6808 = vmatprep.mubr.msk.f32.mxu0 %vm55_vm0, %v8584_v42 }
  0x23   :  { %6838 = vmatmul.mubr.msk.f32.gmra.mrb[10].mxu1 %vm55_vm0, %v8579_v41 }
  0x24   :  { %6809 = vmatmul.mubr.msk.f32.gmra.mrb[12].mxu0 %vm55_vm0, %v8597_v43  ;;  %6840 = vmatprep.mubr.msk.f32.mxu1 %vm55_vm0, %v8584_v42 }
  0x25   :  { %6811 = vmatprep.mubr.msk.f32.mxu0 %vm55_vm0, %v8602_v44 }
  0x27   :  { %6841 = vmatmul.mubr.msk.f32.gmra.mrb[12].mxu1 %vm55_vm0, %v8597_v43 }
  0x28   :  { %6812 = vmatmul.mubr.msk.f32.gmra.mrb[14].mxu0 %vm55_vm0, %v8615_v45  ;;  %6843 = vmatprep.mubr.msk.f32.mxu1 %vm55_vm0, %v8602_v44 }
  0x29   :  { %6854 = vmatprep.mubr.msk.f32.mxu0 %vm55_vm0, %v8440_v5 }
  0x2b   :  { %6844 = vmatmul.mubr.msk.f32.gmra.mrb[14].mxu1 %vm55_vm0, %v8615_v45 }
  0x2c   :  { %6855 = vmatmul.mubr.msk.f32.vlgmr.msra.gmra.mrb[16].mxu0 %vm55_vm0, %v8467_v14  ;;  %6886 = vmatprep.mubr.msk.f32.mxu1 %vm55_vm0, %v8440_v5 }
  0x2d   :  { %7753 = vmatpush3.bf16.msra.mxu0 %v7750_v28  ;;  %6857 = vmatprep.mubr.msk.f32.mxu0 %vm55_vm0, %v8475_v17  ;;  %v7810_v28 = vpack.c.bf16 %v1295_v27, %v1294_v24 }
  0x2e   :  { %7755 = vmatprep.subr.bf16.mxu0 %v7754_v48 }
  0x2f   :  { %6887 = vmatmul.mubr.msk.f32.vlgmr.msra.gmra.mrb[16].mxu1 %vm55_vm0, %v8467_v14 }
  0x30   :  { %6858 = vmatmul.mubr.msk.f32.gmra.mrb[18].mxu0 %vm55_vm0, %v8499_v25  ;;  %7761 = vmatpush3.bf16.msra.mxu1 %v7758_v38 }
  0x31   :  { %6860 = vmatprep.mubr.msk.f32.mxu0 %vm55_vm0, %v8504_v26  ;;  %7757 = vmatpush3.bf16.msra.mxu0 %v7754_v48 }
  0x32   :  { %7767 = vmatprep.subr.bf16.mxu0 %v7766_v51  ;;  %6889 = vmatprep.mubr.msk.f32.mxu1 %vm55_vm0, %v8475_v17 }
  0x33   :  { %7763 = vmatprep.subr.bf16.mxu1 %v7762_v54  ;;  %6890 = vmatmul.mubr.msk.f32.gmra.mrb[18].mxu1 %vm55_vm0, %v8499_v25 }
  0x34   :  { %6861 = vmatmul.mubr.msk.f32.gmra.mrb[20].mxu0 %vm55_vm0, %v8519_v31  ;;  %6892 = vmatprep.mubr.msk.f32.mxu1 %vm55_vm0, %v8504_v26 }
  0x35   :  { %6863 = vmatprep.mubr.msk.f32.mxu0 %vm55_vm0, %v8524_v32  ;;  %7765 = vmatpush3.bf16.msra.mxu1 %v7762_v54 }
  0x36   :  { %7775 = vmatprep.subr.bf16.mxu1 %v7774_v57 }
  0x37   :  { %6893 = vmatmul.mubr.msk.f32.gmra.mrb[20].mxu1 %vm55_vm0, %v8519_v31 }
  0x38   :  { %6864 = vmatmul.mubr.msk.f32.gmra.mrb[22].mxu0 %vm55_vm0, %v8541_v36  ;;  %6895 = vmatprep.mubr.msk.f32.mxu1 %vm55_vm0, %v8524_v32 }
  0x39   :  { %6866 = vmatprep.mubr.msk.f32.mxu0 %vm55_vm0, %v8548_v37 }
  0x3b   :  { %6896 = vmatmul.mubr.msk.f32.gmra.mrb[22].mxu1 %vm55_vm0, %v8541_v36 }
  0x3c   :  { %6867 = vmatmul.mubr.msk.f32.gmra.mrb[24].mxu0 %vm55_vm0, %v8561_v39  ;;  %6898 = vmatprep.mubr.msk.f32.mxu1 %vm55_vm0, %v8548_v37 }
  0x3d   :  { %6869 = vmatprep.mubr.msk.f32.mxu0 %vm55_vm0, %v8566_v40 }
  0x3f   :  { %6899 = vmatmul.mubr.msk.f32.gmra.mrb[24].mxu1 %vm55_vm0, %v8561_v39 }
  0x40   :  { %6870 = vmatmul.mubr.msk.f32.gmra.mrb[26].mxu0 %vm55_vm0, %v8579_v41  ;;  %6901 = vmatprep.mubr.msk.f32.mxu1 %vm55_vm0, %v8566_v40 }
  0x41   :  { %6872 = vmatprep.mubr.msk.f32.mxu0 %vm55_vm0, %v8584_v42 }
  0x43   :  { %6902 = vmatmul.mubr.msk.f32.gmra.mrb[26].mxu1 %vm55_vm0, %v8579_v41 }
  0x44   :  { %6873 = vmatmul.mubr.msk.f32.gmra.mrb[28].mxu0 %vm55_vm0, %v8597_v43  ;;  %6904 = vmatprep.mubr.msk.f32.mxu1 %vm55_vm0, %v8584_v42 }
  0x45   :  { %6875 = vmatprep.mubr.msk.f32.mxu0 %vm55_vm0, %v8602_v44 }
  0x47   :  { %6905 = vmatmul.mubr.msk.f32.gmra.mrb[28].mxu1 %vm55_vm0, %v8597_v43 }
  0x48   :  { %6876 = vmatmul.mubr.msk.f32.gmra.mrb[30].mxu0 %vm55_vm0, %v8615_v45  ;;  %6907 = vmatprep.mubr.msk.f32.mxu1 %vm55_vm0, %v8602_v44 }
  0x49   :  { %6918 = vmatprep.mubr.msk.f32.mxu0 %vm55_vm0, %v8440_v5 }
  0x4b   :  { %6908 = vmatmul.mubr.msk.f32.gmra.mrb[30].mxu1 %vm55_vm0, %v8615_v45 }
  0x4c   :  { %6919 = vmatmul.mubr.msk.f32.vlgmr.msra.gmra.mrb[32].mxu0 %vm55_vm0, %v8467_v14  ;;  %6950 = vmatprep.mubr.msk.f32.mxu1 %vm55_vm0, %v8440_v5 }
  0x4d   :  { %6921 = vmatprep.mubr.msk.f32.mxu0 %vm55_vm0, %v8475_v17  ;;  %7769 = vmatpush3.bf16.msra.mxu0 %v7766_v51 }
  0x4e   :  { %7771 = vmatprep.subr.bf16.mxu0 %v7770_v60 }
  0x4f   :  { %6951 = vmatmul.mubr.msk.f32.vlgmr.msra.gmra.mrb[32].mxu1 %vm55_vm0, %v8467_v14 }
  0x50   :  { %6922 = vmatmul.mubr.msk.f32.gmra.mrb[34].mxu0 %vm55_vm0, %v8499_v25  ;;  %6953 = vmatprep.mubr.msk.f32.mxu1 %vm55_vm0, %v8475_v17 }
  0x51   :  { %6924 = vmatprep.mubr.msk.f32.mxu0 %vm55_vm0, %v8504_v26  ;;  %7773 = vmatpush3.bf16.msra.mxu0 %v7770_v60 }
  0x52   :  { %7783 = vmatprep.subr.bf16.mxu0 %v7782_v63  ;;  %7777 = vmatpush3.bf16.msra.mxu1 %v7774_v57 }
  0x53   :  { %7779 = vmatprep.subr.bf16.mxu1 %v7778_v2  ;;  %6954 = vmatmul.mubr.msk.f32.gmra.mrb[34].mxu1 %vm55_vm0, %v8499_v25 }
  0x54   :  { %6925 = vmatmul.mubr.msk.f32.gmra.mrb[36].mxu0 %vm55_vm0, %v8519_v31  ;;  %6956 = vmatprep.mubr.msk.f32.mxu1 %vm55_vm0, %v8504_v26 }
  0x55   :  { %6927 = vmatprep.mubr.msk.f32.mxu0 %vm55_vm0, %v8524_v32 }
  0x56   :  { %7781 = vmatpush3.bf16.msra.mxu1 %v7778_v2 }
  0x57   :  { %7791 = vmatprep.subr.bf16.mxu1 %v7790_v6  ;;  %6957 = vmatmul.mubr.msk.f32.gmra.mrb[36].mxu1 %vm55_vm0, %v8519_v31 }
  0x58   :  { %6928 = vmatmul.mubr.msk.f32.gmra.mrb[38].mxu0 %vm55_vm0, %v8541_v36  ;;  %6959 = vmatprep.mubr.msk.f32.mxu1 %vm55_vm0, %v8524_v32 }
  0x59   :  { %6930 = vmatprep.mubr.msk.f32.mxu0 %vm55_vm0, %v8548_v37 }
  0x5b   :  { %6960 = vmatmul.mubr.msk.f32.gmra.mrb[38].mxu1 %vm55_vm0, %v8541_v36 }
  0x5c   :  { %6931 = vmatmul.mubr.msk.f32.gmra.mrb[40].mxu0 %vm55_vm0, %v8561_v39  ;;  %6962 = vmatprep.mubr.msk.f32.mxu1 %vm55_vm0, %v8548_v37 }
  0x5d   :  { %6933 = vmatprep.mubr.msk.f32.mxu0 %vm55_vm0, %v8566_v40 }
  0x5f   :  { %6963 = vmatmul.mubr.msk.f32.gmra.mrb[40].mxu1 %vm55_vm0, %v8561_v39 }
  0x60   :  { %6934 = vmatmul.mubr.msk.f32.gmra.mrb[42].mxu0 %vm55_vm0, %v8579_v41  ;;  %6965 = vmatprep.mubr.msk.f32.mxu1 %vm55_vm0, %v8566_v40 }
  0x61   :  { %6936 = vmatprep.mubr.msk.f32.mxu0 %vm55_vm0, %v8584_v42 }
  0x63   :  { %6966 = vmatmul.mubr.msk.f32.gmra.mrb[42].mxu1 %vm55_vm0, %v8579_v41 }
  0x64   :  { %6937 = vmatmul.mubr.msk.f32.gmra.mrb[44].mxu0 %vm55_vm0, %v8597_v43  ;;  %6968 = vmatprep.mubr.msk.f32.mxu1 %vm55_vm0, %v8584_v42 }
  0x65   :  { %6939 = vmatprep.mubr.msk.f32.mxu0 %vm55_vm0, %v8602_v44 }
  0x67   :  { %6969 = vmatmul.mubr.msk.f32.gmra.mrb[44].mxu1 %vm55_vm0, %v8597_v43 }
  0x68   :  { %6940 = vmatmul.mubr.msk.f32.gmra.mrb[46].mxu0 %vm55_vm0, %v8615_v45  ;;  %6971 = vmatprep.mubr.msk.f32.mxu1 %vm55_vm0, %v8602_v44 }
  0x69   :  { %6982 = vmatprep.mubr.msk.f32.mxu0 %vm55_vm0, %v8440_v5 }
  0x6b   :  { %6972 = vmatmul.mubr.msk.f32.gmra.mrb[46].mxu1 %vm55_vm0, %v8615_v45 }
  0x6c   :  { %6983 = vmatmul.mubr.msk.f32.vlgmr.msra.gmra.mrb[48].mxu0 %vm55_vm0, %v8467_v14  ;;  %7014 = vmatprep.mubr.msk.f32.mxu1 %vm55_vm0, %v8440_v5 }
  0x6d   :  { %6985 = vmatprep.mubr.msk.f32.mxu0 %vm55_vm0, %v8475_v17  ;;  %7785 = vmatpush3.bf16.msra.mxu0 %v7782_v63 }
  0x6e   :  { %7787 = vmatprep.subr.bf16.mxu0 %v7786_v9 }
  0x6f   :  { %7015 = vmatmul.mubr.msk.f32.vlgmr.msra.gmra.mrb[48].mxu1 %vm55_vm0, %v8467_v14 }
  0x70   :  { %6986 = vmatmul.mubr.msk.f32.gmra.mrb[50].mxu0 %vm55_vm0, %v8499_v25  ;;  %7017 = vmatprep.mubr.msk.f32.mxu1 %vm55_vm0, %v8475_v17 }
  0x71   :  { %6988 = vmatprep.mubr.msk.f32.mxu0 %vm55_vm0, %v8504_v26  ;;  %7789 = vmatpush3.bf16.msra.mxu0 %v7786_v9 }
  0x72   :  { %7799 = vmatprep.subr.bf16.mxu0 %v7798_v12  ;;  %7793 = vmatpush3.bf16.msra.mxu1 %v7790_v6 }
  0x73   :  { %7795 = vmatprep.subr.bf16.mxu1 %v7794_v16  ;;  %7018 = vmatmul.mubr.msk.f32.gmra.mrb[50].mxu1 %vm55_vm0, %v8499_v25 }
  0x74   :  { %6989 = vmatmul.mubr.msk.f32.gmra.mrb[52].mxu0 %vm55_vm0, %v8519_v31  ;;  %7020 = vmatprep.mubr.msk.f32.mxu1 %vm55_vm0, %v8504_v26 }
  0x75   :  { %6991 = vmatprep.mubr.msk.f32.mxu0 %vm55_vm0, %v8524_v32 }
  0x76   :  { %7797 = vmatpush3.bf16.msra.mxu1 %v7794_v16 }
  0x77   :  { %7807 = vmatprep.subr.bf16.mxu1 %v7806_v20  ;;  %7021 = vmatmul.mubr.msk.f32.gmra.mrb[52].mxu1 %vm55_vm0, %v8519_v31 }
  0x78   :  { %6992 = vmatmul.mubr.msk.f32.gmra.mrb[54].mxu0 %vm55_vm0, %v8541_v36  ;;  %7023 = vmatprep.mubr.msk.f32.mxu1 %vm55_vm0, %v8524_v32 }
  0x79   :  { %6994 = vmatprep.mubr.msk.f32.mxu0 %vm55_vm0, %v8548_v37 }
  0x7b   :  { %7024 = vmatmul.mubr.msk.f32.gmra.mrb[54].mxu1 %vm55_vm0, %v8541_v36 }
  0x7c   :  { %6995 = vmatmul.mubr.msk.f32.gmra.mrb[56].mxu0 %vm55_vm0, %v8561_v39  ;;  %7026 = vmatprep.mubr.msk.f32.mxu1 %vm55_vm0, %v8548_v37 }
  0x7d   :  { %6997 = vmatprep.mubr.msk.f32.mxu0 %vm55_vm0, %v8566_v40 }
  0x7f   :  { %7027 = vmatmul.mubr.msk.f32.gmra.mrb[56].mxu1 %vm55_vm0, %v8561_v39 }
  0x80   :  { %6998 = vmatmul.mubr.msk.f32.gmra.mrb[58].mxu0 %vm55_vm0, %v8579_v41  ;;  %7029 = vmatprep.mubr.msk.f32.mxu1 %vm55_vm0, %v8566_v40 }
  0x81   :  { %7000 = vmatprep.mubr.msk.f32.mxu0 %vm55_vm0, %v8584_v42 }
  0x83   :  { %7030 = vmatmul.mubr.msk.f32.gmra.mrb[58].mxu1 %vm55_vm0, %v8579_v41 }
  0x84   :  { %7001 = vmatmul.mubr.msk.f32.gmra.mrb[60].mxu0 %vm55_vm0, %v8597_v43  ;;  %7032 = vmatprep.mubr.msk.f32.mxu1 %vm55_vm0, %v8584_v42 }
  0x85   :  { %7003 = vmatprep.mubr.msk.f32.mxu0 %vm55_vm0, %v8602_v44 }
  0x87   :  { %7033 = vmatmul.mubr.msk.f32.gmra.mrb[60].mxu1 %vm55_vm0, %v8597_v43 }
  0x88   :  { %7004 = vmatmul.mubr.msk.f32.gmra.mrb[62].mxu0 %vm55_vm0, %v8615_v45  ;;  %7035 = vmatprep.mubr.msk.f32.mxu1 %vm55_vm0, %v8602_v44 }
  0x89   :  { %7046 = vmatprep.mubr.msk.f32.mxu0 %vm55_vm0, %v8440_v5 }
  0x8b   :  { %7036 = vmatmul.mubr.msk.f32.gmra.mrb[62].mxu1 %vm55_vm0, %v8615_v45 }
  0x8c   :  { %7047 = vmatmul.mubr.msk.f32.vlgmr.msra.gmra.mrb[64].mxu0 %vm55_vm0, %v8467_v14  ;;  %7078 = vmatprep.mubr.msk.f32.mxu1 %vm55_vm0, %v8440_v5 }
  0x8d   :  { %7049 = vmatprep.mubr.msk.f32.mxu0 %vm55_vm0, %v8475_v17  ;;  %7801 = vmatpush3.bf16.msra.mxu0 %v7798_v12 }
  0x8e   :  { %7803 = vmatprep.subr.bf16.mxu0 %v7802_v23 }
  0x8f   :  { %7079 = vmatmul.mubr.msk.f32.vlgmr.msra.gmra.mrb[64].mxu1 %vm55_vm0, %v8467_v14 }
  0x90   :  { %7050 = vmatmul.mubr.msk.f32.gmra.mrb[66].mxu0 %vm55_vm0, %v8499_v25  ;;  %7081 = vmatprep.mubr.msk.f32.mxu1 %vm55_vm0, %v8475_v17 }
  0x91   :  { %7052 = vmatprep.mubr.msk.f32.mxu0 %vm55_vm0, %v8504_v26  ;;  %7805 = vmatpush3.bf16.msra.mxu0 %v7802_v23 }
  0x92   :  { %7809 = vmatpush3.bf16.msra.mxu1 %v7806_v20 }
  0x93   :  { %7811 = vmatprep.subr.bf16.mxu1 %v7810_v28  ;;  %7082 = vmatmul.mubr.msk.f32.gmra.mrb[66].mxu1 %vm55_vm0, %v8499_v25 }
  0x94   :  { %7053 = vmatmul.mubr.msk.f32.gmra.mrb[68].mxu0 %vm55_vm0, %v8519_v31  ;;  %7084 = vmatprep.mubr.msk.f32.mxu1 %vm55_vm0, %v8504_v26 }
  0x95   :  { %7055 = vmatprep.mubr.msk.f32.mxu0 %vm55_vm0, %v8524_v32 }
  0x96   :  { %7813 = vmatpush3.bf16.msra.mxu1 %v7810_v28 }
  0x97   :  { %7085 = vmatmul.mubr.msk.f32.gmra.mrb[68].mxu1 %vm55_vm0, %v8519_v31 }
  0x98   :  { %7056 = vmatmul.mubr.msk.f32.gmra.mrb[70].mxu0 %vm55_vm0, %v8541_v36  ;;  %7087 = vmatprep.mubr.msk.f32.mxu1 %vm55_vm0, %v8524_v32 }
  0x99   :  { %7058 = vmatprep.mubr.msk.f32.mxu0 %vm55_vm0, %v8548_v37 }
  0x9b   :  { %7088 = vmatmul.mubr.msk.f32.gmra.mrb[70].mxu1 %vm55_vm0, %v8541_v36 }
  0x9c   :  { %7059 = vmatmul.mubr.msk.f32.gmra.mrb[72].mxu0 %vm55_vm0, %v8561_v39  ;;  %7090 = vmatprep.mubr.msk.f32.mxu1 %vm55_vm0, %v8548_v37 }
  0x9d   :  { %7061 = vmatprep.mubr.msk.f32.mxu0 %vm55_vm0, %v8566_v40 }
  0x9f   :  { %7091 = vmatmul.mubr.msk.f32.gmra.mrb[72].mxu1 %vm55_vm0, %v8561_v39 }
  0xa0   :  { %7062 = vmatmul.mubr.msk.f32.gmra.mrb[74].mxu0 %vm55_vm0, %v8579_v41  ;;  %7093 = vmatprep.mubr.msk.f32.mxu1 %vm55_vm0, %v8566_v40 }
  0xa1   :  { %7064 = vmatprep.mubr.msk.f32.mxu0 %vm55_vm0, %v8584_v42 }
  0xa3   :  { %7094 = vmatmul.mubr.msk.f32.gmra.mrb[74].mxu1 %vm55_vm0, %v8579_v41 }
  0xa4   :  { %7065 = vmatmul.mubr.msk.f32.gmra.mrb[76].mxu0 %vm55_vm0, %v8597_v43  ;;  %7096 = vmatprep.mubr.msk.f32.mxu1 %vm55_vm0, %v8584_v42 }
  0xa5   :  { %7067 = vmatprep.mubr.msk.f32.mxu0 %vm55_vm0, %v8602_v44 }
  0xa7   :  { %7097 = vmatmul.mubr.msk.f32.gmra.mrb[76].mxu1 %vm55_vm0, %v8597_v43 }
  0xa8   :  { %7068 = vmatmul.mubr.msk.f32.gmra.mrb[78].mxu0 %vm55_vm0, %v8615_v45  ;;  %7099 = vmatprep.mubr.msk.f32.mxu1 %vm55_vm0, %v8602_v44 }
  0xa9   :  { %7110 = vmatprep.mubr.msk.f32.mxu0 %vm55_vm0, %v8440_v5 }
  0xab   :  { %7100 = vmatmul.mubr.msk.f32.gmra.mrb[78].mxu1 %vm55_vm0, %v8615_v45 }
  0xac   :  { %7111 = vmatmul.mubr.msk.f32.vlgmr.msra.gmra.mrb[80].mxu0 %vm55_vm0, %v8467_v14  ;;  %7142 = vmatprep.mubr.msk.f32.mxu1 %vm55_vm0, %v8440_v5 }
  0xad   :  { %7113 = vmatprep.mubr.msk.f32.mxu0 %vm55_vm0, %v8475_v17 }
  0xaf   :  { %7143 = vmatmul.mubr.msk.f32.vlgmr.msra.gmra.mrb[80].mxu1 %vm55_vm0, %v8467_v14 }
  0xb0   :  { %7114 = vmatmul.mubr.msk.f32.gmra.mrb[82].mxu0 %vm55_vm0, %v8499_v25  ;;  %7145 = vmatprep.mubr.msk.f32.mxu1 %vm55_vm0, %v8475_v17 }
  0xb1   :  { %7116 = vmatprep.mubr.msk.f32.mxu0 %vm55_vm0, %v8504_v26 }
  0xb3   :  { %7146 = vmatmul.mubr.msk.f32.gmra.mrb[82].mxu1 %vm55_vm0, %v8499_v25 }
  0xb4   :  { %7117 = vmatmul.mubr.msk.f32.gmra.mrb[84].mxu0 %vm55_vm0, %v8519_v31  ;;  %7148 = vmatprep.mubr.msk.f32.mxu1 %vm55_vm0, %v8504_v26 }
  0xb5   :  { %7119 = vmatprep.mubr.msk.f32.mxu0 %vm55_vm0, %v8524_v32 }
  0xb7   :  { %7149 = vmatmul.mubr.msk.f32.gmra.mrb[84].mxu1 %vm55_vm0, %v8519_v31 }
  0xb8   :  { %7120 = vmatmul.mubr.msk.f32.gmra.mrb[86].mxu0 %vm55_vm0, %v8541_v36  ;;  %7151 = vmatprep.mubr.msk.f32.mxu1 %vm55_vm0, %v8524_v32 }
  0xb9   :  { %7122 = vmatprep.mubr.msk.f32.mxu0 %vm55_vm0, %v8548_v37 }
  0xbb   :  { %7152 = vmatmul.mubr.msk.f32.gmra.mrb[86].mxu1 %vm55_vm0, %v8541_v36 }
  0xbc   :  { %7123 = vmatmul.mubr.msk.f32.gmra.mrb[88].mxu0 %vm55_vm0, %v8561_v39  ;;  %7154 = vmatprep.mubr.msk.f32.mxu1 %vm55_vm0, %v8548_v37 }
  0xbd   :  { %7125 = vmatprep.mubr.msk.f32.mxu0 %vm55_vm0, %v8566_v40 }
  0xbf   :  { %7155 = vmatmul.mubr.msk.f32.gmra.mrb[88].mxu1 %vm55_vm0, %v8561_v39 }
  0xc0   :  { %7126 = vmatmul.mubr.msk.f32.gmra.mrb[90].mxu0 %vm55_vm0, %v8579_v41  ;;  %7157 = vmatprep.mubr.msk.f32.mxu1 %vm55_vm0, %v8566_v40 }
  0xc1   :  { %7128 = vmatprep.mubr.msk.f32.mxu0 %vm55_vm0, %v8584_v42 }
  0xc3   :  { %7158 = vmatmul.mubr.msk.f32.gmra.mrb[90].mxu1 %vm55_vm0, %v8579_v41 }
  0xc4   :  { %7129 = vmatmul.mubr.msk.f32.gmra.mrb[92].mxu0 %vm55_vm0, %v8597_v43  ;;  %7160 = vmatprep.mubr.msk.f32.mxu1 %vm55_vm0, %v8584_v42 }
  0xc5   :  { %7131 = vmatprep.mubr.msk.f32.mxu0 %vm55_vm0, %v8602_v44 }
  0xc7   :  { %7161 = vmatmul.mubr.msk.f32.gmra.mrb[92].mxu1 %vm55_vm0, %v8597_v43 }
  0xc8   :  { %7132 = vmatmul.mubr.msk.f32.gmra.mrb[94].mxu0 %vm55_vm0, %v8615_v45  ;;  %7163 = vmatprep.mubr.msk.f32.mxu1 %vm55_vm0, %v8602_v44 }
  0xcb   :  { %7164 = vmatmul.mubr.msk.f32.gmra.mrb[94].mxu1 %vm55_vm0, %v8615_v45 }
  0xdf   :  { %v9033_v5 = vpop.f32.mrb[0].mxu0 }
  0xe0   :  { %v170_v14 = vpop.f32.mrb[1].mxu0 }
  0xe1   :  { %7182 = vmatprep.mubr.msk.f32.mxu0 %vm1876_vm1, %v170_v14 }
  0xe2   :  { %v9040_v26 = vpop.f32.mrb[0].mxu1 }
  0xe3   :  { %v9036_v17 = vpop.f32.mrb[2].mxu0  ;;  %v9044_v30 = vpop.f32.mrb[1].mxu1 }
  0xe4   :  { %v9038_v25 = vpop.f32.mrb[3].mxu0 }
  0xe6   :  { %v9048_v32 = vpop.f32.mrb[2].mxu1 }
  0xe7   :  { %v9042_v29 = vpop.f32.mrb[4].mxu0  ;;  %v9052_v34 = vpop.f32.mrb[3].mxu1 }
  0xe8   :  { %v9046_v31 = vpop.f32.mrb[5].mxu0 }
  0xea   :  { %v9056_v36 = vpop.f32.mrb[4].mxu1 }
  0xeb   :  { %v9050_v33 = vpop.f32.mrb[6].mxu0  ;;  %v9060_v38 = vpop.f32.mrb[5].mxu1 }
  0xec   :  { %v9054_v35 = vpop.f32.mrb[7].mxu0 }
  0xee   :  { %v9063_v40 = vpop.f32.mrb[6].mxu1 }
  0xef   :  { %v9058_v37 = vpop.f32.mrb[8].mxu0  ;;  %v9067_v42 = vpop.f32.mrb[7].mxu1 }
  0xf0   :  { %v210_v39 = vpop.f32.mrb[9].mxu0 }
  0xf1   :  { %7210 = vmatprep.mubr.msk.f32.mxu1 %vm1876_vm1, %v210_v39 }
  0xf2   :  { %v9071_v44 = vpop.f32.mrb[8].mxu1 }
  0xf3   :  { %v9065_v41 = vpop.f32.mrb[10].mxu0  ;;  %v9075_v46 = vpop.f32.mrb[9].mxu1 }
  0xf4   :  { %v9069_v43 = vpop.f32.mrb[11].mxu0 }
  0xf6   :  { %v9079_v48 = vpop.f32.mrb[10].mxu1 }
  0xf7   :  { %v9073_v45 = vpop.f32.mrb[12].mxu0  ;;  %v9083_v50 = vpop.f32.mrb[11].mxu1 }
  0xf8   :  { %v9077_v47 = vpop.f32.mrb[13].mxu0 }
  0xfa   :  { %v9087_v52 = vpop.f32.mrb[12].mxu1 }
  0xfb   :  { %v9081_v49 = vpop.f32.mrb[14].mxu0  ;;  %v9091_v54 = vpop.f32.mrb[13].mxu1 }
  0xfc   :  { %v9085_v51 = vpop.f32.mrb[15].mxu0 }
  0xfe   :  { %v9095_v56 = vpop.f32.mrb[14].mxu1 }
  0xff   :  { %v9089_v53 = vpop.f32.mrb[16].mxu0  ;;  %v9099_v58 = vpop.f32.mrb[15].mxu1 }
 0x100   :  { %v9093_v55 = vpop.f32.mrb[17].mxu0 }
 0x102   :  { %v9103_v60 = vpop.f32.mrb[16].mxu1 }
 0x103   :  { %v9097_v57 = vpop.f32.mrb[18].mxu0  ;;  %10642 = vst [vmem:[#allocation2_spill] sm:$0xff] %v9103_v60  ;;  %v9107_v62 = vpop.f32.mrb[17].mxu1 }
 0x104   :  { %v9101_v59 = vpop.f32.mrb[19].mxu0 }
 0x106   :  { %v9111_v0 = vpop.f32.mrb[18].mxu1 }
 0x107   :  { %v9105_v61 = vpop.f32.mrb[20].mxu0  ;;  %10643 = vst [vmem:[#allocation3_spill] sm:$0xff] %v9111_v0  ;;  %v9115_v2 = vpop.f32.mrb[19].mxu1 }
 0x108   :  { %v9109_v63 = vpop.f32.mrb[21].mxu0  ;;  %10644 = vst [vmem:[#allocation4_spill] sm:$0xff] %v9115_v2 }
 0x10a   :  { %v9119_v4 = vpop.f32.mrb[20].mxu1 }
 0x10b   :  { %v9113_v1 = vpop.f32.mrb[22].mxu0  ;;  %10645 = vst [vmem:[#allocation5_spill] sm:$0xff] %v9119_v4  ;;  %v9123_v7 = vpop.f32.mrb[21].mxu1 }
 0x10c   :  { %v9117_v3 = vpop.f32.mrb[23].mxu0  ;;  %10646 = vst [vmem:[#allocation6_spill] sm:$0xff] %v9123_v7 }
 0x10e   :  { %v9127_v9 = vpop.f32.mrb[22].mxu1 }
 0x10f   :  { %v9121_v6 = vpop.f32.mrb[24].mxu0  ;;  %10647 = vst [vmem:[#allocation7_spill] sm:$0xff] %v9127_v9  ;;  %v9131_v11 = vpop.f32.mrb[23].mxu1 }
 0x110   :  { %v9125_v8 = vpop.f32.mrb[25].mxu0  ;;  %10648 = vst [vmem:[#allocation8_spill] sm:$0xff] %v9131_v11 }
 0x112   :  { %v9135_v13 = vpop.f32.mrb[24].mxu1 }
 0x113   :  { %v9129_v10 = vpop.f32.mrb[26].mxu0  ;;  %10649 = vst [vmem:[#allocation9_spill] sm:$0xff] %v9135_v13  ;;  %v9139_v16 = vpop.f32.mrb[25].mxu1 }
 0x114   :  { %v9133_v12 = vpop.f32.mrb[27].mxu0  ;;  %10651 = vst [vmem:[#allocation11_spill] sm:$0xff] %v9139_v16 }
 0x116   :  { %v9143_v19 = vpop.f32.mrb[26].mxu1 }
 0x117   :  { %v9137_v15 = vpop.f32.mrb[28].mxu0  ;;  %10653 = vst [vmem:[#allocation13_spill] sm:$0xff] %v9143_v19  ;;  %v9147_v21 = vpop.f32.mrb[27].mxu1 }
 0x118   :  { %10650 = vst [vmem:[#allocation10_spill] sm:$0xff] %v9137_v15  ;;  %v9141_v18 = vpop.f32.mrb[29].mxu0  ;;  %10655 = vst [vmem:[#allocation15_spill] sm:$0xff] %v9147_v21 }
 0x119   :  { %10652 = vst [vmem:[#allocation12_spill] sm:$0xff] %v9141_v18 }
 0x11a   :  { %v9151_v23 = vpop.f32.mrb[28].mxu1 }
 0x11b   :  { %v9145_v20 = vpop.f32.mrb[30].mxu0  ;;  %10657 = vst [vmem:[#allocation17_spill] sm:$0xff] %v9151_v23  ;;  %v9153_v27 = vpop.f32.mrb[29].mxu1 }
 0x11c   :  { %10654 = vst [vmem:[#allocation14_spill] sm:$0xff] %v9145_v20  ;;  %v9149_v22 = vpop.f32.mrb[31].mxu0  ;;  %10658 = vst [vmem:[#allocation18_spill] sm:$0xff] %v9153_v27 }
 0x11d   :  { %10656 = vst [vmem:[#allocation16_spill] sm:$0xff] %v9149_v22 }
 0x11e   :  { %v9161_v19 = vpop.f32.mrb[30].mxu1 }
 0x11f   :  { %v6920_v24 = vpop.f32.mrb[32].mxu0  ;;  %10661 = vst [vmem:[#allocation19_spill] sm:$0xff] %v9161_v19  ;;  %v9165_v13 = vpop.f32.mrb[31].mxu1  ;;  %v10700_v14 = vld [vmem:[#allocation15_spill] sm:$0xff] }
 0x120   :  { %v766_v28 = vpop.f32.mrb[33].mxu0  ;;  %10662 = vst [vmem:[#allocation20_spill] sm:$0xff] %v9165_v13 }
 0x121   :  { %v7814_v39 = vpack.c.bf16 %v6920_v24, %v766_v28 }
 0x122   :  { %v6952_v9 = vpop.f32.mrb[32].mxu1 }
 0x123   :  { %7816 = vmatprep.subr.msk.bf16.mxu0 %vm9157_vm2, %v7814_v39  ;;  %v6923_v21 = vpop.f32.mrb[34].mxu0  ;;  %v911_v4 = vpop.f32.mrb[33].mxu1 }
 0x124   :  { %7819 = vmatpush3.bf16.xpose.msk.msra.mxu0 %vm9157_vm2, %v7814_v39  ;;  %v776_v23 = vpop.f32.mrb[35].mxu0  ;;  %v7862_v28 = vpack.c.bf16 %v6952_v9, %v911_v4 }
 0x125   :  { %v7820_v27 = vpack.c.bf16 %v6923_v21, %v776_v23 }
 0x126   :  { %v6955_v7 = vpop.f32.mrb[34].mxu1 }
 0x127   :  { %v6926_v11 = vpop.f32.mrb[36].mxu0  ;;  %7822 = vmatprep.subr.msk.bf16.mxu0 %vm9157_vm2, %v7820_v27  ;;  %v921_v2 = vpop.f32.mrb[35].mxu1 }
 0x128   :  { %v786_v24 = vpop.f32.mrb[37].mxu0  ;;  %v9173_v60 = vpack.c.bf16 %v6955_v7, %v921_v2 }
 0x129   :  { %v7826_v19 = vpack.c.bf16 %v6926_v11, %v786_v24 }
 0x12a   :  { %v6958_v21 = vpop.f32.mrb[36].mxu1 }
 0x12b   :  { %v6929_v0 = vpop.f32.mrb[38].mxu0  ;;  %v931_v16 = vpop.f32.mrb[37].mxu1 }
 0x12c   :  { %7825 = vmatpush3.bf16.xpose.msk.msra.mxu0 %vm9157_vm2, %v7820_v27  ;;  %v796_v13 = vpop.f32.mrb[39].mxu0  ;;  %v9177_v22 = vpack.c.bf16 %v6958_v21, %v931_v16 }
 0x12d   :  { %v7832_v39 = vpack.c.bf16 %v6929_v0, %v796_v13  ;;  %7828 = vmatprep.subr.msk.bf16.mxu0 %vm9157_vm2, %v7826_v19 }
 0x12e   :  { %v6961_v9 = vpop.f32.mrb[38].mxu1 }
 0x12f   :  { %v6932_v23 = vpop.f32.mrb[40].mxu0  ;;  %v941_v27 = vpop.f32.mrb[39].mxu1 }
 0x130   :  { %v806_v20 = vpop.f32.mrb[41].mxu0  ;;  %v9185_v2 = vpack.c.bf16 %v6961_v9, %v941_v27 }
 0x131   :  { %v7838_v4 = vpack.c.bf16 %v6932_v23, %v806_v20 }
 0x132   :  { %v6964_v13 = vpop.f32.mrb[40].mxu1 }
 0x133   :  { %7840 = vmatprep.subr.msk.bf16.mxu1 %vm9157_vm2, %v7838_v4  ;;  %v6935_v11 = vpop.f32.mrb[42].mxu0  ;;  %v951_v20 = vpop.f32.mrb[41].mxu1 }
 0x134   :  { %7831 = vmatpush3.bf16.xpose.msk.msra.mxu0 %vm9157_vm2, %v7826_v19  ;;  %7843 = vmatpush3.bf16.xpose.msk.msra.mxu1 %vm9157_vm2, %v7838_v4  ;;  %v816_v0 = vpop.f32.mrb[43].mxu0  ;;  %v9191_v21 = vpack.c.bf16 %v6964_v13, %v951_v20 }
 0x135   :  { %v7844_v7 = vpack.c.bf16 %v6935_v11, %v816_v0  ;;  %7834 = vmatprep.subr.msk.bf16.mxu0 %vm9157_vm2, %v7832_v39 }
 0x136   :  { %v6967_v23 = vpop.f32.mrb[42].mxu1 }
 0x137   :  { %7846 = vmatprep.subr.msk.bf16.mxu1 %vm9157_vm2, %v7844_v7  ;;  %v6938_v16 = vpop.f32.mrb[44].mxu0  ;;  %v961_v4 = vpop.f32.mrb[43].mxu1 }
 0x138   :  { %v826_v24 = vpop.f32.mrb[45].mxu0  ;;  %v9197_v11 = vpack.c.bf16 %v6967_v23, %v961_v4 }
 0x139   :  { %v7850_v19 = vpack.c.bf16 %v6938_v16, %v826_v24 }
 0x13a   :  { %v6970_v0 = vpop.f32.mrb[44].mxu1 }
 0x13b   :  { %v6941_v15 = vpop.f32.mrb[46].mxu0  ;;  %v971_v16 = vpop.f32.mrb[45].mxu1 }
 0x13c   :  { %7837 = vmatpush3.bf16.xpose.msk.msra.mxu0 %vm9157_vm2, %v7832_v39  ;;  %7849 = vmatpush3.bf16.xpose.msk.msra.mxu1 %vm9157_vm2, %v7844_v7  ;;  %v836_v9 = vpop.f32.mrb[47].mxu0  ;;  %v9203_v20 = vpack.c.bf16 %v6970_v0, %v971_v16 }
 0x13d   :  { %7852 = vmatprep.subr.msk.bf16.mxu1 %vm9157_vm2, %v7850_v19  ;;  %7864 = vmatprep.subr.msk.bf16.mxu0 %vm9157_vm2, %v7862_v28  ;;  %v7856_v27 = vpack.c.bf16 %v6941_v15, %v836_v9 }
 0x13e   :  { %v6973_v18 = vpop.f32.mrb[46].mxu1 }
 0x13f   :  { %v6984_v13 = vpop.f32.mrb[48].mxu0  ;;  %v981_v23 = vpop.f32.mrb[47].mxu1 }
 0x140   :  { %v1056_v24 = vpop.f32.mrb[49].mxu0  ;;  %v9213_v15 = vpack.c.bf16 %v6973_v18, %v981_v23 }
 0x141   :  { %v9205_v39 = vpack.c.bf16 %v6984_v13, %v1056_v24 }
 0x143   :  { %7183 = vmatmul.mubr.msk.f32.vlgmr.msra.gmra.mrb[96].mxu0 %vm1876_vm1, %v9033_v5  ;;  %v6987_v7 = vpop.f32.mrb[50].mxu0  ;;  %v7016_v5 = vpop.f32.mrb[48].mxu1 }
 0x144   :  { %7185 = vmatprep.mubr.msk.f32.mxu0 %vm1876_vm1, %v9038_v25  ;;  %7855 = vmatpush3.bf16.xpose.msk.msra.mxu1 %vm9157_vm2, %v7850_v19  ;;  %v1066_v4 = vpop.f32.mrb[51].mxu0  ;;  %v1201_v18 = vpop.f32.mrb[49].mxu1 }
 0x145   :  { %7867 = vmatpush3.bf16.xpose.msk.msra.mxu0 %vm9157_vm2, %v7862_v28  ;;  %7858 = vmatprep.subr.msk.bf16.mxu1 %vm9157_vm2, %v7856_v27  ;;  %v9219_v9 = vpack.c.bf16 %v6987_v7, %v1066_v4  ;;  %v9228_v28 = vpack.c.bf16 %v7016_v5, %v1201_v18 }
 0x146   :  { %7870 = vmatprep.subr.msk.bf16.mxu0 %vm9157_vm2, %v9173_v60  ;;  %v7019_v13 = vpop.f32.mrb[50].mxu1 }
 0x147   :  { %7186 = vmatmul.mubr.msk.f32.gmra.mrb[98].mxu0 %vm1876_vm1, %v9036_v17  ;;  %v6990_v25 = vpop.f32.mrb[52].mxu0  ;;  %v1211_v24 = vpop.f32.mrb[51].mxu1 }
 0x148   :  { %7188 = vmatprep.mubr.msk.f32.mxu0 %vm1876_vm1, %v9046_v31  ;;  %v1076_v19 = vpop.f32.mrb[53].mxu0  ;;  %v9238_v7 = vpack.c.bf16 %v7019_v13, %v1211_v24 }
 0x149   :  { %v9230_v0 = vpack.c.bf16 %v6990_v25, %v1076_v19 }
 0x14a   :  { %v7022_v31 = vpop.f32.mrb[52].mxu1 }
 0x14b   :  { %7189 = vmatmul.mubr.msk.f32.gmra.mrb[100].mxu0 %vm1876_vm1, %v9042_v29  ;;  %v6993_v16 = vpop.f32.mrb[54].mxu0 }
 0x14c   :  { %7191 = vmatprep.mubr.msk.f32.mxu0 %vm1876_vm1, %v9054_v35  ;;  %7861 = vmatpush3.bf16.xpose.msk.msra.mxu1 %vm9157_vm2, %v7856_v27  ;;  %v1086_v17 = vpop.f32.mrb[55].mxu0  ;;  %v1221_v27 = vpop.f32.mrb[53].mxu1 }
 0x14d   :  { %7873 = vmatpush3.bf16.xpose.msk.msra.mxu0 %vm9157_vm2, %v9173_v60  ;;  %7888 = vmatprep.subr.msk.bf16.mxu1 %vm9157_vm2, %v9191_v21  ;;  %v9246_v29 = vpack.c.bf16 %v6993_v16, %v1086_v17  ;;  %v9255_v23 = vpack.c.bf16 %v7022_v31, %v1221_v27 }
 0x14e   :  { %7876 = vmatprep.subr.msk.bf16.mxu0 %vm9157_vm2, %v9177_v22  ;;  %v7025_v5 = vpop.f32.mrb[54].mxu1 }
 0x14f   :  { %7192 = vmatmul.mubr.msk.f32.gmra.mrb[102].mxu0 %vm1876_vm1, %v9050_v33  ;;  %v6996_v35 = vpop.f32.mrb[56].mxu0  ;;  %v1231_v18 = vpop.f32.mrb[55].mxu1 }
 0x150   :  { %7238 = vmatprep.mubr.msk.f32.mxu0 %vm1876_vm1, %v9044_v30  ;;  %v1096_v60 = vpop.f32.mrb[57].mxu0  ;;  %v9266_v30 = vpack.c.bf16 %v7025_v5, %v1231_v18 }
 0x151   :  { %v9257_v4 = vpack.c.bf16 %v6996_v35, %v1096_v60 }
 0x153   :  { %7211 = vmatmul.mubr.msk.f32.vlgmr.msra.gmra.mrb[96].mxu1 %vm1876_vm1, %v9058_v37  ;;  %v6999_v25 = vpop.f32.mrb[58].mxu0 }
 0x154   :  { %7213 = vmatprep.mubr.msk.f32.mxu1 %vm1876_vm1, %v9069_v43  ;;  %7891 = vmatpush3.bf16.xpose.msk.msra.mxu1 %vm9157_vm2, %v9191_v21  ;;  %v1106_v33 = vpop.f32.mrb[59].mxu0  ;;  %v7028_v43 = vpop.f32.mrb[56].mxu1 }
 0x155   :  { %7879 = vmatpush3.bf16.xpose.msk.msra.mxu0 %vm9157_vm2, %v9177_v22  ;;  %7894 = vmatprep.subr.msk.bf16.mxu1 %vm9157_vm2, %v9197_v11  ;;  %v9274_v37 = vpack.c.bf16 %v6999_v25, %v1106_v33  ;;  %v1241_v19 = vpop.f32.mrb[57].mxu1 }
 0x156   :  { %7882 = vmatprep.subr.msk.bf16.mxu0 %vm9157_vm2, %v9185_v2  ;;  %v9283_v13 = vpack.c.bf16 %v7028_v43, %v1241_v19  ;;  %v7031_v24 = vpop.f32.mrb[58].mxu1 }
 0x157   :  { %7214 = vmatmul.mubr.msk.f32.gmra.mrb[98].mxu1 %vm1876_vm1, %v9065_v41  ;;  %v7002_v21 = vpop.f32.mrb[60].mxu0  ;;  %v1251_v31 = vpop.f32.mrb[59].mxu1 }
 0x158   :  { %7216 = vmatprep.mubr.msk.f32.mxu1 %vm1876_vm1, %v9077_v47  ;;  %v1116_v22 = vpop.f32.mrb[61].mxu0  ;;  %v9294_v47 = vpack.c.bf16 %v7031_v24, %v1251_v31 }
 0x159   :  { %v9285_v16 = vpack.c.bf16 %v7002_v21, %v1116_v22 }
 0x15b   :  { %7217 = vmatmul.mubr.msk.f32.gmra.mrb[100].mxu1 %vm1876_vm1, %v9073_v45  ;;  %v7005_v17 = vpop.f32.mrb[62].mxu0 }
 0x15c   :  { %7219 = vmatprep.mubr.msk.f32.mxu1 %vm1876_vm1, %v9085_v51  ;;  %7897 = vmatpush3.bf16.xpose.msk.msra.mxu1 %vm9157_vm2, %v9197_v11  ;;  %v1126_v41 = vpop.f32.mrb[63].mxu0  ;;  %v7034_v51 = vpop.f32.mrb[60].mxu1 }
 0x15d   :  { %7885 = vmatpush3.bf16.xpose.msk.msra.mxu0 %vm9157_vm2, %v9185_v2  ;;  %7900 = vmatprep.subr.msk.bf16.mxu1 %vm9157_vm2, %v9203_v20  ;;  %v9302_v45 = vpack.c.bf16 %v7005_v17, %v1126_v41  ;;  %v1261_v11 = vpop.f32.mrb[61].mxu1 }
 0x15e   :  { %7912 = vmatprep.subr.msk.bf16.mxu0 %vm9157_vm2, %v9205_v39  ;;  %v9311_v2 = vpack.c.bf16 %v7034_v51, %v1261_v11  ;;  %v7037_v5 = vpop.f32.mrb[62].mxu1 }
 0x15f   :  { %7220 = vmatmul.mubr.msk.f32.gmra.mrb[102].mxu1 %vm1876_vm1, %v9081_v49  ;;  %v7048_v35 = vpop.f32.mrb[64].mxu0  ;;  %v1271_v25 = vpop.f32.mrb[63].mxu1 }
 0x160   :  { %7266 = vmatprep.mubr.msk.f32.mxu1 %vm1876_vm1, %v9075_v46  ;;  %v1362_v27 = vpop.f32.mrb[65].mxu0  ;;  %v9320_v49 = vpack.c.bf16 %v7037_v5, %v1271_v25 }
 0x161   :  { %v9313_v60 = vpack.c.bf16 %v7048_v35, %v1362_v27 }
 0x163   :  { %v7051_v18 = vpop.f32.mrb[66].mxu0 }
 0x164   :  { %7239 = vmatmul.mubr.msk.f32.vlgmr.msra.gmra.mrb[104].mxu0 %vm1876_vm1, %v9040_v26  ;;  %7903 = vmatpush3.bf16.xpose.msk.msra.mxu1 %vm9157_vm2, %v9203_v20  ;;  %v1372_v33 = vpop.f32.mrb[67].mxu0  ;;  %v7080_v26 = vpop.f32.mrb[64].mxu1 }
 0x165   :  { %7241 = vmatprep.mubr.msk.f32.mxu0 %vm1876_vm1, %v9052_v34  ;;  %7915 = vmatpush3.bf16.xpose.msk.msra.mxu0 %vm9157_vm2, %v9205_v39  ;;  %v9327_v46 = vpack.c.bf16 %v7051_v18, %v1372_v33  ;;  %v1507_v43 = vpop.f32.mrb[65].mxu1 }
 0x166   :  { %7906 = vmatprep.subr.msk.bf16.mxu1 %vm9157_vm2, %v9213_v15  ;;  %7918 = vmatprep.subr.msk.bf16.mxu0 %vm9157_vm2, %v9219_v9  ;;  %v9337_v21 = vpack.c.bf16 %v7080_v26, %v1507_v43  ;;  %v7083_v19 = vpop.f32.mrb[66].mxu1 }
 0x167   :  { %v7054_v20 = vpop.f32.mrb[68].mxu0  ;;  %v1517_v24 = vpop.f32.mrb[67].mxu1 }
 0x168   :  { %7242 = vmatmul.mubr.msk.f32.gmra.mrb[106].mxu0 %vm1876_vm1, %v9048_v32  ;;  %v1382_v34 = vpop.f32.mrb[69].mxu0  ;;  %10663 = vst [vmem:[#allocation21_spill] sm:$0xff] %v9337_v21  ;;  %v9348_v32 = vpack.c.bf16 %v7083_v19, %v1517_v24 }
 0x169   :  { %7244 = vmatprep.mubr.msk.f32.mxu0 %vm1876_vm1, %v9060_v38  ;;  %v9341_v39 = vpack.c.bf16 %v7054_v20, %v1382_v34 }
 0x16a   :  { %10664 = vst [vmem:[#allocation22_spill] sm:$0xff] %v9348_v32 }
 0x16b   :  { %v7057_v22 = vpop.f32.mrb[70].mxu0 }
 0x16c   :  { %7245 = vmatmul.mubr.msk.f32.gmra.mrb[108].mxu0 %vm1876_vm1, %v9056_v36  ;;  %7909 = vmatpush3.bf16.xpose.msk.msra.mxu1 %vm9157_vm2, %v9213_v15  ;;  %v1392_v17 = vpop.f32.mrb[71].mxu0  ;;  %v7086_v36 = vpop.f32.mrb[68].mxu1 }
 0x16d   :  { %7247 = vmatprep.mubr.msk.f32.mxu0 %vm1876_vm1, %v9067_v42  ;;  %7921 = vmatpush3.bf16.xpose.msk.msra.mxu0 %vm9157_vm2, %v9219_v9  ;;  %v9355_v38 = vpack.c.bf16 %v7057_v22, %v1392_v17  ;;  %v1527_v31 = vpop.f32.mrb[69].mxu1 }
 0x16e   :  { %7924 = vmatprep.subr.msk.bf16.mxu0 %vm9157_vm2, %v9230_v0  ;;  %7936 = vmatprep.subr.msk.bf16.mxu1 %vm9157_vm2, %v9257_v4  ;;  %v9365_v41 = vpack.c.bf16 %v7086_v36, %v1527_v31  ;;  %v7089_v51 = vpop.f32.mrb[70].mxu1  ;;  %v10678_v31 = vld [vmem:[#allocation12_spill] sm:$0xff] }
 0x16f   :  { %v7060_v15 = vpop.f32.mrb[72].mxu0  ;;  %v1537_v35 = vpop.f32.mrb[71].mxu1 }
 0x170   :  { %7248 = vmatmul.mubr.msk.f32.gmra.mrb[110].mxu0 %vm1876_vm1, %v9063_v40  ;;  %v1402_v42 = vpop.f32.mrb[73].mxu0  ;;  %10665 = vst [vmem:[#allocation23_spill] sm:$0xff] %v9365_v41  ;;  %v9378_v27 = vpack.c.bf16 %v7089_v51, %v1537_v35 }
 0x171   :  { %7294 = vmatprep.mubr.msk.f32.mxu0 %vm1876_vm1, %v9093_v55  ;;  %v9369_v9 = vpack.c.bf16 %v7060_v15, %v1402_v42 }
 0x172   :  { %10666 = vst [vmem:[#allocation24_spill] sm:$0xff] %v9378_v27 }
 0x173   :  { %7267 = vmatmul.mubr.msk.f32.vlgmr.msra.gmra.mrb[104].mxu1 %vm1876_vm1, %v9071_v44  ;;  %v7063_v11 = vpop.f32.mrb[74].mxu0 }
 0x174   :  { %7269 = vmatprep.mubr.msk.f32.mxu1 %vm1876_vm1, %v9083_v50  ;;  %7939 = vmatpush3.bf16.xpose.msk.msra.mxu1 %vm9157_vm2, %v9257_v4  ;;  %v1412_v40 = vpop.f32.mrb[75].mxu0  ;;  %v7092_v50 = vpop.f32.mrb[72].mxu1 }
 0x175   :  { %7927 = vmatpush3.bf16.xpose.msk.msra.mxu0 %vm9157_vm2, %v9230_v0  ;;  %7942 = vmatprep.subr.msk.bf16.mxu1 %vm9157_vm2, %v9274_v37  ;;  %v9386_v44 = vpack.c.bf16 %v7063_v11, %v1412_v40  ;;  %v1547_v4 = vpop.f32.mrb[73].mxu1 }
 0x176   :  { %7930 = vmatprep.subr.msk.bf16.mxu0 %vm9157_vm2, %v9246_v29  ;;  %v9395_v5 = vpack.c.bf16 %v7092_v50, %v1547_v4  ;;  %v7095_v18 = vpop.f32.mrb[74].mxu1  ;;  %v10681_v50 = vld [vmem:[#allocation10_spill] sm:$0xff] }
 0x177   :  { %7270 = vmatmul.mubr.msk.f32.gmra.mrb[106].mxu1 %vm1876_vm1, %v9079_v48  ;;  %v7066_v55 = vpop.f32.mrb[76].mxu0  ;;  %v1557_v26 = vpop.f32.mrb[75].mxu1 }
 0x178   :  { %7272 = vmatprep.mubr.msk.f32.mxu1 %vm1876_vm1, %v9091_v54  ;;  %v1422_v0 = vpop.f32.mrb[77].mxu0  ;;  %10667 = vst [vmem:[#allocation25_spill] sm:$0xff] %v9395_v5  ;;  %v9406_v54 = vpack.c.bf16 %v7095_v18, %v1557_v26 }
 0x179   :  { %v9397_v25 = vpack.c.bf16 %v7066_v55, %v1422_v0  ;;  %v10683_v0 = vld [vmem:[#allocation16_spill] sm:$0xff] }
 0x17a   :  { %10668 = vst [vmem:[#allocation26_spill] sm:$0xff] %v9406_v54 }
 0x17b   :  { %7273 = vmatmul.mubr.msk.f32.gmra.mrb[108].mxu1 %vm1876_vm1, %v9087_v52  ;;  %v7069_v33 = vpop.f32.mrb[78].mxu0 }
 0x17c   :  { %7275 = vmatprep.mubr.msk.f32.mxu1 %vm1876_vm1, %v9099_v58  ;;  %7945 = vmatpush3.bf16.xpose.msk.msra.mxu1 %vm9157_vm2, %v9274_v37  ;;  %v1432_v48 = vpop.f32.mrb[79].mxu0  ;;  %v7098_v58 = vpop.f32.mrb[76].mxu1 }
 0x17d   :  { %7933 = vmatpush3.bf16.xpose.msk.msra.mxu0 %vm9157_vm2, %v9246_v29  ;;  %7948 = vmatprep.subr.msk.bf16.mxu1 %vm9157_vm2, %v9285_v16  ;;  %v9414_v52 = vpack.c.bf16 %v7069_v33, %v1432_v48  ;;  %v1567_v20 = vpop.f32.mrb[77].mxu1 }
 0x17e   :  { %7960 = vmatprep.subr.msk.bf16.mxu0 %vm9157_vm2, %v9228_v28  ;;  %v9423_v43 = vpack.c.bf16 %v7098_v58, %v1567_v20  ;;  %v7101_v19 = vpop.f32.mrb[78].mxu1  ;;  %v10686_v20 = vld [vmem:[#allocation14_spill] sm:$0xff] }
 0x17f   :  { %7276 = vmatmul.mubr.msk.f32.gmra.mrb[110].mxu1 %vm1876_vm1, %v9095_v56  ;;  %v7112_v37 = vpop.f32.mrb[80].mxu0  ;;  %v1577_v24 = vpop.f32.mrb[79].mxu1 }
 0x180   :  { %7322 = vmatprep.mubr.msk.f32.mxu1 %vm1876_vm1, %v9125_v8  ;;  %v1652_v29 = vpop.f32.mrb[81].mxu0  ;;  %10669 = vst [vmem:[#allocation27_spill] sm:$0xff] %v9423_v43  ;;  %v9432_v17 = vpack.c.bf16 %v7101_v19, %v1577_v24  ;;  %v10688_v19 = vld [vmem:[#allocation11_spill] sm:$0xff] }
 0x181   :  { %v9425_v34 = vpack.c.bf16 %v7112_v37, %v1652_v29 }
 0x182   :  { %10671 = vst [vmem:[#allocation29_spill] sm:$0xff] %v9432_v17 }
 0x183   :  { %10670 = vst [vmem:[#allocation28_spill] sm:$0xff] %v9425_v34  ;;  %v7115_v22 = vpop.f32.mrb[82].mxu0 }
 0x184   :  { %7295 = vmatmul.mubr.msk.f32.vlgmr.msra.gmra.mrb[112].mxu0 %vm1876_vm1, %v9089_v53  ;;  %7951 = vmatpush3.bf16.xpose.msk.msra.mxu1 %vm9157_vm2, %v9285_v16  ;;  %v1662_v56 = vpop.f32.mrb[83].mxu0  ;;  %v7144_v53 = vpop.f32.mrb[80].mxu1 }
 0x185   :  { %7297 = vmatprep.mubr.msk.f32.mxu0 %vm1876_vm1, %v9101_v59  ;;  %7963 = vmatpush3.bf16.xpose.msk.msra.mxu0 %vm9157_vm2, %v9228_v28  ;;  %v9439_v8 = vpack.c.bf16 %v7115_v22, %v1662_v56 }
 0x186   :  { %7954 = vmatprep.subr.msk.bf16.mxu1 %vm9157_vm2, %v9302_v45  ;;  %7966 = vmatprep.subr.msk.bf16.mxu0 %vm9157_vm2, %v9238_v7 }
 0x187   :  { %10672 = vst [vmem:[#allocation30_spill] sm:$0xff] %v9439_v8  ;;  %v7118_v16 = vpop.f32.mrb[84].mxu0 }
 0x188   :  { %7298 = vmatmul.mubr.msk.f32.gmra.mrb[114].mxu0 %vm1876_vm1, %v9097_v57  ;;  %v1672_v59 = vpop.f32.mrb[85].mxu0 }
 0x189   :  { %7300 = vmatprep.mubr.msk.f32.mxu0 %vm1876_vm1, %v9109_v63  ;;  %v9451_v28 = vpack.c.bf16 %v7118_v16, %v1672_v59  ;;  %v10691_v59 = vld [vmem:[#allocation2_spill] sm:$0xff] }
 0x18b   :  { %10673 = vst [vmem:[#allocation31_spill] sm:$0xff] %v9451_v28  ;;  %v7121_v36 = vpop.f32.mrb[86].mxu0 }
 0x18c   :  { %7301 = vmatmul.mubr.msk.f32.gmra.mrb[116].mxu0 %vm1876_vm1, %v9105_v61  ;;  %7957 = vmatpush3.bf16.xpose.msk.msra.mxu1 %vm9157_vm2, %v9302_v45  ;;  %v1682_v15 = vpop.f32.mrb[87].mxu0 }
 0x18d   :  { %7303 = vmatprep.mubr.msk.f32.mxu0 %vm1876_vm1, %v9117_v3  ;;  %7969 = vmatpush3.bf16.xpose.msk.msra.mxu0 %vm9157_vm2, %v9238_v7  ;;  %v9463_v57 = vpack.c.bf16 %v7121_v36, %v1682_v15  ;;  %v10692_v15 = vld [vmem:[#allocation4_spill] sm:$0xff] }
 0x18e   :  { %7972 = vmatprep.subr.msk.bf16.mxu0 %vm9157_vm2, %v9255_v23  ;;  %7984 = vmatprep.subr.msk.bf16.mxu1 %vm9157_vm2, %v9283_v13 }
 0x18f   :  { %10674 = vst [vmem:[#allocation32_spill] sm:$0xff] %v9463_v57  ;;  %v7124_v61 = vpop.f32.mrb[88].mxu0 }
 0x190   :  { %7304 = vmatmul.mubr.msk.f32.gmra.mrb[118].mxu0 %vm1876_vm1, %v9113_v1  ;;  %v1692_v63 = vpop.f32.mrb[89].mxu0  ;;  %v1797_v1 = vpop.f32.mrb[81].mxu1 }
 0x191   :  { %7350 = vmatprep.mubr.msk.f32.mxu0 %vm1876_vm1, %v9107_v62  ;;  %v9475_v3 = vpack.c.bf16 %v7124_v61, %v1692_v63  ;;  %v10694_v63 = vld [vmem:[#allocation3_spill] sm:$0xff] }
 0x193   :  { %10675 = vst [vmem:[#allocation33_spill] sm:$0xff] %v9475_v3  ;;  %7323 = vmatmul.mubr.msk.f32.vlgmr.msra.gmra.mrb[112].mxu1 %vm1876_vm1, %v9121_v6  ;;  %v7127_v7 = vpop.f32.mrb[90].mxu0 }
 0x194   :  { %7325 = vmatprep.mubr.msk.f32.mxu1 %vm1876_vm1, %v9133_v12  ;;  %7987 = vmatpush3.bf16.xpose.msk.msra.mxu1 %vm9157_vm2, %v9283_v13  ;;  %v1702_v45 = vpop.f32.mrb[91].mxu0  ;;  %v9497_v12 = vpack.c.bf16 %v7144_v53, %v1797_v1  ;;  %v7147_v13 = vpop.f32.mrb[82].mxu1  ;;  %v10704_v1 = vld [vmem:[#allocation20_spill] sm:$0xff] }
 0x195   :  { %7975 = vmatpush3.bf16.xpose.msk.msra.mxu0 %vm9157_vm2, %v9255_v23  ;;  %7990 = vmatprep.subr.msk.bf16.mxu1 %vm9157_vm2, %v9294_v47  ;;  %v9490_v62 = vpack.c.bf16 %v7127_v7, %v1702_v45  ;;  %v1807_v42 = vpop.f32.mrb[83].mxu1  ;;  %v10695_v7 = vld [vmem:[#allocation6_spill] sm:$0xff]  ;;  %v10698_v45 = vld [vmem:[#allocation7_spill] sm:$0xff] }
 0x196   :  { %7978 = vmatprep.subr.msk.bf16.mxu0 %vm9157_vm2, %v9266_v30  ;;  %10677 = vst [vmem:[#allocation35_spill] sm:$0xff] %v9497_v12  ;;  %v9503_v11 = vpack.c.bf16 %v7147_v13, %v1807_v42  ;;  %v7150_v35 = vpop.f32.mrb[84].mxu1 }
 0x197   :  { %10676 = vst [vmem:[#allocation34_spill] sm:$0xff] %v9490_v62  ;;  %7326 = vmatmul.mubr.msk.f32.gmra.mrb[114].mxu1 %vm1876_vm1, %v9129_v10  ;;  %v7130_v6 = vpop.f32.mrb[92].mxu0  ;;  %v1817_v40 = vpop.f32.mrb[85].mxu1 }
 0x198   :  { %7328 = vmatprep.mubr.msk.f32.mxu1 %vm1876_vm1, %v10678_v31  ;;  %v1712_v23 = vpop.f32.mrb[93].mxu0  ;;  %10680 = vst [vmem:[#allocation36_spill] sm:$0xff] %v9503_v11  ;;  %v9507_v10 = vpack.c.bf16 %v7150_v35, %v1817_v40  ;;  %v7153_v4 = vpop.f32.mrb[86].mxu1 }
 0x199   :  { %v9501_v51 = vpack.c.bf16 %v7130_v6, %v1712_v23  ;;  %v1827_v33 = vpop.f32.mrb[87].mxu1 }
 0x19a   :  { %10682 = vst [vmem:[#allocation10_spill] sm:$0xff] %v9507_v10  ;;  %v9522_v48 = vpack.c.bf16 %v7153_v4, %v1827_v33  ;;  %v7156_v58 = vpop.f32.mrb[88].mxu1 }
 0x19b   :  { %10679 = vst [vmem:[#allocation12_spill] sm:$0xff] %v9501_v51  ;;  %7329 = vmatmul.mubr.msk.f32.gmra.mrb[116].mxu1 %vm1876_vm1, %v10681_v50  ;;  %v7133_v55 = vpop.f32.mrb[94].mxu0  ;;  %v1837_v37 = vpop.f32.mrb[89].mxu1 }
 0x19c   :  { %7331 = vmatprep.mubr.msk.f32.mxu1 %vm1876_vm1, %v10683_v0  ;;  %7993 = vmatpush3.bf16.xpose.msk.msra.mxu1 %vm9157_vm2, %v9294_v47  ;;  %v1722_v18 = vpop.f32.mrb[95].mxu0  ;;  %10685 = vst [vmem:[#allocation37_spill] sm:$0xff] %v9522_v48  ;;  %v9527_v47 = vpack.c.bf16 %v7156_v58, %v1837_v37  ;;  %v7159_v29 = vpop.f32.mrb[90].mxu1 }
 0x19d   :  { %7981 = vmatpush3.bf16.xpose.msk.msra.mxu0 %vm9157_vm2, %v9266_v30  ;;  %7996 = vmatprep.subr.msk.bf16.mxu1 %vm9157_vm2, %v9311_v2  ;;  %v9520_v26 = vpack.c.bf16 %v7133_v55, %v1722_v18  ;;  %v1847_v30 = vpop.f32.mrb[91].mxu1 }
 0x19e   :  { %8007 = vmatprep.subr.bf16.mxu0 %v9313_v60  ;;  %10687 = vst [vmem:[#allocation14_spill] sm:$0xff] %v9527_v47  ;;  %v9531_v22 = vpack.c.bf16 %v7159_v29, %v1847_v30  ;;  %v7162_v24 = vpop.f32.mrb[92].mxu1 }
 0x19f   :  { %10684 = vst [vmem:[#allocation16_spill] sm:$0xff] %v9520_v26  ;;  %7332 = vmatmul.mubr.msk.f32.gmra.mrb[118].mxu1 %vm1876_vm1, %v10686_v20  ;;  %v1857_v56 = vpop.f32.mrb[93].mxu1 }
 0x1a0   :  { %7378 = vmatprep.mubr.msk.f32.mxu1 %vm1876_vm1, %v10688_v19  ;;  %10689 = vst [vmem:[#allocation11_spill] sm:$0xff] %v9531_v22  ;;  %v9533_v53 = vpack.c.bf16 %v7162_v24, %v1857_v56  ;;  %v7165_v16 = vpop.f32.mrb[94].mxu1 }
 0x1a1   :  { %v1867_v36 = vpop.f32.mrb[95].mxu1 }
 0x1a2   :  { %10690 = vst [vmem:[#allocation38_spill] sm:$0xff] %v9533_v53  ;;  %v9545_v61 = vpack.c.bf16 %v7165_v16, %v1867_v36 }
 0x1a4   :  { %7351 = vmatmul.mubr.msk.f32.vlgmr.msra.gmra.mrb[120].mxu0 %vm1876_vm1, %v10691_v59  ;;  %7999 = vmatpush3.bf16.xpose.msk.msra.mxu1 %vm9157_vm2, %v9311_v2  ;;  %10693 = vst [vmem:[#allocation2_spill] sm:$0xff] %v9545_v61  ;;  %v10696_v2 = vld [vmem:[#allocation5_spill] sm:$0xff] }
 0x1a5   :  { %7353 = vmatprep.mubr.msk.f32.mxu0 %vm1876_vm1, %v10692_v15  ;;  %8002 = vmatprep.subr.msk.bf16.mxu1 %vm9157_vm2, %v9320_v49 }
 0x1a6   :  { %8009 = vmatpush3.bf16.msra.mxu0 %v9313_v60  ;;  %v10697_v60 = vld [vmem:[#allocation8_spill] sm:$0xff] }
 0x1a7   :  { %8011 = vmatprep.subr.bf16.mxu0 %v9327_v46 }
 0x1a8   :  { %7354 = vmatmul.mubr.msk.f32.gmra.mrb[122].mxu0 %vm1876_vm1, %v10694_v63 }
 0x1a9   :  { %7356 = vmatprep.mubr.msk.f32.mxu0 %vm1876_vm1, %v10695_v7 }
 0x1aa   :  { %8013 = vmatpush3.bf16.msra.mxu0 %v9327_v46  ;;  %v10699_v46 = vld [vmem:[#allocation9_spill] sm:$0xff] }
 0x1ab   :  { %8015 = vmatprep.subr.bf16.mxu0 %v9341_v39 }
 0x1ac   :  { %7357 = vmatmul.mubr.msk.f32.gmra.mrb[124].mxu0 %vm1876_vm1, %v10696_v2  ;;  %8005 = vmatpush3.bf16.xpose.msk.msra.mxu1 %vm9157_vm2, %v9320_v49  ;;  %v10701_v49 = vld [vmem:[#allocation13_spill] sm:$0xff] }
 0x1ad   :  { %7359 = vmatprep.mubr.msk.f32.mxu0 %vm1876_vm1, %v10697_v60  ;;  %8023 = vmatprep.subr.bf16.mxu1 %v9369_v9 }
 0x1ae   :  { %8017 = vmatpush3.bf16.msra.mxu0 %v9341_v39  ;;  %v10702_v39 = vld [vmem:[#allocation18_spill] sm:$0xff] }
 0x1af   :  { %8019 = vmatprep.subr.bf16.mxu0 %v9355_v38 }
 0x1b0   :  { %7360 = vmatmul.mubr.msk.f32.gmra.mrb[126].mxu0 %vm1876_vm1, %v10698_v45 }
 0x1b2   :  { %8021 = vmatpush3.bf16.msra.mxu0 %v9355_v38  ;;  %v10703_v38 = vld [vmem:[#allocation17_spill] sm:$0xff] }
 0x1b3   :  { %7379 = vmatmul.mubr.msk.f32.vlgmr.msra.gmra.mrb[120].mxu1 %vm1876_vm1, %v10699_v46  ;;  %8039 = vmatprep.subr.bf16.mxu0 %v9337_v21 }
 0x1b4   :  { %7381 = vmatprep.mubr.msk.f32.mxu1 %vm1876_vm1, %v10700_v14  ;;  %8025 = vmatpush3.bf16.msra.mxu1 %v9369_v9  ;;  %v10705_v9 = vld [vmem:[#allocation19_spill] sm:$0xff] }
 0x1b5   :  { %8027 = vmatprep.subr.bf16.mxu1 %v9386_v44 }
 0x1b7   :  { %7382 = vmatmul.mubr.msk.f32.gmra.mrb[122].mxu1 %vm1876_vm1, %v10701_v49 }
 0x1b8   :  { %7384 = vmatprep.mubr.msk.f32.mxu1 %vm1876_vm1, %v10702_v39  ;;  %8029 = vmatpush3.bf16.msra.mxu1 %v9386_v44 }
 0x1b9   :  { %8031 = vmatprep.subr.bf16.mxu1 %v9397_v25 }
 0x1bb   :  { %7385 = vmatmul.mubr.msk.f32.gmra.mrb[124].mxu1 %vm1876_vm1, %v10703_v38 }
 0x1bc   :  { %7387 = vmatprep.mubr.msk.f32.mxu1 %vm1876_vm1, %v10704_v1  ;;  %8033 = vmatpush3.bf16.msra.mxu1 %v9397_v25 }
 0x1bd   :  { %8035 = vmatprep.subr.bf16.mxu1 %v9414_v52 }
 0x1bf   :  { %7388 = vmatmul.mubr.msk.f32.gmra.mrb[126].mxu1 %vm1876_vm1, %v10705_v9 }
 0x1c0   :  { %8037 = vmatpush3.bf16.msra.mxu1 %v9414_v52 }
 0x1c1   :  { %8055 = vmatprep.subr.bf16.mxu1 %v9395_v5 }
 0x216   :  { %v9591_v44 = vpop.f32.mrb[96].mxu0 }
 0x217   :  { %v9593_v6 = vpop.f32.mrb[97].mxu0  ;;  %v3105_v13 = vsel %vm3101_vm3, %v9591_v44, -inf }
 0x218   :  { %3106 = vmax.xlane.f32.xlu0 %v3105_v13  ;;  %v3102_v23 = vsel %vm3101_vm3, %v9593_v6, -inf }
 0x21a   :  { %v9597_v31 = vpop.f32.mrb[98].mxu0 }
 0x21b   :  { %v9599_v25 = vpop.f32.mrb[99].mxu0  ;;  %v3111_v52 = vsel %vm3101_vm3, %v9597_v31, -inf }
 0x21c   :  { %3103 = vmax.xlane.f32.xlu0 %v3102_v23  ;;  %3112 = vmax.xlane.f32.xlu1 %v3111_v52  ;;  %v3108_v40 = vsel %vm3101_vm3, %v9599_v25, -inf }
 0x21e   :  { %v9605_v42 = vpop.f32.mrb[100].mxu0 }
 0x21f   :  { %v9607_v35 = vpop.f32.mrb[101].mxu0  ;;  %v3117_v0 = vsel %vm3101_vm3, %v9605_v42, -inf }
 0x220   :  { %3109 = vmax.xlane.f32.xlu1 %v3108_v40  ;;  %v3114_v50 = vsel %vm3101_vm3, %v9607_v35, -inf }
 0x221   :  { %3115 = vmax.xlane.f32.xlu0 %v3114_v50 }
 0x222   :  { %v9613_v55 = vpop.f32.mrb[102].mxu0 }
 0x223   :  { %v9615_v4 = vpop.f32.mrb[103].mxu0  ;;  %v3123_v37 = vsel %vm3101_vm3, %v9613_v55, -inf }
 0x224   :  { %3118 = vmax.xlane.f32.xlu1 %v3117_v0  ;;  %v3120_v18 = vsel %vm3101_vm3, %v9615_v4, -inf }
 0x225   :  { %3121 = vmax.xlane.f32.xlu0 %v3120_v18 }
 0x226   :  { %v9621_v33 = vpop.f32.mrb[96].mxu1 }
 0x227   :  { %v9623_v58 = vpop.f32.mrb[97].mxu1  ;;  %v3129_v20 = vsel %vm3101_vm3, %v9621_v33, -inf }
 0x228   :  { %3124 = vmax.xlane.f32.xlu1 %v3123_v37  ;;  %v3126_v30 = vsel %vm3101_vm3, %v9623_v58, -inf }
 0x229   :  { %3130 = vmax.xlane.f32.xlu0 %v3129_v20 }
 0x22a   :  { %v9629_v29 = vpop.f32.mrb[98].mxu1 }
 0x22b   :  { %v9631_v19 = vpop.f32.mrb[99].mxu1  ;;  %v3135_v16 = vsel %vm3101_vm3, %v9629_v29, -inf }
 0x22c   :  { %v3132_v15 = vsel %vm3101_vm3, %v9631_v19, -inf }
 0x22d   :  { %3127 = vmax.xlane.f32.xlu0 %v3126_v30 }
 0x22e   :  { %v9635_v24 = vpop.f32.mrb[100].mxu1 }
 0x22f   :  { %v9637_v56 = vpop.f32.mrb[101].mxu1  ;;  %v3141_v60 = vsel %vm3101_vm3, %v9635_v24, -inf }
 0x230   :  { %v3138_v49 = vsel %vm3101_vm3, %v9637_v56, -inf }
 0x231   :  { %3136 = vmax.xlane.f32.xlu0 %v3135_v16 }
 0x232   :  { %v9641_v59 = vpop.f32.mrb[102].mxu1 }
 0x233   :  { %v9643_v36 = vpop.f32.mrb[103].mxu1  ;;  %v3147_v9 = vsel %vm3101_vm3, %v9641_v59, -inf }
 0x234   :  { %v3144_v40 = vsel %vm3101_vm3, %v9643_v36, -inf }
 0x235   :  { %3133 = vmax.xlane.f32.xlu0 %v3132_v15 }
 0x237   :  { %v9647_v63 = vpop.f32.mrb[104].mxu0 }
 0x238   :  { %v9649_v7 = vpop.f32.mrb[105].mxu0  ;;  %v3153_v2 = vsel %vm3101_vm3, %v9647_v63, -inf }
 0x239   :  { %3154 = vmax.xlane.f32.xlu1 %v3153_v2  ;;  %3142 = vmax.xlane.f32.xlu0 %v3141_v60  ;;  %v3150_v14 = vsel %vm3101_vm3, %v9649_v7, -inf }
 0x23b   :  { %v9655_v45 = vpop.f32.mrb[106].mxu0 }
 0x23c   :  { %v9657_v46 = vpop.f32.mrb[107].mxu0  ;;  %v3159_v1 = vsel %vm3101_vm3, %v9655_v45, -inf }
 0x23d   :  { %3151 = vmax.xlane.f32.xlu1 %v3150_v14  ;;  %3139 = vmax.xlane.f32.xlu0 %v3138_v49  ;;  %v3156_v52 = vsel %vm3101_vm3, %v9657_v46, -inf }
 0x23f   :  { %v9663_v39 = vpop.f32.mrb[108].mxu0 }
 0x240   :  { %v9665_v38 = vpop.f32.mrb[109].mxu0  ;;  %v3165_v37 = vsel %vm3101_vm3, %v9663_v39, -inf }
 0x241   :  { %3160 = vmax.xlane.f32.xlu1 %v3159_v1  ;;  %3148 = vmax.xlane.f32.xlu0 %v3147_v9  ;;  %v3162_v16 = vsel %vm3101_vm3, %v9665_v38, -inf }
 0x243   :  { %v9671_v13 = vpop.f32.mrb[110].mxu0 }
 0x244   :  { %v9673_v23 = vpop.f32.mrb[111].mxu0  ;;  %v3171_v14 = vsel %vm3101_vm3, %v9671_v13, -inf }
 0x245   :  { %3157 = vmax.xlane.f32.xlu1 %v3156_v52  ;;  %3145 = vmax.xlane.f32.xlu0 %v3144_v40  ;;  %v3168_v52 = vsel %vm3101_vm3, %v9673_v23, -inf }
 0x246   :  { %v9679_v50 = vpop.f32.mrb[104].mxu1 }
 0x247   :  { %v9681_v0 = vpop.f32.mrb[105].mxu1  ;;  %v3177_v18 = vsel %vm3101_vm3, %v9679_v50, -inf }
 0x248   :  { %v3174_v15 = vsel %vm3101_vm3, %v9681_v0, -inf }
 0x249   :  { %3166 = vmax.xlane.f32.xlu1 %v3165_v37  ;;  %3178 = vmax.xlane.f32.xlu0 %v3177_v18 }
 0x24a   :  { %v9687_v20 = vpop.f32.mrb[106].mxu1 }
 0x24b   :  { %v9689_v30 = vpop.f32.mrb[107].mxu1  ;;  %v3183_v49 = vsel %vm3101_vm3, %v9687_v20, -inf }
 0x24c   :  { %v3180_v40 = vsel %vm3101_vm3, %v9689_v30, -inf }
 0x24d   :  { %3163 = vmax.xlane.f32.xlu1 %v3162_v16  ;;  %3175 = vmax.xlane.f32.xlu0 %v3174_v15 }
 0x24e   :  { %v9695_v2 = vpop.f32.mrb[108].mxu1 }
 0x24f   :  { %v9697_v60 = vpop.f32.mrb[109].mxu1  ;;  %v3189_v15 = vsel %vm3101_vm3, %v9695_v2, -inf }
 0x251   :  { %3172 = vmax.xlane.f32.xlu1 %v3171_v14  ;;  %3184 = vmax.xlane.f32.xlu0 %v3183_v49 }
 0x252   :  { %v9703_v1 = vpop.f32.mrb[110].mxu1 }
 0x253   :  { %v9705_v9 = vpop.f32.mrb[111].mxu1 }
 0x255   :  { %3169 = vmax.xlane.f32.xlu1 %v3168_v52  ;;  %3181 = vmax.xlane.f32.xlu0 %v3180_v40  ;;  %v3186_v40 = vsel %vm3101_vm3, %v9697_v60, -inf }
 0x257   :  { %v9711_v18 = vpop.f32.mrb[112].mxu0 }
 0x258   :  { %v9713_v37 = vpop.f32.mrb[113].mxu0  ;;  %v3201_v16 = vsel %vm3101_vm3, %v9711_v18, -inf }
 0x259   :  { %3202 = vmax.xlane.f32.xlu1 %v3201_v16  ;;  %3190 = vmax.xlane.f32.xlu0 %v3189_v15  ;;  %v3198_v52 = vsel %vm3101_vm3, %v9713_v37, -inf  ;;  %v3195_v15 = vsel %vm3101_vm3, %v9703_v1, -inf }
 0x25b   :  { %v9719_v14 = vpop.f32.mrb[114].mxu0 }
 0x25c   :  { %v9721_v49 = vpop.f32.mrb[115].mxu0  ;;  %v3207_v16 = vsel %vm3101_vm3, %v9719_v14, -inf }
 0x25d   :  { %3199 = vmax.xlane.f32.xlu1 %v3198_v52  ;;  %3187 = vmax.xlane.f32.xlu0 %v3186_v40  ;;  %v3204_v52 = vsel %vm3101_vm3, %v9721_v49, -inf  ;;  %v3192_v40 = vsel %vm3101_vm3, %v9705_v9, -inf }
 0x25f   :  { %v9727_v61 = vpop.f32.mrb[116].mxu0 }
 0x260   :  { %v9729_v53 = vpop.f32.mrb[117].mxu0 }
 0x261   :  { %3208 = vmax.xlane.f32.xlu1 %v3207_v16  ;;  %3196 = vmax.xlane.f32.xlu0 %v3195_v15  ;;  %v3213_v15 = vsel %vm3101_vm3, %v9727_v61, -inf }
 0x263   :  { %v9735_v22 = vpop.f32.mrb[118].mxu0 }
 0x264   :  { %v9737_v48 = vpop.f32.mrb[119].mxu0 }
 0x265   :  { %3205 = vmax.xlane.f32.xlu1 %v3204_v52  ;;  %3193 = vmax.xlane.f32.xlu0 %v3192_v40  ;;  %v3210_v52 = vsel %vm3101_vm3, %v9729_v53, -inf }
 0x266   :  { %v9743_v10 = vpop.f32.mrb[112].mxu1 }
 0x267   :  { %v9745_v11 = vpop.f32.mrb[113].mxu1  ;;  %v3225_v16 = vsel %vm3101_vm3, %v9743_v10, -inf }
 0x268   :  { %v3222_v40 = vsel %vm3101_vm3, %v9745_v11, -inf }
 0x269   :  { %3214 = vmax.xlane.f32.xlu1 %v3213_v15  ;;  %3226 = vmax.xlane.f32.xlu0 %v3225_v16  ;;  %v3219_v15 = vsel %vm3101_vm3, %v9735_v22, -inf }
 0x26a   :  { %v9751_v47 = vpop.f32.mrb[114].mxu1 }
 0x26b   :  { %v9753_v26 = vpop.f32.mrb[115].mxu1  ;;  %v3231_v16 = vsel %vm3101_vm3, %v9751_v47, -inf }
 0x26d   :  { %3211 = vmax.xlane.f32.xlu1 %v3210_v52  ;;  %3223 = vmax.xlane.f32.xlu0 %v3222_v40  ;;  %v3216_v52 = vsel %vm3101_vm3, %v9737_v48, -inf  ;;  %v3228_v40 = vsel %vm3101_vm3, %v9753_v26, -inf }
 0x26e   :  { %v9759_v51 = vpop.f32.mrb[116].mxu1 }
 0x26f   :  { %v9761_v62 = vpop.f32.mrb[117].mxu1 }
 0x271   :  { %3220 = vmax.xlane.f32.xlu1 %v3219_v15  ;;  %3232 = vmax.xlane.f32.xlu0 %v3231_v16  ;;  %v3237_v16 = vsel %vm3101_vm3, %v9759_v51, -inf }
 0x272   :  { %v9767_v12 = vpop.f32.mrb[118].mxu1 }
 0x273   :  { %v9769_v57 = vpop.f32.mrb[119].mxu1 }
 0x274   :  { %10706 = vst [vmem:[#allocation4_spill] sm:$0xff] %v9769_v57 }
 0x275   :  { %3217 = vmax.xlane.f32.xlu1 %v3216_v52  ;;  %3229 = vmax.xlane.f32.xlu0 %v3228_v40  ;;  %v3234_v40 = vsel %vm3101_vm3, %v9761_v62, -inf }
 0x277   :  { %v9775_v28 = vpop.f32.mrb[120].mxu0 }
 0x278   :  { %v9777_v8 = vpop.f32.mrb[121].mxu0  ;;  %v3249_v15 = vsel %vm3101_vm3, %v9775_v28, -inf }
 0x279   :  { %3250 = vmax.xlane.f32.xlu1 %v3249_v15  ;;  %3238 = vmax.xlane.f32.xlu0 %v3237_v16  ;;  %v3246_v52 = vsel %vm3101_vm3, %v9777_v8, -inf  ;;  %v3243_v16 = vsel %vm3101_vm3, %v9767_v12, -inf }
 0x27b   :  { %v9783_v3 = vpop.f32.mrb[122].mxu0 }
 0x27c   :  { %v9785_v17 = vpop.f32.mrb[123].mxu0  ;;  %v3255_v15 = vsel %vm3101_vm3, %v9783_v3, -inf }
 0x27d   :  { %10707 = vst [vmem:[#allocation3_spill] sm:$0xff] %v9785_v17  ;;  %3247 = vmax.xlane.f32.xlu1 %v3246_v52  ;;  %3235 = vmax.xlane.f32.xlu0 %v3234_v40  ;;  %v3252_v52 = vsel %vm3101_vm3, %v9785_v17, -inf  ;;  %v3240_v40 = vsel %vm3101_vm3, %v9769_v57, -inf }
 0x27f   :  { %v9791_v43 = vpop.f32.mrb[124].mxu0 }
 0x280   :  { %10708 = vst [vmem:[#allocation6_spill] sm:$0xff] %v9791_v43  ;;  %v9793_v54 = vpop.f32.mrb[125].mxu0 }
 0x281   :  { %10709 = vst [vmem:[#allocation5_spill] sm:$0xff] %v9793_v54  ;;  %3256 = vmax.xlane.f32.xlu1 %v3255_v15  ;;  %3244 = vmax.xlane.f32.xlu0 %v3243_v16  ;;  %v3261_v15 = vsel %vm3101_vm3, %v9791_v43, -inf }
 0x283   :  { %v9799_v5 = vpop.f32.mrb[126].mxu0 }
 0x284   :  { %10710 = vst [vmem:[#allocation8_spill] sm:$0xff] %v9799_v5  ;;  %v9801_v34 = vpop.f32.mrb[127].mxu0 }
 0x285   :  { %10711 = vst [vmem:[#allocation7_spill] sm:$0xff] %v9801_v34  ;;  %3253 = vmax.xlane.f32.xlu1 %v3252_v52  ;;  %3241 = vmax.xlane.f32.xlu0 %v3240_v40  ;;  %v3258_v52 = vsel %vm3101_vm3, %v9793_v54, -inf }
 0x286   :  { %v9807_v27 = vpop.f32.mrb[120].mxu1 }
 0x287   :  { %10712 = vst [vmem:[#allocation9_spill] sm:$0xff] %v9807_v27  ;;  %v9809_v41 = vpop.f32.mrb[121].mxu1 }
 0x288   :  { %10713 = vst [vmem:[#allocation15_spill] sm:$0xff] %v9809_v41  ;;  %v3270_v16 = vsel %vm3101_vm3, %v9809_v41, -inf }
 0x289   :  { %3262 = vmax.xlane.f32.xlu1 %v3261_v15  ;;  %3271 = vmax.xlane.f32.xlu0 %v3270_v16  ;;  %v3267_v15 = vsel %vm3101_vm3, %v9799_v5, -inf  ;;  %v3273_v5 = vsel %vm3101_vm3, %v9807_v27, -inf }
 0x28a   :  { %v9815_v32 = vpop.f32.mrb[122].mxu1 }
 0x28b   :  { %10714 = vst [vmem:[#allocation13_spill] sm:$0xff] %v9815_v32  ;;  %v9817_v21 = vpop.f32.mrb[123].mxu1 }
 0x28c   :  { %10715 = vst [vmem:[#allocation18_spill] sm:$0xff] %v9817_v21  ;;  %v3276_v40 = vsel %vm3101_vm3, %v9817_v21, -inf }
 0x28d   :  { %3259 = vmax.xlane.f32.xlu1 %v3258_v52  ;;  %3277 = vmax.xlane.f32.xlu0 %v3276_v40  ;;  %v3264_v52 = vsel %vm3101_vm3, %v9801_v34, -inf }
 0x28e   :  { %v9823_v57 = vpop.f32.mrb[124].mxu1 }
 0x28f   :  { %10716 = vst [vmem:[#allocation17_spill] sm:$0xff] %v9823_v57  ;;  %v9825_v43 = vpop.f32.mrb[125].mxu1 }
 0x290   :  { %10717 = vst [vmem:[#allocation20_spill] sm:$0xff] %v9825_v43  ;;  %v3282_v16 = vsel %vm3101_vm3, %v9825_v43, -inf }
 0x291   :  { %3268 = vmax.xlane.f32.xlu1 %v3267_v15  ;;  %3283 = vmax.xlane.f32.xlu0 %v3282_v16  ;;  %v3279_v15 = vsel %vm3101_vm3, %v9815_v32, -inf  ;;  %v3285_v16 = vsel %vm3101_vm3, %v9823_v57, -inf }
 0x292   :  { %v9831_v41 = vpop.f32.mrb[126].mxu1 }
 0x293   :  { %10718 = vst [vmem:[#allocation19_spill] sm:$0xff] %v9831_v41  ;;  %v9833_v54 = vpop.f32.mrb[127].mxu1  ;;  %v3291_v34 = vsel %vm3101_vm3, %v9831_v41, -inf }
 0x294   :  { %10719 = vst [vmem:[#allocation39_spill] sm:$0xff] %v9833_v54  ;;  %v3288_v40 = vsel %vm3101_vm3, %v9833_v54, -inf }
 0x295   :  { %3265 = vmax.xlane.f32.xlu1 %v3264_v52  ;;  %3289 = vmax.xlane.f32.xlu0 %v3288_v40 }
 0x299   :  { %3274 = vmax.xlane.f32.xlu1 %v3273_v5 }
 0x29d   :  { %3280 = vmax.xlane.f32.xlu1 %v3279_v15 }
 0x2a1   :  { %3286 = vmax.xlane.f32.xlu1 %v3285_v16 }
 0x2a5   :  { %3292 = vmax.xlane.f32.xlu1 %v3291_v34  ;;  %v3107_v43 = vpop.xlane.xlu0 %3106 }
 0x2a6   :  { %v3295_v52 = vsub.f32 %v9591_v44, %v3107_v43 }
 0x2a8   :  { %v3360_v40 = vmul.f32 1.442695, %v3295_v52 }
 0x2a9   :  { %v3104_v54 = vpop.xlane.xlu0 %3103  ;;  %v3113_v21 = vpop.xlane.xlu1 %3112 }
 0x2aa   :  { %8134 = vpow2.f32 %v3360_v40  ;;  %v3294_v5 = vsub.f32 %v9593_v6, %v3104_v54  ;;  %v3297_v32 = vsub.f32 %v9597_v31, %v3113_v21 }
 0x2ac   :  { %v3358_v15 = vmul.f32 1.442695, %v3294_v5  ;;  %v3364_v27 = vmul.f32 1.442695, %v3297_v32 }
 0x2ad   :  { %v3110_v17 = vpop.xlane.xlu1 %3109 }
 0x2ae   :  { %8136 = vpow2.f32 %v3358_v15  ;;  %v3296_v16 = vsub.f32 %v9599_v25, %v3110_v17  ;;  %v3116_v57 = vpop.xlane.xlu0 %3115 }
 0x2af   :  { %8138 = vpow2.f32 %v3364_v27  ;;  %v3298_v34 = vsub.f32 %v9607_v35, %v3116_v57 }
 0x2b0   :  { %v3362_v41 = vmul.f32 1.442695, %v3296_v16 }
 0x2b1   :  { %v3366_v43 = vmul.f32 1.442695, %v3298_v34  ;;  %v3119_v44 = vpop.xlane.xlu1 %3118 }
 0x2b2   :  { %8140 = vpow2.f32 %v3362_v41  ;;  %v3299_v52 = vsub.f32 %v9605_v42, %v3119_v44  ;;  %v3122_v40 = vpop.xlane.xlu0 %3121 }
 0x2b3   :  { %v3300_v54 = vsub.f32 %v9615_v4, %v3122_v40  ;;  %8142 = vpow2.f32 %v3366_v43 }
 0x2b4   :  { %v9854_v21 = vpop.eup %8134  ;;  %v3368_v32 = vmul.f32 1.442695, %v3299_v52 }
 0x2b5   :  { %v3370_v6 = vmul.f32 1.442695, %v3300_v54  ;;  %v3125_v31 = vpop.xlane.xlu1 %3124  ;;  %v3489_v27 = vsel %vm3101_vm3, %v9854_v21, 0.0 }
 0x2b6   :  { %8144 = vpow2.f32 %v3368_v32  ;;  %v3301_v17 = vsub.f32 %v9613_v55, %v3125_v31  ;;  %v3131_v57 = vpop.xlane.xlu0 %3130  ;;  %3490 = vadd.xlane.f32.xlu1 %v3489_v27 }
 0x2b7   :  { %v3303_v41 = vsub.f32 %v9621_v33, %v3131_v57  ;;  %8146 = vpow2.f32 %v3370_v6 }
 0x2b8   :  { %v9860_v25 = vpop.eup %8136  ;;  %v3372_v42 = vmul.f32 1.442695, %v3301_v17 }
 0x2b9   :  { %v9862_v35 = vpop.eup %8138  ;;  %v3376_v4 = vmul.f32 1.442695, %v3303_v41  ;;  %v3486_v5 = vsel %vm3101_vm3, %v9860_v25, 0.0 }
 0x2ba   :  { %8148 = vpow2.f32 %v3372_v42  ;;  %3487 = vadd.xlane.f32.xlu0 %v3486_v5  ;;  %v3128_v15 = vpop.xlane.xlu0 %3127  ;;  %v3495_v55 = vsel %vm3101_vm3, %v9862_v35, 0.0 }
 0x2bb   :  { %v3302_v16 = vsub.f32 %v9623_v58, %v3128_v15  ;;  %3496 = vadd.xlane.f32.xlu1 %v3495_v55  ;;  %8150 = vpow2.f32 %v3376_v4 }
 0x2bc   :  { %v9869_v33 = vpop.eup %8140 }
 0x2bd   :  { %v3374_v34 = vmul.f32 1.442695, %v3302_v16  ;;  %v3492_v43 = vsel %vm3101_vm3, %v9869_v33, 0.0  ;;  %v9873_v44 = vpop.eup %8142 }
 0x2be   :  { %3493 = vadd.xlane.f32.xlu0 %v3492_v43  ;;  %v3137_v52 = vpop.xlane.xlu0 %3136  ;;  %v3498_v58 = vsel %vm3101_vm3, %v9873_v44, 0.0 }
 0x2bf   :  { %v3305_v40 = vsub.f32 %v9629_v29, %v3137_v52  ;;  %8152 = vpow2.f32 %v3374_v34 }
 0x2c0   :  { %v9876_v54 = vpop.eup %8144 }
 0x2c1   :  { %v3380_v32 = vmul.f32 1.442695, %v3305_v40  ;;  %v3501_v6 = vsel %vm3101_vm3, %v9876_v54, 0.0  ;;  %v9882_v31 = vpop.eup %8146 }
 0x2c2   :  { %3499 = vadd.xlane.f32.xlu0 %v3498_v58  ;;  %v3134_v27 = vpop.xlane.xlu0 %3133  ;;  %3502 = vadd.xlane.f32.xlu1 %v3501_v6  ;;  %v3504_v41 = vsel %vm3101_vm3, %v9882_v31, 0.0 }
 0x2c3   :  { %v3304_v17 = vsub.f32 %v9631_v19, %v3134_v27  ;;  %8154 = vpow2.f32 %v3380_v32 }
 0x2c4   :  { %v9885_v57 = vpop.eup %8148 }
 0x2c5   :  { %v3378_v29 = vmul.f32 1.442695, %v3304_v17  ;;  %v3507_v42 = vsel %vm3101_vm3, %v9885_v57, 0.0  ;;  %v9891_v4 = vpop.eup %8150 }
 0x2c6   :  { %v3155_v5 = vpop.xlane.xlu1 %3154  ;;  %3505 = vadd.xlane.f32.xlu0 %v3504_v41  ;;  %v3143_v15 = vpop.xlane.xlu0 %3142  ;;  %3508 = vadd.xlane.f32.xlu1 %v3507_v42  ;;  %v3513_v43 = vsel %vm3101_vm3, %v9891_v4, 0.0 }
 0x2c7   :  { %v3311_v55 = vsub.f32 %v9647_v63, %v3155_v5  ;;  %v3307_v19 = vsub.f32 %v9635_v24, %v3143_v15  ;;  %8156 = vpow2.f32 %v3378_v29 }
 0x2c9   :  { %v3392_v16 = vmul.f32 1.442695, %v3311_v55  ;;  %v3384_v34 = vmul.f32 1.442695, %v3307_v19  ;;  %v9897_v52 = vpop.eup %8152 }
 0x2ca   :  { %v3152_v40 = vpop.xlane.xlu1 %3151  ;;  %3514 = vadd.xlane.f32.xlu0 %v3513_v43  ;;  %v3140_v32 = vpop.xlane.xlu0 %3139  ;;  %v3510_v24 = vsel %vm3101_vm3, %v9897_v52, 0.0 }
 0x2cb   :  { %8158 = vpow2.f32 %v3392_v16  ;;  %v3310_v58 = vsub.f32 %v9649_v7, %v3152_v40  ;;  %v3306_v6 = vsub.f32 %v9637_v56, %v3140_v32 }
 0x2cc   :  { %8160 = vpow2.f32 %v3384_v34 }
 0x2cd   :  { %v3390_v63 = vmul.f32 1.442695, %v3310_v58  ;;  %v3382_v27 = vmul.f32 1.442695, %v3306_v6  ;;  %v9903_v17 = vpop.eup %8154 }
 0x2ce   :  { %v3161_v29 = vpop.xlane.xlu1 %3160  ;;  %3511 = vadd.xlane.f32.xlu0 %v3510_v24  ;;  %v3149_v41 = vpop.xlane.xlu0 %3148  ;;  %v3519_v56 = vsel %vm3101_vm3, %v9903_v17, 0.0 }
 0x2cf   :  { %8162 = vpow2.f32 %v3390_v63  ;;  %v3313_v42 = vsub.f32 %v9655_v45, %v3161_v29  ;;  %v3309_v5 = vsub.f32 %v9641_v59, %v3149_v41 }
 0x2d0   :  { %8164 = vpow2.f32 %v3382_v27 }
 0x2d1   :  { %v3396_v7 = vmul.f32 1.442695, %v3313_v42  ;;  %v3388_v15 = vmul.f32 1.442695, %v3309_v5  ;;  %v9909_v55 = vpop.eup %8156 }
 0x2d2   :  { %v3158_v19 = vpop.xlane.xlu1 %3157  ;;  %3520 = vadd.xlane.f32.xlu0 %v3519_v56  ;;  %v3146_v16 = vpop.xlane.xlu0 %3145  ;;  %v3516_v32 = vsel %vm3101_vm3, %v9909_v55, 0.0 }
 0x2d3   :  { %8166 = vpow2.f32 %v3396_v7  ;;  %v3312_v34 = vsub.f32 %v9657_v46, %v3158_v19  ;;  %v3308_v43 = vsub.f32 %v9643_v36, %v3146_v16 }
 0x2d4   :  { %8168 = vpow2.f32 %v3388_v15 }
 0x2d5   :  { %v9913_v45 = vpop.eup %8158  ;;  %v3394_v59 = vmul.f32 1.442695, %v3312_v34  ;;  %v3386_v40 = vmul.f32 1.442695, %v3308_v43 }
 0x2d6   :  { %v9917_v58 = vpop.eup %8160  ;;  %v3167_v6 = vpop.xlane.xlu1 %3166  ;;  %3517 = vadd.xlane.f32.xlu0 %v3516_v32  ;;  %v3537_v27 = vsel %vm3101_vm3, %v9913_v45, 0.0 }
 0x2d7   :  { %v3179_v63 = vpop.xlane.xlu0 %3178  ;;  %8170 = vpow2.f32 %v3394_v59  ;;  %v3315_v46 = vsub.f32 %v9663_v39, %v3167_v6  ;;  %3538 = vadd.xlane.f32.xlu1 %v3537_v27  ;;  %v3525_v42 = vsel %vm3101_vm3, %v9917_v58, 0.0 }
 0x2d8   :  { %v3319_v36 = vsub.f32 %v9679_v50, %v3179_v63  ;;  %8172 = vpow2.f32 %v3386_v40 }
 0x2d9   :  { %v9923_v24 = vpop.eup %8162  ;;  %v3400_v29 = vmul.f32 1.442695, %v3315_v46 }
 0x2da   :  { %v3408_v41 = vmul.f32 1.442695, %v3319_v36  ;;  %v9927_v5 = vpop.eup %8164  ;;  %v3164_v7 = vpop.xlane.xlu1 %3163  ;;  %3526 = vadd.xlane.f32.xlu0 %v3525_v42  ;;  %v3534_v56 = vsel %vm3101_vm3, %v9923_v24, 0.0 }
 0x2db   :  { %v3176_v15 = vpop.xlane.xlu0 %3175  ;;  %8174 = vpow2.f32 %v3400_v29  ;;  %v3314_v39 = vsub.f32 %v9665_v38, %v3164_v7  ;;  %3535 = vadd.xlane.f32.xlu1 %v3534_v56  ;;  %v3522_v43 = vsel %vm3101_vm3, %v9927_v5, 0.0 }
 0x2dc   :  { %v3318_v50 = vsub.f32 %v9681_v0, %v3176_v15  ;;  %8176 = vpow2.f32 %v3408_v41 }
 0x2dd   :  { %v9933_v19 = vpop.eup %8166  ;;  %v3398_v16 = vmul.f32 1.442695, %v3314_v39 }
 0x2de   :  { %v3406_v34 = vmul.f32 1.442695, %v3318_v50  ;;  %v9937_v59 = vpop.eup %8168  ;;  %v3173_v40 = vpop.xlane.xlu1 %3172  ;;  %3523 = vadd.xlane.f32.xlu0 %v3522_v43  ;;  %v3543_v6 = vsel %vm3101_vm3, %v9933_v19, 0.0 }
 0x2df   :  { %v3185_v32 = vpop.xlane.xlu0 %3184  ;;  %8178 = vpow2.f32 %v3398_v16  ;;  %v3317_v38 = vsub.f32 %v9671_v13, %v3173_v40  ;;  %3544 = vadd.xlane.f32.xlu1 %v3543_v6  ;;  %v3531_v36 = vsel %vm3101_vm3, %v9937_v59, 0.0 }
 0x2e0   :  { %v3321_v0 = vsub.f32 %v9687_v20, %v3185_v32  ;;  %8180 = vpow2.f32 %v3406_v34 }
 0x2e1   :  { %v9943_v63 = vpop.eup %8170  ;;  %v3404_v27 = vmul.f32 1.442695, %v3317_v38 }
 0x2e2   :  { %v3412_v46 = vmul.f32 1.442695, %v3321_v0  ;;  %v9947_v29 = vpop.eup %8172  ;;  %v3170_v41 = vpop.xlane.xlu1 %3169  ;;  %3532 = vadd.xlane.f32.xlu0 %v3531_v36  ;;  %v3540_v7 = vsel %vm3101_vm3, %v9943_v63, 0.0 }
 0x2e3   :  { %v3182_v42 = vpop.xlane.xlu0 %3181  ;;  %8182 = vpow2.f32 %v3404_v27  ;;  %v3316_v13 = vsub.f32 %v9673_v23, %v3170_v41  ;;  %3541 = vadd.xlane.f32.xlu1 %v3540_v7  ;;  %v3528_v50 = vsel %vm3101_vm3, %v9947_v29, 0.0 }
 0x2e4   :  { %v3320_v20 = vsub.f32 %v9689_v30, %v3182_v42  ;;  %8184 = vpow2.f32 %v3412_v46 }
 0x2e5   :  { %v9953_v15 = vpop.eup %8174  ;;  %v3402_v56 = vmul.f32 1.442695, %v3316_v13 }
 0x2e6   :  { %v3410_v39 = vmul.f32 1.442695, %v3320_v20  ;;  %v9957_v16 = vpop.eup %8176  ;;  %v3203_v34 = vpop.xlane.xlu1 %3202  ;;  %3529 = vadd.xlane.f32.xlu0 %v3528_v50  ;;  %v3549_v40 = vsel %vm3101_vm3, %v9953_v15, 0.0 }
 0x2e7   :  { %v3191_v43 = vpop.xlane.xlu0 %3190  ;;  %8186 = vpow2.f32 %v3402_v56  ;;  %v3327_v23 = vsub.f32 %v9711_v18, %v3203_v34  ;;  %3550 = vadd.xlane.f32.xlu1 %v3549_v40  ;;  %v3561_v0 = vsel %vm3101_vm3, %v9957_v16, 0.0 }
 0x2e8   :  { %v3323_v30 = vsub.f32 %v9695_v2, %v3191_v43  ;;  %8188 = vpow2.f32 %v3410_v39 }
 0x2e9   :  { %v9963_v32 = vpop.eup %8178  ;;  %v3424_v6 = vmul.f32 1.442695, %v3327_v23 }
 0x2ea   :  { %v3416_v38 = vmul.f32 1.442695, %v3323_v30  ;;  %v9967_v27 = vpop.eup %8180  ;;  %v3200_v46 = vpop.xlane.xlu1 %3199  ;;  %3562 = vadd.xlane.f32.xlu0 %v3561_v0  ;;  %v3546_v41 = vsel %vm3101_vm3, %v9963_v32, 0.0 }
 0x2eb   :  { %v3188_v36 = vpop.xlane.xlu0 %3187  ;;  %8190 = vpow2.f32 %v3424_v6  ;;  %v3326_v2 = vsub.f32 %v9713_v37, %v3200_v46  ;;  %3547 = vadd.xlane.f32.xlu1 %v3546_v41  ;;  %v3558_v20 = vsel %vm3101_vm3, %v9967_v27, 0.0 }
 0x2ec   :  { %v3322_v18 = vsub.f32 %v9697_v60, %v3188_v36  ;;  %8192 = vpow2.f32 %v3416_v38 }
 0x2ed   :  { %v9973_v42 = vpop.eup %8182  ;;  %v3422_v7 = vmul.f32 1.442695, %v3326_v2 }
 0x2ee   :  { %v3414_v13 = vmul.f32 1.442695, %v3322_v18  ;;  %v9977_v56 = vpop.eup %8184  ;;  %v3209_v39 = vpop.xlane.xlu1 %3208  ;;  %3559 = vadd.xlane.f32.xlu0 %v3558_v20  ;;  %v3555_v34 = vsel %vm3101_vm3, %v9973_v42, 0.0 }
 0x2ef   :  { %v3197_v50 = vpop.xlane.xlu0 %3196  ;;  %8194 = vpow2.f32 %v3422_v7  ;;  %v3329_v60 = vsub.f32 %v9719_v14, %v3209_v39  ;;  %3556 = vadd.xlane.f32.xlu1 %v3555_v34  ;;  %v3567_v30 = vsel %vm3101_vm3, %v9977_v56, 0.0 }
 0x2f0   :  { %v3325_v37 = vsub.f32 %v9703_v1, %v3197_v50  ;;  %8196 = vpow2.f32 %v3414_v13 }
 0x2f1   :  { %v9983_v43 = vpop.eup %8186  ;;  %v3428_v40 = vmul.f32 1.442695, %v3329_v60 }
 0x2f2   :  { %v3420_v23 = vmul.f32 1.442695, %v3325_v37  ;;  %v9987_v6 = vpop.eup %8188  ;;  %v3206_v38 = vpop.xlane.xlu1 %3205  ;;  %3568 = vadd.xlane.f32.xlu0 %v3567_v30  ;;  %v3552_v46 = vsel %vm3101_vm3, %v9983_v43, 0.0 }
 0x2f3   :  { %v3194_v0 = vpop.xlane.xlu0 %3193  ;;  %8198 = vpow2.f32 %v3428_v40  ;;  %v3328_v1 = vsub.f32 %v9721_v49, %v3206_v38  ;;  %3553 = vadd.xlane.f32.xlu1 %v3552_v46  ;;  %v3564_v18 = vsel %vm3101_vm3, %v9987_v6, 0.0 }
 0x2f4   :  { %v3324_v14 = vsub.f32 %v9705_v9, %v3194_v0  ;;  %8200 = vpow2.f32 %v3420_v23 }
 0x2f5   :  { %v9993_v36 = vpop.eup %8190  ;;  %v3426_v41 = vmul.f32 1.442695, %v3328_v1 }
 0x2f6   :  { %v3418_v2 = vmul.f32 1.442695, %v3324_v14  ;;  %v9997_v7 = vpop.eup %8192  ;;  %v3215_v13 = vpop.xlane.xlu1 %3214  ;;  %3565 = vadd.xlane.f32.xlu0 %v3564_v18  ;;  %v3585_v39 = vsel %vm3101_vm3, %v9993_v36, 0.0 }
 0x2f7   :  { %v3227_v20 = vpop.xlane.xlu0 %3226  ;;  %8202 = vpow2.f32 %v3426_v41  ;;  %v3331_v9 = vsub.f32 %v9727_v61, %v3215_v13  ;;  %3586 = vadd.xlane.f32.xlu1 %v3585_v39  ;;  %v3573_v37 = vsel %vm3101_vm3, %v9997_v7, 0.0 }
 0x2f8   :  { %v3335_v49 = vsub.f32 %v9743_v10, %v3227_v20  ;;  %8204 = vpow2.f32 %v3418_v2 }
 0x2f9   :  { %v10003_v50 = vpop.eup %8194  ;;  %v3432_v34 = vmul.f32 1.442695, %v3331_v9 }
 0x2fa   :  { %v3440_v60 = vmul.f32 1.442695, %v3335_v49  ;;  %v10007_v40 = vpop.eup %8196  ;;  %v3212_v23 = vpop.xlane.xlu1 %3211  ;;  %3574 = vadd.xlane.f32.xlu0 %v3573_v37  ;;  %v3582_v38 = vsel %vm3101_vm3, %v10003_v50, 0.0 }
 0x2fb   :  { %v3224_v30 = vpop.xlane.xlu0 %3223  ;;  %8206 = vpow2.f32 %v3432_v34  ;;  %v3330_v10 = vsub.f32 %v9729_v53, %v3212_v23  ;;  %3583 = vadd.xlane.f32.xlu1 %v3582_v38  ;;  %v3570_v14 = vsel %vm3101_vm3, %v10007_v40, 0.0 }
 0x2fc   :  { %v3334_v61 = vsub.f32 %v9745_v11, %v3224_v30  ;;  %8208 = vpow2.f32 %v3440_v60 }
 0x2fd   :  { %v10013_v0 = vpop.eup %8198  ;;  %v3430_v46 = vmul.f32 1.442695, %v3330_v10 }
 0x2fe   :  { %v3438_v1 = vmul.f32 1.442695, %v3334_v61  ;;  %v10017_v41 = vpop.eup %8200  ;;  %v3221_v2 = vpop.xlane.xlu1 %3220  ;;  %3571 = vadd.xlane.f32.xlu0 %v3570_v14  ;;  %v3591_v13 = vsel %vm3101_vm3, %v10013_v0, 0.0 }
 0x2ff   :  { %v3233_v18 = vpop.xlane.xlu0 %3232  ;;  %8210 = vpow2.f32 %v3430_v46  ;;  %v3333_v11 = vsub.f32 %v9735_v22, %v3221_v2  ;;  %3592 = vadd.xlane.f32.xlu1 %v3591_v13  ;;  %v3579_v49 = vsel %vm3101_vm3, %v10017_v41, 0.0 }
 0x300   :  { %v3337_v53 = vsub.f32 %v9751_v47, %v3233_v18  ;;  %8212 = vpow2.f32 %v3438_v1 }
 0x301   :  { %v10023_v20 = vpop.eup %8202  ;;  %v3436_v39 = vmul.f32 1.442695, %v3333_v11 }
 0x302   :  { %v3444_v9 = vmul.f32 1.442695, %v3337_v53  ;;  %v10027_v34 = vpop.eup %8204  ;;  %v3218_v60 = vpop.xlane.xlu1 %3217  ;;  %3580 = vadd.xlane.f32.xlu0 %v3579_v49  ;;  %v3588_v23 = vsel %vm3101_vm3, %v10023_v20, 0.0 }
 0x303   :  { %v3230_v37 = vpop.xlane.xlu0 %3229  ;;  %8214 = vpow2.f32 %v3436_v39  ;;  %v3332_v47 = vsub.f32 %v9737_v48, %v3218_v60  ;;  %3589 = vadd.xlane.f32.xlu1 %v3588_v23  ;;  %v3576_v61 = vsel %vm3101_vm3, %v10027_v34, 0.0 }
 0x304   :  { %v3336_v22 = vsub.f32 %v9753_v26, %v3230_v37  ;;  %8216 = vpow2.f32 %v3444_v9 }
 0x305   :  { %v10033_v30 = vpop.eup %8206  ;;  %v3434_v38 = vmul.f32 1.442695, %v3332_v47 }
 0x306   :  { %v3442_v10 = vmul.f32 1.442695, %v3336_v22  ;;  %v10037_v46 = vpop.eup %8208  ;;  %v3251_v1 = vpop.xlane.xlu1 %3250  ;;  %3577 = vadd.xlane.f32.xlu0 %v3576_v61  ;;  %v3597_v2 = vsel %vm3101_vm3, %v10033_v30, 0.0 }
 0x307   :  { %v3239_v14 = vpop.xlane.xlu0 %3238  ;;  %8218 = vpow2.f32 %v3434_v38  ;;  %v3343_v26 = vsub.f32 %v9775_v28, %v3251_v1  ;;  %3598 = vadd.xlane.f32.xlu1 %v3597_v2  ;;  %v3609_v53 = vsel %vm3101_vm3, %v10037_v46, 0.0 }
 0x308   :  { %v3339_v48 = vsub.f32 %v9759_v51, %v3239_v14  ;;  %8220 = vpow2.f32 %v3442_v10 }
 0x309   :  { %v10043_v18 = vpop.eup %8210  ;;  %v3456_v13 = vmul.f32 1.442695, %v3343_v26 }
 0x30a   :  { %v3448_v11 = vmul.f32 1.442695, %v3339_v48  ;;  %v10047_v39 = vpop.eup %8212  ;;  %v3248_v9 = vpop.xlane.xlu1 %3247  ;;  %3610 = vadd.xlane.f32.xlu0 %v3609_v53  ;;  %v3594_v60 = vsel %vm3101_vm3, %v10043_v18, 0.0 }
 0x30b   :  { %v3236_v49 = vpop.xlane.xlu0 %3235  ;;  %8222 = vpow2.f32 %v3456_v13  ;;  %v3342_v28 = vsub.f32 %v9777_v8, %v3248_v9  ;;  %3595 = vadd.xlane.f32.xlu1 %v3594_v60  ;;  %v3606_v22 = vsel %vm3101_vm3, %v10047_v39, 0.0 }
 0x30c   :  { %v3338_v51 = vsub.f32 %v9761_v62, %v3236_v49  ;;  %8224 = vpow2.f32 %v3448_v11  ;;  %v10721_v49 = vld [vmem:[#allocation4_spill] sm:$0xff] }
 0x30d   :  { %v10053_v37 = vpop.eup %8214  ;;  %v3454_v23 = vmul.f32 1.442695, %v3342_v28 }
 0x30e   :  { %v3446_v47 = vmul.f32 1.442695, %v3338_v51  ;;  %v10057_v38 = vpop.eup %8216  ;;  %v3257_v10 = vpop.xlane.xlu1 %3256  ;;  %3607 = vadd.xlane.f32.xlu0 %v3606_v22  ;;  %v3603_v1 = vsel %vm3101_vm3, %v10053_v37, 0.0 }
 0x30f   :  { %v3245_v61 = vpop.xlane.xlu0 %3244  ;;  %8226 = vpow2.f32 %v3454_v23  ;;  %v3345_v8 = vsub.f32 %v9783_v3, %v3257_v10  ;;  %3604 = vadd.xlane.f32.xlu1 %v3603_v1  ;;  %v3615_v48 = vsel %vm3101_vm3, %v10057_v38, 0.0  ;;  %v10720_v3 = vld [vmem:[#allocation3_spill] sm:$0xff] }
 0x310   :  { %v3341_v62 = vsub.f32 %v9767_v12, %v3245_v61  ;;  %8228 = vpow2.f32 %v3446_v47 }
 0x311   :  { %v10063_v14 = vpop.eup %8218  ;;  %v3460_v2 = vmul.f32 1.442695, %v3345_v8  ;;  %v10723_v8 = vld [vmem:[#allocation6_spill] sm:$0xff] }
 0x312   :  { %v3452_v26 = vmul.f32 1.442695, %v3341_v62  ;;  %v10067_v13 = vpop.eup %8220  ;;  %v3254_v11 = vpop.xlane.xlu1 %3253  ;;  %3616 = vadd.xlane.f32.xlu0 %v3615_v48  ;;  %v3600_v9 = vsel %vm3101_vm3, %v10063_v14, 0.0 }
 0x313   :  { %v3242_v53 = vpop.xlane.xlu0 %3241  ;;  %8230 = vpow2.f32 %v3460_v2  ;;  %v3344_v12 = vsub.f32 %v10720_v3, %v3254_v11  ;;  %3601 = vadd.xlane.f32.xlu1 %v3600_v9  ;;  %v3612_v47 = vsel %vm3101_vm3, %v10067_v13, 0.0  ;;  %v10724_v2 = vld [vmem:[#allocation15_spill] sm:$0xff] }
 0x314   :  { %v3340_v60 = vsub.f32 %v10721_v49, %v3242_v53  ;;  %8232 = vpow2.f32 %v3452_v26 }
 0x315   :  { %v10073_v28 = vpop.eup %8222  ;;  %v3458_v51 = vmul.f32 1.442695, %v3344_v12 }
 0x316   :  { %v3450_v23 = vmul.f32 1.442695, %v3340_v60  ;;  %v10077_v22 = vpop.eup %8224  ;;  %v3263_v10 = vpop.xlane.xlu1 %3262  ;;  %3613 = vadd.xlane.f32.xlu0 %v3612_v47  ;;  %v3633_v1 = vsel %vm3101_vm3, %v10073_v28, 0.0 }
 0x317   :  { %10722 = vst [vmem:[#allocation3_spill] sm:$0xff] %v10077_v22  ;;  %v3272_v61 = vpop.xlane.xlu0 %3271  ;;  %8234 = vpow2.f32 %v3458_v51  ;;  %v3347_v62 = vsub.f32 %v10723_v8, %v3263_v10  ;;  %3634 = vadd.xlane.f32.xlu1 %v3633_v1  ;;  %v3621_v9 = vsel %vm3101_vm3, %v10077_v22, 0.0  ;;  %v10726_v51 = vld [vmem:[#allocation5_spill] sm:$0xff]  ;;  %v10727_v10 = vld [vmem:[#allocation18_spill] sm:$0xff] }
 0x318   :  { %v3350_v26 = vsub.f32 %v10724_v2, %v3272_v61  ;;  %8236 = vpow2.f32 %v3450_v23 }
 0x319   :  { %v10083_v48 = vpop.eup %8226  ;;  %v3464_v11 = vmul.f32 1.442695, %v3347_v62 }
 0x31a   :  { %v3470_v53 = vmul.f32 1.442695, %v3350_v26  ;;  %v10087_v3 = vpop.eup %8228  ;;  %v3260_v12 = vpop.xlane.xlu1 %3259  ;;  %3622 = vadd.xlane.f32.xlu0 %v3621_v9  ;;  %v3630_v60 = vsel %vm3101_vm3, %v10083_v48, 0.0 }
 0x31b   :  { %10725 = vst [vmem:[#allocation4_spill] sm:$0xff] %v10087_v3  ;;  %v3278_v49 = vpop.xlane.xlu0 %3277  ;;  %8238 = vpow2.f32 %v3464_v11  ;;  %v3346_v47 = vsub.f32 %v10726_v51, %v3260_v12  ;;  %3631 = vadd.xlane.f32.xlu1 %v3630_v60  ;;  %v3618_v62 = vsel %vm3101_vm3, %v10087_v3, 0.0  ;;  %v10730_v12 = vld [vmem:[#allocation20_spill] sm:$0xff] }
 0x31c   :  { %v3352_v23 = vsub.f32 %v10727_v10, %v3278_v49  ;;  %8240 = vpow2.f32 %v3470_v53  ;;  %v10731_v53 = vld [vmem:[#allocation8_spill] sm:$0xff] }
 0x31d   :  { %v10093_v61 = vpop.eup %8230  ;;  %v3462_v1 = vmul.f32 1.442695, %v3346_v47 }
 0x31e   :  { %10728 = vst [vmem:[#allocation6_spill] sm:$0xff] %v10093_v61  ;;  %v3474_v8 = vmul.f32 1.442695, %v3352_v23  ;;  %v10097_v2 = vpop.eup %8232  ;;  %v3269_v26 = vpop.xlane.xlu1 %3268  ;;  %3619 = vadd.xlane.f32.xlu0 %v3618_v62  ;;  %v3639_v11 = vsel %vm3101_vm3, %v10093_v61, 0.0  ;;  %v10733_v61 = vld [vmem:[#allocation7_spill] sm:$0xff] }
 0x31f   :  { %10729 = vst [vmem:[#allocation15_spill] sm:$0xff] %v10097_v2  ;;  %v3284_v9 = vpop.xlane.xlu0 %3283  ;;  %8242 = vpow2.f32 %v3462_v1  ;;  %3640 = vadd.xlane.f32.xlu1 %v3639_v11  ;;  %v3349_v60 = vsub.f32 %v10731_v53, %v3269_v26  ;;  %v3627_v10 = vsel %vm3101_vm3, %v10097_v2, 0.0  ;;  %v10734_v11 = vld [vmem:[#allocation39_spill] sm:$0xff] }
 0x320   :  { %v3354_v49 = vsub.f32 %v10730_v12, %v3284_v9  ;;  %8244 = vpow2.f32 %v3474_v8 }
 0x321   :  { %v10103_v51 = vpop.eup %8234  ;;  %v3468_v26 = vmul.f32 1.442695, %v3349_v60 }
 0x322   :  { %10732 = vst [vmem:[#allocation5_spill] sm:$0xff] %v10103_v51  ;;  %v3478_v47 = vmul.f32 1.442695, %v3354_v49  ;;  %v10107_v23 = vpop.eup %8236  ;;  %v3266_v62 = vpop.xlane.xlu1 %3265  ;;  %3628 = vadd.xlane.f32.xlu0 %v3627_v10  ;;  %v3636_v1 = vsel %vm3101_vm3, %v10103_v51, 0.0 }
 0x323   :  { %v3290_v22 = vpop.xlane.xlu0 %3289  ;;  %v3348_v9 = vsub.f32 %v10733_v61, %v3266_v62  ;;  %3637 = vadd.xlane.f32.xlu1 %v3636_v1  ;;  %v3624_v2 = vsel %vm3101_vm3, %v10107_v23, 0.0  ;;  %v10736_v61 = vld [vmem:[#allocation9_spill] sm:$0xff] }
 0x324   :  { %v3356_v8 = vsub.f32 %v10734_v11, %v3290_v22  ;;  %8246 = vpow2.f32 %v3478_v47  ;;  %v10738_v11 = vld [vmem:[#allocation13_spill] sm:$0xff] }
 0x325   :  { %v10113_v12 = vpop.eup %8238  ;;  %v3466_v49 = vmul.f32 1.442695, %v3348_v9 }
 0x326   :  { %10735 = vst [vmem:[#allocation18_spill] sm:$0xff] %v10113_v12  ;;  %v3482_v53 = vmul.f32 1.442695, %v3356_v8  ;;  %v10117_v3 = vpop.eup %8240  ;;  %v3275_v10 = vpop.xlane.xlu1 %3274  ;;  %3625 = vadd.xlane.f32.xlu0 %v3624_v2  ;;  %v3645_v51 = vsel %vm3101_vm3, %v10113_v12, 0.0 }
 0x327   :  { %8248 = vpow2.f32 %v3466_v49  ;;  %v3351_v22 = vsub.f32 %v10736_v61, %v3275_v10  ;;  %3646 = vadd.xlane.f32.xlu1 %v3645_v51  ;;  %v3654_v62 = vsel %vm3101_vm3, %v10117_v3, 0.0  ;;  %v10740_v10 = vld [vmem:[#allocation17_spill] sm:$0xff] }
 0x328   :  { %8250 = vpow2.f32 %v3482_v53 }
 0x329   :  { %v10122_v60 = vpop.eup %8242  ;;  %8252 = vpow2.f32 %v3468_v26  ;;  %v3472_v47 = vmul.f32 1.442695, %v3351_v22 }
 0x32a   :  { %v10126_v1 = vpop.eup %8244  ;;  %v3281_v9 = vpop.xlane.xlu1 %3280  ;;  %3655 = vadd.xlane.f32.xlu0 %v3654_v62  ;;  %v3642_v2 = vsel %vm3101_vm3, %v10122_v60, 0.0 }
 0x32b   :  { %10737 = vst [vmem:[#allocation20_spill] sm:$0xff] %v10126_v1  ;;  %v3353_v8 = vsub.f32 %v10738_v11, %v3281_v9  ;;  %3643 = vadd.xlane.f32.xlu1 %v3642_v2  ;;  %8254 = vpow2.f32 %v3472_v47  ;;  %v3660_v49 = vsel %vm3101_vm3, %v10126_v1, 0.0 }
 0x32d   :  { %v3476_v51 = vmul.f32 1.442695, %v3353_v8  ;;  %v10742_v8 = vld [vmem:[#allocation19_spill] sm:$0xff] }
 0x32e   :  { %v10133_v26 = vpop.eup %8246  ;;  %v3287_v53 = vpop.xlane.xlu1 %3286  ;;  %3661 = vadd.xlane.f32.xlu0 %v3660_v49 }
 0x32f   :  { %10739 = vst [vmem:[#allocation8_spill] sm:$0xff] %v10133_v26  ;;  %v3355_v61 = vsub.f32 %v10740_v10, %v3287_v53  ;;  %8256 = vpow2.f32 %v3476_v51  ;;  %v3666_v12 = vsel %vm3101_vm3, %v10133_v26, 0.0 }
 0x331   :  { %v10136_v22 = vpop.eup %8248  ;;  %v3480_v62 = vmul.f32 1.442695, %v3355_v61 }
 0x332   :  { %v10140_v9 = vpop.eup %8250  ;;  %v3293_v47 = vpop.xlane.xlu1 %3292  ;;  %3667 = vadd.xlane.f32.xlu0 %v3666_v12  ;;  %v3648_v2 = vsel %vm3101_vm3, %v10136_v22, 0.0 }
 0x333   :  { %10741 = vst [vmem:[#allocation7_spill] sm:$0xff] %v10140_v9  ;;  %v10144_v11 = vpop.eup %8252  ;;  %v3357_v49 = vsub.f32 %v10742_v8, %v3293_v47  ;;  %3649 = vadd.xlane.f32.xlu1 %v3648_v2  ;;  %8258 = vpow2.f32 %v3480_v62  ;;  %v3672_v51 = vsel %vm3101_vm3, %v10140_v9, 0.0 }
 0x334   :  { %v3651_v10 = vsel %vm3101_vm3, %v10144_v11, 0.0 }
 0x335   :  { %v3484_v53 = vmul.f32 1.442695, %v3357_v49  ;;  %v10151_v61 = vpop.eup %8254 }
 0x336   :  { %3673 = vadd.xlane.f32.xlu0 %v3672_v51  ;;  %10743 = vst [vmem:[#allocation39_spill] sm:$0xff] %v10151_v61  ;;  %v3657_v12 = vsel %vm3101_vm3, %v10151_v61, 0.0 }
 0x337   :  { %3652 = vadd.xlane.f32.xlu1 %v3651_v10  ;;  %8260 = vpow2.f32 %v3484_v53 }
 0x339   :  { %v10155_v26 = vpop.eup %8256 }
 0x33a   :  { %10744 = vst [vmem:[#allocation9_spill] sm:$0xff] %v10155_v26  ;;  %v3663_v62 = vsel %vm3101_vm3, %v10155_v26, 0.0 }
 0x33b   :  { %3658 = vadd.xlane.f32.xlu1 %v3657_v12 }
 0x33d   :  { %v10159_v47 = vpop.eup %8258 }
 0x33e   :  { %10745 = vst [vmem:[#allocation13_spill] sm:$0xff] %v10159_v47  ;;  %v3669_v2 = vsel %vm3101_vm3, %v10159_v47, 0.0 }
 0x33f   :  { %3664 = vadd.xlane.f32.xlu1 %v3663_v62 }
 0x341   :  { %v10163_v8 = vpop.eup %8260 }
 0x342   :  { %10746 = vst [vmem:[#allocation17_spill] sm:$0xff] %v10163_v8  ;;  %v3675_v53 = vsel %vm3101_vm3, %v10163_v8, 0.0 }
 0x343   :  { %3670 = vadd.xlane.f32.xlu1 %v3669_v2  ;;  %v3491_v49 = vpop.xlane.xlu1 %3490 }
 0x344   :  { %8262 = vrcp.f32 %v3491_v49 }
 0x347   :  { %3676 = vadd.xlane.f32.xlu1 %v3675_v53  ;;  %v3488_v51 = vpop.xlane.xlu0 %3487 }
 0x348   :  { %8264 = vrcp.f32 %v3488_v51  ;;  %v3497_v10 = vpop.xlane.xlu1 %3496  ;;  %v10747_v51 = vld [vmem:[#allocation21_spill] sm:$0xff] }
 0x349   :  { %8266 = vrcp.f32 %v3497_v10 }
 0x34b   :  { %v3494_v12 = vpop.xlane.xlu0 %3493 }
 0x34c   :  { %8268 = vrcp.f32 %v3494_v12  ;;  %v10748_v12 = vld [vmem:[#allocation22_spill] sm:$0xff] }
 0x34e   :  { %v8263_v26 = vpop.eup %8262 }
 0x34f   :  { %v3500_v9 = vpop.xlane.xlu0 %3499  ;;  %v3503_v62 = vpop.xlane.xlu1 %3502  ;;  %v3681_v8 = vmul.f32 %v8263_v26, %v9854_v21 }
 0x350   :  { %8270 = vrcp.f32 %v3500_v9 }
 0x351   :  { %8272 = vrcp.f32 %v3503_v62 }
 0x352   :  { %v8265_v47 = vpop.eup %8264 }
 0x353   :  { %v3506_v1 = vpop.xlane.xlu0 %3505  ;;  %v3509_v2 = vpop.xlane.xlu1 %3508  ;;  %v3679_v61 = vmul.f32 %v8265_v47, %v9860_v25 }
 0x354   :  { %8274 = vrcp.f32 %v3506_v1  ;;  %v8267_v49 = vpop.eup %8266 }
 0x355   :  { %8276 = vrcp.f32 %v3509_v2  ;;  %7406 = vmatprep.mubr.msk.f32.mxu0 %vm3101_vm3, %v3679_v61  ;;  %v3685_v62 = vmul.f32 %v8267_v49, %v9862_v35  ;;  %v10749_v61 = vld [vmem:[#allocation23_spill] sm:$0xff]  ;;  %v10750_v49 = vld [vmem:[#allocation24_spill] sm:$0xff] }
 0x356   :  { %v8269_v53 = vpop.eup %8268  ;;  %7407 = vmatmul.mubr.msk.f32.vlgmr.msra.gmra.mrb[128].mxu0 %vm3101_vm3, %v3681_v8 }
 0x357   :  { %8041 = vmatpush3.bf16.msra.mxu0 %v10747_v51  ;;  %v3515_v9 = vpop.xlane.xlu0 %3514  ;;  %v3683_v10 = vmul.f32 %v8269_v53, %v9869_v33  ;;  %v10751_v53 = vld [vmem:[#allocation28_spill] sm:$0xff] }
 0x358   :  { %8043 = vmatprep.subr.bf16.mxu0 %v10748_v12  ;;  %8278 = vrcp.f32 %v3515_v9 }
 0x359   :  { %7409 = vmatprep.mubr.msk.f32.mxu0 %vm3101_vm3, %v3683_v10 }
 0x35a   :  { %v8271_v21 = vpop.eup %8270  ;;  %7410 = vmatmul.mubr.msk.f32.gmra.mrb[130].mxu0 %vm3101_vm3, %v3685_v62 }
 0x35b   :  { %v8273_v25 = vpop.eup %8272  ;;  %8045 = vmatpush3.bf16.msra.mxu0 %v10748_v12  ;;  %v3512_v1 = vpop.xlane.xlu0 %3511  ;;  %v3687_v26 = vmul.f32 %v8271_v21, %v9873_v44  ;;  %v10752_v21 = vld [vmem:[#allocation25_spill] sm:$0xff] }
 0x35c   :  { %8280 = vrcp.f32 %v3512_v1  ;;  %8047 = vmatprep.subr.bf16.mxu0 %v10749_v61  ;;  %v3689_v33 = vmul.f32 %v8273_v25, %v9876_v54  ;;  %v10753_v1 = vld [vmem:[#allocation26_spill] sm:$0xff] }
 0x35d   :  { %7412 = vmatprep.mubr.msk.f32.mxu0 %vm3101_vm3, %v3687_v26 }
 0x35e   :  { %v8275_v35 = vpop.eup %8274  ;;  %7413 = vmatmul.mubr.msk.f32.gmra.mrb[132].mxu0 %vm3101_vm3, %v3689_v33 }
 0x35f   :  { %v8277_v47 = vpop.eup %8276  ;;  %8049 = vmatpush3.bf16.msra.mxu0 %v10749_v61  ;;  %v3521_v8 = vpop.xlane.xlu0 %3520  ;;  %v3691_v2 = vmul.f32 %v8275_v35, %v9882_v31  ;;  %v10754_v35 = vld [vmem:[#allocation27_spill] sm:$0xff] }
 0x360   :  { %8051 = vmatprep.subr.bf16.mxu0 %v10750_v49  ;;  %v3693_v44 = vmul.f32 %v8277_v47, %v9885_v57  ;;  %8282 = vrcp.f32 %v3521_v8 }
 0x361   :  { %7415 = vmatprep.mubr.msk.f32.mxu0 %vm3101_vm3, %v3691_v2 }
 0x362   :  { %7416 = vmatmul.mubr.msk.f32.gmra.mrb[134].mxu0 %vm3101_vm3, %v3693_v44  ;;  %v8279_v9 = vpop.eup %8278 }
 0x363   :  { %8053 = vmatpush3.bf16.msra.mxu0 %v10750_v49  ;;  %v3518_v54 = vpop.xlane.xlu0 %3517  ;;  %v3697_v62 = vmul.f32 %v8279_v9, %v9891_v4 }
 0x364   :  { %8284 = vrcp.f32 %v3518_v54  ;;  %8071 = vmatprep.subr.bf16.mxu0 %v10751_v53  ;;  %v3539_v51 = vpop.xlane.xlu1 %3538  ;;  %v10755_v54 = vld [vmem:[#allocation29_spill] sm:$0xff] }
 0x365   :  { %8286 = vrcp.f32 %v3539_v51 }
 0x366   :  { %v8281_v10 = vpop.eup %8280 }
 0x367   :  { %v3527_v12 = vpop.xlane.xlu0 %3526  ;;  %v3695_v31 = vmul.f32 %v8281_v10, %v9897_v52 }
 0x368   :  { %v3536_v57 = vpop.xlane.xlu1 %3535 }
 0x369   :  { %8288 = vrcp.f32 %v3536_v57  ;;  %7434 = vmatprep.mubr.msk.f32.mxu1 %vm3101_vm3, %v3695_v31 }
 0x36a   :  { %7435 = vmatmul.mubr.msk.f32.vlgmr.msra.gmra.mrb[128].mxu1 %vm3101_vm3, %v3697_v62  ;;  %8290 = vrcp.f32 %v3527_v12  ;;  %v8283_v61 = vpop.eup %8282  ;;  %v10756_v62 = vld [vmem:[#allocation33_spill] sm:$0xff] }
 0x36b   :  { %8057 = vmatpush3.bf16.msra.mxu1 %v10752_v21  ;;  %v3524_v25 = vpop.xlane.xlu0 %3523  ;;  %v3701_v8 = vmul.f32 %v8283_v61, %v9903_v17  ;;  %v10757_v21 = vld [vmem:[#allocation30_spill] sm:$0xff]  ;;  %v10758_v61 = vld [vmem:[#allocation31_spill] sm:$0xff] }
 0x36c   :  { %8059 = vmatprep.subr.bf16.mxu1 %v10753_v1  ;;  %8292 = vrcp.f32 %v3524_v25  ;;  %v3545_v26 = vpop.xlane.xlu1 %3544 }
 0x36d   :  { %8294 = vrcp.f32 %v3545_v26 }
 0x36e   :  { %v8285_v33 = vpop.eup %8284 }
 0x36f   :  { %8061 = vmatpush3.bf16.msra.mxu1 %v10753_v1  ;;  %v3533_v4 = vpop.xlane.xlu0 %3532  ;;  %v3699_v52 = vmul.f32 %v8285_v33, %v9909_v55  ;;  %v8287_v2 = vpop.eup %8286 }
 0x370   :  { %8063 = vmatprep.subr.bf16.mxu1 %v10754_v35  ;;  %v3542_v47 = vpop.xlane.xlu1 %3541  ;;  %v3713_v17 = vmul.f32 %v8287_v2, %v9913_v45 }
 0x371   :  { %8296 = vrcp.f32 %v3542_v47  ;;  %7437 = vmatprep.mubr.msk.f32.mxu1 %vm3101_vm3, %v3699_v52 }
 0x372   :  { %7438 = vmatmul.mubr.msk.f32.gmra.mrb[130].mxu1 %vm3101_vm3, %v3701_v8  ;;  %8298 = vrcp.f32 %v3533_v4 }
 0x373   :  { %v8289_v49 = vpop.eup %8288  ;;  %8065 = vmatpush3.bf16.msra.mxu1 %v10754_v35  ;;  %v3530_v44 = vpop.xlane.xlu0 %3529 }
 0x374   :  { %8067 = vmatprep.subr.bf16.mxu1 %v10755_v54  ;;  %8300 = vrcp.f32 %v3530_v44  ;;  %v3551_v55 = vpop.xlane.xlu1 %3550  ;;  %v3711_v51 = vmul.f32 %v8289_v49, %v9923_v24  ;;  %v8291_v9 = vpop.eup %8290 }
 0x375   :  { %8302 = vrcp.f32 %v3551_v55  ;;  %v3705_v24 = vmul.f32 %v8291_v9, %v9917_v58 }
 0x376   :  { %v8293_v10 = vpop.eup %8292  ;;  %7462 = vmatprep.mubr.msk.f32.mxu0 %vm3101_vm3, %v3711_v51 }
 0x377   :  { %7463 = vmatmul.mubr.msk.f32.vlgmr.msra.gmra.mrb[136].mxu0 %vm3101_vm3, %v3713_v17  ;;  %8069 = vmatpush3.bf16.msra.mxu1 %v10755_v54  ;;  %v3563_v12 = vpop.xlane.xlu0 %3562  ;;  %v3703_v31 = vmul.f32 %v8293_v10, %v9927_v5  ;;  %v8295_v45 = vpop.eup %8294  ;;  %v10760_v54 = vld [vmem:[#allocation35_spill] sm:$0xff] }
 0x378   :  { %8073 = vmatpush3.bf16.msra.mxu0 %v10751_v53  ;;  %8087 = vmatprep.subr.bf16.mxu1 %v10756_v62  ;;  %v3548_v57 = vpop.xlane.xlu1 %3547  ;;  %v3717_v58 = vmul.f32 %v8295_v45, %v9933_v19 }
 0x379   :  { %8075 = vmatprep.subr.bf16.mxu0 %v10757_v21  ;;  %8304 = vrcp.f32 %v3548_v57  ;;  %7440 = vmatprep.mubr.msk.f32.mxu1 %vm3101_vm3, %v3703_v31  ;;  %v10761_v31 = vld [vmem:[#allocation34_spill] sm:$0xff] }
 0x37a   :  { %7441 = vmatmul.mubr.msk.f32.gmra.mrb[132].mxu1 %vm3101_vm3, %v3705_v24  ;;  %8306 = vrcp.f32 %v3563_v12 }
 0x37b   :  { %v8297_v25 = vpop.eup %8296  ;;  %v3560_v1 = vpop.xlane.xlu0 %3559 }
 0x37c   :  { %8077 = vmatpush3.bf16.msra.mxu0 %v10757_v21  ;;  %8308 = vrcp.f32 %v3560_v1  ;;  %v3557_v5 = vpop.xlane.xlu1 %3556  ;;  %v3715_v53 = vmul.f32 %v8297_v25, %v9943_v63  ;;  %v8299_v26 = vpop.eup %8298  ;;  %v10759_v63 = vld [vmem:[#allocation32_spill] sm:$0xff] }
 0x37d   :  { %8079 = vmatprep.subr.bf16.mxu0 %v10758_v61  ;;  %8310 = vrcp.f32 %v3557_v5  ;;  %v3709_v47 = vmul.f32 %v8299_v26, %v9937_v59  ;;  %v10762_v25 = vld [vmem:[#allocation12_spill] sm:$0xff] }
 0x37e   :  { %v8301_v33 = vpop.eup %8300  ;;  %7465 = vmatprep.mubr.msk.f32.mxu0 %vm3101_vm3, %v3715_v53  ;;  %v10763_v26 = vld [vmem:[#allocation16_spill] sm:$0xff] }
 0x37f   :  { %7466 = vmatmul.mubr.msk.f32.gmra.mrb[138].mxu0 %vm3101_vm3, %v3717_v58  ;;  %v3569_v4 = vpop.xlane.xlu0 %3568  ;;  %v3707_v52 = vmul.f32 %v8301_v33, %v9947_v29  ;;  %v8303_v19 = vpop.eup %8302 }
 0x380   :  { %8081 = vmatpush3.bf16.msra.mxu0 %v10758_v61  ;;  %v3554_v35 = vpop.xlane.xlu1 %3553  ;;  %v3721_v59 = vmul.f32 %v8303_v19, %v9953_v15 }
 0x381   :  { %8083 = vmatprep.subr.bf16.mxu0 %v10759_v63  ;;  %8312 = vrcp.f32 %v3554_v35  ;;  %7443 = vmatprep.mubr.msk.f32.mxu1 %vm3101_vm3, %v3707_v52  ;;  %v10764_v35 = vld [vmem:[#allocation14_spill] sm:$0xff] }
 0x382   :  { %7444 = vmatmul.mubr.msk.f32.gmra.mrb[134].mxu1 %vm3101_vm3, %v3709_v47  ;;  %8314 = vrcp.f32 %v3569_v4 }
 0x383   :  { %v8305_v8 = vpop.eup %8304  ;;  %v3566_v2 = vpop.xlane.xlu0 %3565 }
 0x384   :  { %8085 = vmatpush3.bf16.msra.mxu0 %v10759_v63  ;;  %8316 = vrcp.f32 %v3566_v2  ;;  %v3587_v29 = vpop.xlane.xlu1 %3586  ;;  %v3719_v49 = vmul.f32 %v8305_v8, %v9963_v32  ;;  %v8307_v44 = vpop.eup %8306  ;;  %v10765_v63 = vld [vmem:[#allocation36_spill] sm:$0xff] }
 0x385   :  { %8103 = vmatprep.subr.bf16.mxu0 %v10760_v54  ;;  %v3729_v17 = vmul.f32 %v8307_v44, %v9957_v16  ;;  %8318 = vrcp.f32 %v3587_v29 }
 0x386   :  { %v8309_v55 = vpop.eup %8308  ;;  %7468 = vmatprep.mubr.msk.f32.mxu0 %vm3101_vm3, %v3719_v49  ;;  %v10766_v49 = vld [vmem:[#allocation10_spill] sm:$0xff] }
 0x387   :  { %7469 = vmatmul.mubr.msk.f32.gmra.mrb[140].mxu0 %vm3101_vm3, %v3721_v59  ;;  %v3575_v51 = vpop.xlane.xlu0 %3574  ;;  %v3727_v9 = vmul.f32 %v8309_v55, %v9967_v27  ;;  %v8311_v32 = vpop.eup %8310 }
 0x388   :  { %v3584_v10 = vpop.xlane.xlu1 %3583  ;;  %v3725_v24 = vmul.f32 %v8311_v32, %v9973_v42 }
 0x389   :  { %8320 = vrcp.f32 %v3584_v10  ;;  %7490 = vmatprep.mubr.msk.f32.mxu1 %vm3101_vm3, %v3727_v9 }
 0x38a   :  { %7491 = vmatmul.mubr.msk.f32.vlgmr.msra.gmra.mrb[136].mxu1 %vm3101_vm3, %v3729_v17  ;;  %8322 = vrcp.f32 %v3575_v51 }
 0x38b   :  { %v8313_v12 = vpop.eup %8312  ;;  %8089 = vmatpush3.bf16.msra.mxu1 %v10756_v62  ;;  %v3572_v15 = vpop.xlane.xlu0 %3571 }
 0x38c   :  { %8091 = vmatprep.subr.bf16.mxu1 %v10761_v31  ;;  %8324 = vrcp.f32 %v3572_v15  ;;  %v3593_v57 = vpop.xlane.xlu1 %3592  ;;  %v3723_v27 = vmul.f32 %v8313_v12, %v9983_v43  ;;  %v8315_v16 = vpop.eup %8314 }
 0x38d   :  { %8326 = vrcp.f32 %v3593_v57  ;;  %v3733_v5 = vmul.f32 %v8315_v16, %v9977_v56 }
 0x38e   :  { %v8317_v21 = vpop.eup %8316  ;;  %7471 = vmatprep.mubr.msk.f32.mxu0 %vm3101_vm3, %v3723_v27 }
 0x38f   :  { %7472 = vmatmul.mubr.msk.f32.gmra.mrb[142].mxu0 %vm3101_vm3, %v3725_v24  ;;  %8093 = vmatpush3.bf16.msra.mxu1 %v10761_v31  ;;  %v3581_v45 = vpop.xlane.xlu0 %3580  ;;  %v3731_v62 = vmul.f32 %v8317_v21, %v9987_v6  ;;  %v8319_v42 = vpop.eup %8318  ;;  %v4838_v24 = vld [vmem:[%s10588_s4] sm:$0xff] }
 0x390   :  { %8095 = vmatprep.subr.bf16.mxu1 %v10762_v25  ;;  %v3590_v1 = vpop.xlane.xlu1 %3589  ;;  %v3745_v56 = vmul.f32 %v8319_v42, %v9993_v36  ;;  %v10769_v42 = vld [vmem:[#allocation38_spill] sm:$0xff] }
 0x391   :  { %8328 = vrcp.f32 %v3590_v1  ;;  %7493 = vmatprep.mubr.msk.f32.mxu1 %vm3101_vm3, %v3731_v62 }
 0x392   :  { %7494 = vmatmul.mubr.msk.f32.gmra.mrb[138].mxu1 %vm3101_vm3, %v3733_v5  ;;  %8330 = vrcp.f32 %v3581_v45 }
 0x393   :  { %v8321_v43 = vpop.eup %8320  ;;  %8097 = vmatpush3.bf16.msra.mxu1 %v10762_v25  ;;  %v3578_v53 = vpop.xlane.xlu0 %3577 }
 0x394   :  { %8099 = vmatprep.subr.bf16.mxu1 %v10763_v26  ;;  %8332 = vrcp.f32 %v3578_v53  ;;  %v3599_v6 = vpop.xlane.xlu1 %3598  ;;  %v3743_v61 = vmul.f32 %v8321_v43, %v10003_v50  ;;  %v8323_v58 = vpop.eup %8322 }
 0x395   :  { %8334 = vrcp.f32 %v3599_v6  ;;  %v3737_v50 = vmul.f32 %v8323_v58, %v9997_v7  ;;  %v10770_v6 = vld [vmem:[#allocation2_spill] sm:$0xff] }
 0x396   :  { %v8325_v33 = vpop.eup %8324  ;;  %7518 = vmatprep.mubr.msk.f32.mxu0 %vm3101_vm3, %v3743_v61 }
 0x397   :  { %7519 = vmatmul.mubr.msk.f32.vlgmr.msra.gmra.mrb[144].mxu0 %vm3101_vm3, %v3745_v56  ;;  %8101 = vmatpush3.bf16.msra.mxu1 %v10763_v26  ;;  %v3611_v4 = vpop.xlane.xlu0 %3610  ;;  %v3735_v52 = vmul.f32 %v8325_v33, %v10007_v40  ;;  %v8327_v36 = vpop.eup %8326 }
 0x398   :  { %8105 = vmatpush3.bf16.msra.mxu0 %v10760_v54  ;;  %8119 = vmatprep.subr.bf16.mxu1 %v10764_v35  ;;  %v3596_v47 = vpop.xlane.xlu1 %3595  ;;  %v3749_v7 = vmul.f32 %v8327_v36, %v10013_v0 }
 0x399   :  { %8107 = vmatprep.subr.bf16.mxu0 %v10765_v63  ;;  %8336 = vrcp.f32 %v3596_v47  ;;  %7496 = vmatprep.mubr.msk.f32.mxu1 %vm3101_vm3, %v3735_v52  ;;  %v10772_v47 = vld [vmem:[#allocation3_spill] sm:$0xff] }
 0x39a   :  { %7497 = vmatmul.mubr.msk.f32.gmra.mrb[140].mxu1 %vm3101_vm3, %v3737_v50  ;;  %8338 = vrcp.f32 %v3611_v4  ;;  %v10771_v4 = vld [vmem:[#allocation4_spill] sm:$0xff] }
 0x39b   :  { %v8329_v19 = vpop.eup %8328  ;;  %v3608_v8 = vpop.xlane.xlu0 %3607 }
 0x39c   :  { %8109 = vmatpush3.bf16.msra.mxu0 %v10765_v63  ;;  %8340 = vrcp.f32 %v3608_v8  ;;  %v3605_v40 = vpop.xlane.xlu1 %3604  ;;  %v3747_v2 = vmul.f32 %v8329_v19, %v10023_v20  ;;  %v8331_v29 = vpop.eup %8330  ;;  %v10767_v20 = vld [vmem:[#allocation37_spill] sm:$0xff]  ;;  %v10774_v8 = vld [vmem:[#allocation6_spill] sm:$0xff] }
 0x39d   :  { %8111 = vmatprep.subr.bf16.mxu0 %v10766_v49  ;;  %8342 = vrcp.f32 %v3605_v40  ;;  %v3741_v51 = vmul.f32 %v8331_v29, %v10017_v41  ;;  %v10773_v63 = vld [vmem:[#allocation5_spill] sm:$0xff] }
 0x39e   :  { %v8333_v44 = vpop.eup %8332  ;;  %7521 = vmatprep.mubr.msk.f32.mxu0 %vm3101_vm3, %v3747_v2 }
 0x39f   :  { %7522 = vmatmul.mubr.msk.f32.gmra.mrb[146].mxu0 %vm3101_vm3, %v3749_v7  ;;  %v3617_v54 = vpop.xlane.xlu0 %3616  ;;  %v3739_v59 = vmul.f32 %v8333_v44, %v10027_v34  ;;  %v8335_v0 = vpop.eup %8334  ;;  %v10775_v7 = vld [vmem:[#allocation15_spill] sm:$0xff] }
 0x3a0   :  { %8113 = vmatpush3.bf16.msra.mxu0 %v10766_v49  ;;  %v3602_v55 = vpop.xlane.xlu1 %3601  ;;  %v3753_v41 = vmul.f32 %v8335_v0, %v10033_v30 }
 0x3a1   :  { %8115 = vmatprep.subr.bf16.mxu0 %v10767_v20  ;;  %8344 = vrcp.f32 %v3602_v55  ;;  %7499 = vmatprep.mubr.msk.f32.mxu1 %vm3101_vm3, %v3739_v59 }
 0x3a2   :  { %7500 = vmatmul.mubr.msk.f32.gmra.mrb[142].mxu1 %vm3101_vm3, %v3741_v51  ;;  %8346 = vrcp.f32 %v3617_v54 }
 0x3a3   :  { %v8337_v9 = vpop.eup %8336  ;;  %v3614_v17 = vpop.xlane.xlu0 %3613 }
 0x3a4   :  { %8117 = vmatpush3.bf16.msra.mxu0 %v10767_v20  ;;  %8348 = vrcp.f32 %v3614_v17  ;;  %v3635_v34 = vpop.xlane.xlu1 %3634  ;;  %v3751_v10 = vmul.f32 %v8337_v9, %v10043_v18  ;;  %v8339_v32 = vpop.eup %8338 }
 0x3a5   :  { %v3761_v57 = vmul.f32 %v8339_v32, %v10037_v46  ;;  %8350 = vrcp.f32 %v3635_v34  ;;  %7614 = vmatprep.subr.mxu0 %v4838_v24 }
 0x3a6   :  { %v8341_v12 = vpop.eup %8340  ;;  %7524 = vmatprep.mubr.msk.f32.mxu0 %vm3101_vm3, %v3751_v10 }
 0x3a7   :  { %7525 = vmatmul.mubr.msk.f32.gmra.mrb[148].mxu0 %vm3101_vm3, %v3753_v41  ;;  %v3623_v15 = vpop.xlane.xlu0 %3622  ;;  %v3759_v31 = vmul.f32 %v8341_v12, %v10047_v39  ;;  %v8343_v16 = vpop.eup %8342  ;;  %v10768_v39 = vld [vmem:[#allocation11_spill] sm:$0xff] }
 0x3a8   :  { %v3632_v27 = vpop.xlane.xlu1 %3631  ;;  %v3757_v62 = vmul.f32 %v8343_v16, %v10053_v37 }
 0x3a9   :  { %8352 = vrcp.f32 %v3632_v27  ;;  %7546 = vmatprep.mubr.msk.f32.mxu1 %vm3101_vm3, %v3759_v31 }
 0x3aa   :  { %7547 = vmatmul.mubr.msk.f32.vlgmr.msra.gmra.mrb[144].mxu1 %vm3101_vm3, %v3761_v57  ;;  %8354 = vrcp.f32 %v3623_v15 }
 0x3ab   :  { %v8345_v18 = vpop.eup %8344  ;;  %8121 = vmatpush3.bf16.msra.mxu1 %v10764_v35  ;;  %v3620_v30 = vpop.xlane.xlu0 %3619 }
 0x3ac   :  { %8123 = vmatprep.subr.bf16.mxu1 %v10768_v39  ;;  %8356 = vrcp.f32 %v3620_v30  ;;  %v3641_v46 = vpop.xlane.xlu1 %3640  ;;  %v3755_v21 = vmul.f32 %v8345_v18, %v10063_v14  ;;  %v8347_v45 = vpop.eup %8346  ;;  %v10777_v18 = vld [vmem:[#allocation39_spill] sm:$0xff] }
 0x3ad   :  { %8358 = vrcp.f32 %v3641_v46  ;;  %v3765_v14 = vmul.f32 %v8347_v45, %v10057_v38  ;;  %v10779_v45 = vld [vmem:[#allocation9_spill] sm:$0xff] }
 0x3ae   :  { %v8349_v25 = vpop.eup %8348  ;;  %7527 = vmatprep.mubr.msk.f32.mxu0 %vm3101_vm3, %v3755_v21 }
 0x3af   :  { %7528 = vmatmul.mubr.msk.f32.gmra.mrb[150].mxu0 %vm3101_vm3, %v3757_v62  ;;  %8125 = vmatpush3.bf16.msra.mxu1 %v10768_v39  ;;  %v3629_v1 = vpop.xlane.xlu0 %3628  ;;  %v3763_v5 = vmul.f32 %v8349_v25, %v10067_v13  ;;  %v8351_v37 = vpop.eup %8350  ;;  %v10780_v62 = vld [vmem:[#allocation8_spill] sm:$0xff] }
 0x3b0   :  { %8127 = vmatprep.subr.bf16.mxu1 %v10769_v42  ;;  %v3638_v43 = vpop.xlane.xlu1 %3637  ;;  %v3777_v38 = vmul.f32 %v8351_v37, %v10073_v28 }
 0x3b1   :  { %8360 = vrcp.f32 %v3638_v43  ;;  %7549 = vmatprep.mubr.msk.f32.mxu1 %vm3101_vm3, %v3763_v5 }
 0x3b2   :  { %7550 = vmatmul.mubr.msk.f32.gmra.mrb[146].mxu1 %vm3101_vm3, %v3765_v14  ;;  %8362 = vrcp.f32 %v3629_v1  ;;  %v10782_v14 = vld [vmem:[#allocation7_spill] sm:$0xff] }
 0x3b3   :  { %v8353_v53 = vpop.eup %8352  ;;  %8129 = vmatpush3.bf16.msra.mxu1 %v10769_v42  ;;  %v3626_v26 = vpop.xlane.xlu0 %3625  ;;  %v10781_v42 = vld [vmem:[#allocation13_spill] sm:$0xff] }
 0x3b4   :  { %8131 = vmatprep.subr.bf16.mxu1 %v10770_v6  ;;  %8364 = vrcp.f32 %v3626_v26  ;;  %v3647_v13 = vpop.xlane.xlu1 %3646  ;;  %v3775_v61 = vmul.f32 %v8353_v53, %v10083_v48  ;;  %v8355_v58 = vpop.eup %8354  ;;  %v10783_v26 = vld [vmem:[#allocation17_spill] sm:$0xff] }
 0x3b5   :  { %8366 = vrcp.f32 %v3647_v13  ;;  %v3769_v50 = vmul.f32 %v8355_v58, %v10772_v47  ;;  %v4840_v13 = vld [vmem:[%s10588_s4 + $0x10] sm:$0xff] }
 0x3b6   :  { %v8357_v56 = vpop.eup %8356  ;;  %7574 = vmatprep.mubr.msk.f32.mxu0 %vm3101_vm3, %v3775_v61  ;;  %v4841_v61 = vld [vmem:[%s10588_s4 + $0x18] sm:$0xff] }
 0x3b7   :  { %7575 = vmatmul.mubr.msk.f32.vlgmr.msra.gmra.mrb[152].mxu0 %vm3101_vm3, %v3777_v38  ;;  %8133 = vmatpush3.bf16.msra.mxu1 %v10770_v6  ;;  %v3656_v33 = vpop.xlane.xlu0 %3655  ;;  %v3767_v52 = vmul.f32 %v8357_v56, %v10771_v4  ;;  %v8359_v28 = vpop.eup %8358 }
 0x3b8   :  { %8368 = vrcp.f32 %v3656_v33  ;;  %v3644_v35 = vpop.xlane.xlu1 %3643  ;;  %7615 = vmatpush3.msra.mxu0 %v4838_v24  ;;  %v3781_v40 = vmul.f32 %v8359_v28, %v10774_v8 }
 0x3b9   :  { %8370 = vrcp.f32 %v3644_v35  ;;  %7552 = vmatprep.mubr.msk.f32.mxu1 %vm3101_vm3, %v3767_v52  ;;  %7666 = vmatprep.subr.mxu0 %v4840_v13 }
 0x3ba   :  { %7553 = vmatmul.mubr.msk.f32.gmra.mrb[148].mxu1 %vm3101_vm3, %v3769_v50 }
 0x3bb   :  { %v8361_v48 = vpop.eup %8360  ;;  %v3662_v59 = vpop.xlane.xlu0 %3661 }
 0x3bc   :  { %v3779_v36 = vmul.f32 %v8361_v48, %v10773_v63  ;;  %v8363_v19 = vpop.eup %8362 }
 0x3bd   :  { %v3773_v44 = vmul.f32 %v8363_v19, %v10775_v7 }
 0x3be   :  { %v8365_v2 = vpop.eup %8364  ;;  %7577 = vmatprep.mubr.msk.f32.mxu0 %vm3101_vm3, %v3779_v36 }
 0x3bf   :  { %7578 = vmatmul.mubr.msk.f32.gmra.mrb[154].mxu0 %vm3101_vm3, %v3781_v40  ;;  %v3771_v29 = vmul.f32 %v8365_v2, %v10107_v23  ;;  %v8367_v54 = vpop.eup %8366  ;;  %v10776_v23 = vld [vmem:[#allocation18_spill] sm:$0xff]  ;;  %v3668_v34 = vpop.xlane.xlu0 %3667 }
 0x3c0   :  { %v3650_v49 = vpop.xlane.xlu1 %3649  ;;  %v3785_v17 = vmul.f32 %v8367_v54, %v10776_v23 }
 0x3c1   :  { %8372 = vrcp.f32 %v3650_v49  ;;  %7555 = vmatprep.mubr.msk.f32.mxu1 %vm3101_vm3, %v3771_v29 }
 0x3c2   :  { %v8369_v55 = vpop.eup %8368  ;;  %7556 = vmatmul.mubr.msk.f32.gmra.mrb[150].mxu1 %vm3101_vm3, %v3773_v44 }
 0x3c3   :  { %v8371_v51 = vpop.eup %8370  ;;  %v3791_v20 = vmul.f32 %v8369_v55, %v10117_v3  ;;  %v4839_v3 = vld [vmem:[%s10588_s4 + $0x8] sm:$0xff]  ;;  %v3674_v12 = vpop.xlane.xlu0 %3673 }
 0x3c4   :  { %v3653_v0 = vpop.xlane.xlu1 %3652  ;;  %v3783_v9 = vmul.f32 %v8371_v51, %v10122_v60  ;;  %7640 = vmatprep.subr.mxu1 %v4839_v3 }
 0x3c5   :  { %8374 = vrcp.f32 %v3653_v0  ;;  %7602 = vmatprep.mubr.msk.f32.mxu1 %vm3101_vm3, %v3791_v20 }
 0x3c6   :  { %7580 = vmatprep.mubr.msk.f32.mxu0 %vm3101_vm3, %v3783_v9  ;;  %8376 = vrcp.f32 %v3662_v59 }
 0x3c7   :  { %7581 = vmatmul.mubr.msk.f32.gmra.mrb[156].mxu0 %vm3101_vm3, %v3785_v17 }
 0x3c8   :  { %v3659_v10 = vpop.xlane.xlu1 %3658 }
 0x3c9   :  { %8378 = vrcp.f32 %v3659_v10 }
 0x3ca   :  { %8380 = vrcp.f32 %v3668_v34 }
 0x3cb   :  { %v8373_v32 = vpop.eup %8372 }
 0x3cc   :  { %v3665_v60 = vpop.xlane.xlu1 %3664  ;;  %v3787_v41 = vmul.f32 %v8373_v32, %v10136_v22  ;;  %v10778_v22 = vld [vmem:[#allocation20_spill] sm:$0xff] }
 0x3cd   :  { %8382 = vrcp.f32 %v3665_v60 }
 0x3ce   :  { %7583 = vmatprep.mubr.msk.f32.mxu0 %vm3101_vm3, %v3787_v41  ;;  %8384 = vrcp.f32 %v3674_v12 }
 0x3cf   :  { %v8375_v15 = vpop.eup %8374 }
 0x3d0   :  { %v3671_v31 = vpop.xlane.xlu1 %3670  ;;  %v3789_v57 = vmul.f32 %v8375_v15, %v10144_v11  ;;  %v8377_v27 = vpop.eup %8376 }
 0x3d1   :  { %8386 = vrcp.f32 %v3671_v31  ;;  %v3795_v39 = vmul.f32 %v8377_v27, %v10778_v22 }
 0x3d2   :  { %7584 = vmatmul.mubr.msk.f32.gmra.mrb[158].mxu0 %vm3101_vm3, %v3789_v57 }
 0x3d3   :  { %v8379_v16 = vpop.eup %8378 }
 0x3d4   :  { %v3793_v30 = vmul.f32 %v8379_v16, %v10777_v18  ;;  %v3677_v24 = vpop.xlane.xlu1 %3676  ;;  %v8381_v46 = vpop.eup %8380 }
 0x3d5   :  { %8388 = vrcp.f32 %v3677_v24  ;;  %v3799_v25 = vmul.f32 %v8381_v46, %v10780_v62 }
 0x3d6   :  { %7603 = vmatmul.mubr.msk.f32.vlgmr.msra.gmra.mrb[152].mxu1 %vm3101_vm3, %v3793_v30 }
 0x3d7   :  { %v8383_v21 = vpop.eup %8382  ;;  %7605 = vmatprep.mubr.msk.f32.mxu1 %vm3101_vm3, %v3795_v39  ;;  %7641 = vmatpush3.msra.mxu1 %v4839_v3 }
 0x3d8   :  { %v3797_v11 = vmul.f32 %v8383_v21, %v10779_v45  ;;  %v8385_v1 = vpop.eup %8384  ;;  %7692 = vmatprep.subr.mxu1 %v4841_v61 }
 0x3d9   :  { %v3803_v37 = vmul.f32 %v8385_v1, %v10782_v14 }
 0x3da   :  { %7606 = vmatmul.mubr.msk.f32.gmra.mrb[154].mxu1 %vm3101_vm3, %v3797_v11 }
 0x3db   :  { %v8387_v5 = vpop.eup %8386  ;;  %7608 = vmatprep.mubr.msk.f32.mxu1 %vm3101_vm3, %v3799_v25 }
 0x3dc   :  { %v3801_v43 = vmul.f32 %v8387_v5, %v10781_v42 }
 0x3de   :  { %7609 = vmatmul.mubr.msk.f32.gmra.mrb[156].mxu1 %vm3101_vm3, %v3801_v43 }
 0x3df   :  { %v8389_v53 = vpop.eup %8388  ;;  %7611 = vmatprep.mubr.msk.f32.mxu1 %vm3101_vm3, %v3803_v37 }
 0x3e0   :  { %v3805_v6 = vmul.f32 %v8389_v53, %v10783_v26 }
 0x3e2   :  { %7612 = vmatmul.mubr.msk.f32.gmra.mrb[158].mxu1 %vm3101_vm3, %v3805_v6 }
 0x429   :  { %v7408_v58 = vpop.f32.mrb[128].mxu0 }
 0x42a   :  { %v3896_v38 = vpop.f32.mrb[129].mxu0 }
 0x42b   :  { %7616 = vmatprep.mubr.msk.f32.mxu0 %vm1876_vm1, %v3896_v38 }
 0x42c   :  { %7617 = vmatmul.mubr.msk.f32.vlgmr.msra.gmra.mrb[160].mxu0 %vm1876_vm1, %v7408_v58 }
 0x42d   :  { %v7411_v56 = vpop.f32.mrb[130].mxu0  ;;  %7667 = vmatpush3.msra.mxu0 %v4840_v13 }
 0x42e   :  { %v3906_v33 = vpop.f32.mrb[131].mxu0 }
 0x42f   :  { %7619 = vmatprep.mubr.msk.f32.mxu0 %vm1876_vm1, %v3906_v33 }
 0x430   :  { %7620 = vmatmul.mubr.msk.f32.gmra.mrb[162].mxu0 %vm1876_vm1, %v7411_v56 }
 0x431   :  { %v7414_v4 = vpop.f32.mrb[132].mxu0 }
 0x432   :  { %v3916_v52 = vpop.f32.mrb[133].mxu0 }
 0x433   :  { %7622 = vmatprep.mubr.msk.f32.mxu0 %vm1876_vm1, %v3916_v52 }
 0x434   :  { %7623 = vmatmul.mubr.msk.f32.gmra.mrb[164].mxu0 %vm1876_vm1, %v7414_v4 }
 0x435   :  { %v7417_v35 = vpop.f32.mrb[134].mxu0 }
 0x436   :  { %v3926_v47 = vpop.f32.mrb[135].mxu0 }
 0x437   :  { %7625 = vmatprep.mubr.msk.f32.mxu0 %vm1876_vm1, %v3926_v47 }
 0x438   :  { %7626 = vmatmul.mubr.msk.f32.gmra.mrb[166].mxu0 %vm1876_vm1, %v7417_v35 }
 0x43d   :  { %v7436_v50 = vpop.f32.mrb[128].mxu1 }
 0x43e   :  { %v4025_v28 = vpop.f32.mrb[129].mxu1 }
 0x43f   :  { %7628 = vmatprep.mubr.msk.f32.mxu0 %vm1876_vm1, %v4025_v28 }
 0x440   :  { %7629 = vmatmul.mubr.msk.f32.gmra.mrb[168].mxu0 %vm1876_vm1, %v7436_v50 }
 0x445   :  { %v7439_v48 = vpop.f32.mrb[130].mxu1 }
 0x446   :  { %v4035_v63 = vpop.f32.mrb[131].mxu1 }
 0x447   :  { %7631 = vmatprep.mubr.msk.f32.mxu0 %vm1876_vm1, %v4035_v63 }
 0x448   :  { %7632 = vmatmul.mubr.msk.f32.gmra.mrb[170].mxu0 %vm1876_vm1, %v7439_v48 }
 0x44a   :  { %v7464_v36 = vpop.f32.mrb[136].mxu0 }
 0x44b   :  { %v4154_v19 = vpop.f32.mrb[137].mxu0 }
 0x44c   :  { %7642 = vmatprep.mubr.msk.f32.mxu1 %vm1876_vm1, %v4154_v19 }
 0x44d   :  { %7643 = vmatmul.mubr.msk.f32.vlgmr.msra.gmra.mrb[160].mxu1 %vm1876_vm1, %v7464_v36  ;;  %v7442_v8 = vpop.f32.mrb[132].mxu1 }
 0x44e   :  { %v4045_v40 = vpop.f32.mrb[133].mxu1  ;;  %7693 = vmatpush3.msra.mxu1 %v4841_v61 }
 0x44f   :  { %7634 = vmatprep.mubr.msk.f32.mxu0 %vm1876_vm1, %v4045_v40 }
 0x450   :  { %7635 = vmatmul.mubr.msk.f32.gmra.mrb[172].mxu0 %vm1876_vm1, %v7442_v8 }
 0x452   :  { %v7467_v2 = vpop.f32.mrb[138].mxu0 }
 0x453   :  { %v4164_v29 = vpop.f32.mrb[139].mxu0 }
 0x454   :  { %7645 = vmatprep.mubr.msk.f32.mxu1 %vm1876_vm1, %v4164_v29 }
 0x455   :  { %7646 = vmatmul.mubr.msk.f32.gmra.mrb[162].mxu1 %vm1876_vm1, %v7467_v2  ;;  %v7445_v49 = vpop.f32.mrb[134].mxu1 }
 0x456   :  { %v4055_v7 = vpop.f32.mrb[135].mxu1 }
 0x457   :  { %7637 = vmatprep.mubr.msk.f32.mxu0 %vm1876_vm1, %v4055_v7 }
 0x458   :  { %7638 = vmatmul.mubr.msk.f32.gmra.mrb[174].mxu0 %vm1876_vm1, %v7445_v49 }
 0x45a   :  { %v7470_v44 = vpop.f32.mrb[140].mxu0 }
 0x45b   :  { %v4174_v54 = vpop.f32.mrb[141].mxu0 }
 0x45c   :  { %7648 = vmatprep.mubr.msk.f32.mxu1 %vm1876_vm1, %v4174_v54 }
 0x45d   :  { %7649 = vmatmul.mubr.msk.f32.gmra.mrb[164].mxu1 %vm1876_vm1, %v7470_v44  ;;  %v7492_v59 = vpop.f32.mrb[136].mxu1 }
 0x45e   :  { %v4283_v55 = vpop.f32.mrb[137].mxu1 }
 0x462   :  { %v7473_v51 = vpop.f32.mrb[142].mxu0 }
 0x463   :  { %v4184_v20 = vpop.f32.mrb[143].mxu0 }
 0x464   :  { %7651 = vmatprep.mubr.msk.f32.mxu1 %vm1876_vm1, %v4184_v20 }
 0x465   :  { %7652 = vmatmul.mubr.msk.f32.gmra.mrb[166].mxu1 %vm1876_vm1, %v7473_v51  ;;  %v7495_v0 = vpop.f32.mrb[138].mxu1 }
 0x466   :  { %7654 = vmatprep.mubr.msk.f32.mxu1 %vm1876_vm1, %v4283_v55  ;;  %v4293_v9 = vpop.f32.mrb[139].mxu1 }
 0x469   :  { %7655 = vmatmul.mubr.msk.f32.gmra.mrb[168].mxu1 %vm1876_vm1, %v7492_v59 }
 0x46a   :  { %v7520_v23 = vpop.f32.mrb[144].mxu0  ;;  %7657 = vmatprep.mubr.msk.f32.mxu1 %vm1876_vm1, %v4293_v9 }
 0x46b   :  { %v4412_v17 = vpop.f32.mrb[145].mxu0 }
 0x46c   :  { %7668 = vmatprep.mubr.msk.f32.mxu0 %vm1876_vm1, %v4412_v17 }
 0x46d   :  { %7658 = vmatmul.mubr.msk.f32.gmra.mrb[170].mxu1 %vm1876_vm1, %v7495_v0  ;;  %7669 = vmatmul.mubr.msk.f32.vlgmr.msra.gmra.mrb[176].mxu0 %vm1876_vm1, %v7520_v23  ;;  %v7498_v34 = vpop.f32.mrb[140].mxu1 }
 0x46e   :  { %v4303_v10 = vpop.f32.mrb[141].mxu1 }
 0x46f   :  { %7660 = vmatprep.mubr.msk.f32.mxu1 %vm1876_vm1, %v4303_v10 }
 0x471   :  { %7661 = vmatmul.mubr.msk.f32.gmra.mrb[172].mxu1 %vm1876_vm1, %v7498_v34 }
 0x472   :  { %v7523_v32 = vpop.f32.mrb[146].mxu0 }
 0x473   :  { %v4422_v3 = vpop.f32.mrb[147].mxu0 }
 0x474   :  { %7671 = vmatprep.mubr.msk.f32.mxu0 %vm1876_vm1, %v4422_v3 }
 0x475   :  { %7672 = vmatmul.mubr.msk.f32.gmra.mrb[178].mxu0 %vm1876_vm1, %v7523_v32  ;;  %v7501_v60 = vpop.f32.mrb[142].mxu1 }
 0x476   :  { %v4313_v41 = vpop.f32.mrb[143].mxu1 }
 0x477   :  { %7663 = vmatprep.mubr.msk.f32.mxu1 %vm1876_vm1, %v4313_v41 }
 0x478   :  { %7664 = vmatmul.mubr.msk.f32.gmra.mrb[174].mxu1 %vm1876_vm1, %v7501_v60 }
 0x47a   :  { %v7526_v12 = vpop.f32.mrb[148].mxu0 }
 0x47b   :  { %v4432_v15 = vpop.f32.mrb[149].mxu0 }
 0x47c   :  { %7674 = vmatprep.mubr.msk.f32.mxu0 %vm1876_vm1, %v4432_v15 }
 0x47d   :  { %7675 = vmatmul.mubr.msk.f32.gmra.mrb[180].mxu0 %vm1876_vm1, %v7526_v12  ;;  %v7548_v31 = vpop.f32.mrb[144].mxu1 }
 0x47e   :  { %v4541_v57 = vpop.f32.mrb[145].mxu1 }
 0x482   :  { %v7529_v27 = vpop.f32.mrb[150].mxu0 }
 0x483   :  { %v4442_v16 = vpop.f32.mrb[151].mxu0 }
 0x484   :  { %7677 = vmatprep.mubr.msk.f32.mxu0 %vm1876_vm1, %v4442_v16 }
 0x485   :  { %7678 = vmatmul.mubr.msk.f32.gmra.mrb[182].mxu0 %vm1876_vm1, %v7529_v27  ;;  %v7551_v18 = vpop.f32.mrb[146].mxu1 }
 0x486   :  { %7680 = vmatprep.mubr.msk.f32.mxu0 %vm1876_vm1, %v4541_v57  ;;  %v4551_v30 = vpop.f32.mrb[147].mxu1 }
 0x489   :  { %7681 = vmatmul.mubr.msk.f32.gmra.mrb[184].mxu0 %vm1876_vm1, %v7548_v31 }
 0x48a   :  { %v7576_v24 = vpop.f32.mrb[152].mxu0  ;;  %7683 = vmatprep.mubr.msk.f32.mxu0 %vm1876_vm1, %v4551_v30 }
 0x48b   :  { %v4670_v22 = vpop.f32.mrb[153].mxu0 }
 0x48c   :  { %7694 = vmatprep.mubr.msk.f32.mxu1 %vm1876_vm1, %v4670_v22 }
 0x48d   :  { %7684 = vmatmul.mubr.msk.f32.gmra.mrb[186].mxu0 %vm1876_vm1, %v7551_v18  ;;  %7695 = vmatmul.mubr.msk.f32.vlgmr.msra.gmra.mrb[176].mxu1 %vm1876_vm1, %v7576_v24  ;;  %v7554_v39 = vpop.f32.mrb[148].mxu1 }
 0x48e   :  { %v4561_v46 = vpop.f32.mrb[149].mxu1 }
 0x48f   :  { %7686 = vmatprep.mubr.msk.f32.mxu0 %vm1876_vm1, %v4561_v46 }
 0x491   :  { %7687 = vmatmul.mubr.msk.f32.gmra.mrb[188].mxu0 %vm1876_vm1, %v7554_v39 }
 0x492   :  { %v7579_v21 = vpop.f32.mrb[154].mxu0 }
 0x493   :  { %v4680_v45 = vpop.f32.mrb[155].mxu0 }
 0x494   :  { %7697 = vmatprep.mubr.msk.f32.mxu1 %vm1876_vm1, %v4680_v45 }
 0x495   :  { %7698 = vmatmul.mubr.msk.f32.gmra.mrb[178].mxu1 %vm1876_vm1, %v7579_v21  ;;  %v7557_v11 = vpop.f32.mrb[150].mxu1 }
 0x496   :  { %v4571_v62 = vpop.f32.mrb[151].mxu1 }
 0x497   :  { %7689 = vmatprep.mubr.msk.f32.mxu0 %vm1876_vm1, %v4571_v62 }
 0x498   :  { %7690 = vmatmul.mubr.msk.f32.gmra.mrb[190].mxu0 %vm1876_vm1, %v7557_v11 }
 0x49a   :  { %v7582_v25 = vpop.f32.mrb[156].mxu0 }
 0x49b   :  { %v4690_v1 = vpop.f32.mrb[157].mxu0 }
 0x49c   :  { %7700 = vmatprep.mubr.msk.f32.mxu1 %vm1876_vm1, %v4690_v1 }
 0x49d   :  { %7701 = vmatmul.mubr.msk.f32.gmra.mrb[180].mxu1 %vm1876_vm1, %v7582_v25 }
 0x4a5   :  { %v7585_v5 = vpop.f32.mrb[158].mxu0 }
 0x4a6   :  { %v4700_v42 = vpop.f32.mrb[159].mxu0 }
 0x4a7   :  { %7703 = vmatprep.mubr.msk.f32.mxu1 %vm1876_vm1, %v4700_v42 }
 0x4a8   :  { %7704 = vmatmul.mubr.msk.f32.gmra.mrb[182].mxu1 %vm1876_vm1, %v7585_v5 }
 0x4a9   :  { %v7604_v43 = vpop.f32.mrb[152].mxu1 }
 0x4aa   :  { %v4799_v14 = vpop.f32.mrb[153].mxu1 }
 0x4ab   :  { %7706 = vmatprep.mubr.msk.f32.mxu1 %vm1876_vm1, %v4799_v14 }
 0x4ac   :  { %7707 = vmatmul.mubr.msk.f32.gmra.mrb[184].mxu1 %vm1876_vm1, %v7604_v43 }
 0x4ad   :  { %v7607_v37 = vpop.f32.mrb[154].mxu1 }
 0x4ae   :  { %v4809_v53 = vpop.f32.mrb[155].mxu1 }
 0x4af   :  { %7709 = vmatprep.mubr.msk.f32.mxu1 %vm1876_vm1, %v4809_v53 }
 0x4b0   :  { %7710 = vmatmul.mubr.msk.f32.gmra.mrb[186].mxu1 %vm1876_vm1, %v7607_v37 }
 0x4b1   :  { %v7610_v26 = vpop.f32.mrb[156].mxu1 }
 0x4b2   :  { %v4819_v6 = vpop.f32.mrb[157].mxu1 }
 0x4b3   :  { %7712 = vmatprep.mubr.msk.f32.mxu1 %vm1876_vm1, %v4819_v6 }
 0x4b4   :  { %7713 = vmatmul.mubr.msk.f32.gmra.mrb[188].mxu1 %vm1876_vm1, %v7610_v26 }
 0x4b5   :  { %v7613_v13 = vpop.f32.mrb[158].mxu1 }
 0x4b6   :  { %v4829_v61 = vpop.f32.mrb[159].mxu1 }
 0x4b7   :  { %7715 = vmatprep.mubr.msk.f32.mxu1 %vm1876_vm1, %v4829_v61 }
 0x4b8   :  { %7716 = vmatmul.mubr.msk.f32.gmra.mrb[190].mxu1 %vm1876_vm1, %v7613_v13 }
 0x4ff   :  { %v7618_v58 = vpop.f32.mrb[160].mxu0 }
 0x500   :  { %v4956_v38 = vpop.f32.mrb[161].mxu0  ;;  %v5621_v19 = vsel %vm55_vm0, %v7618_v58, 0.0 }
 0x501   :  { %v5614_v2 = vsel %vm55_vm0, %v4956_v38, 0.0 }
 0x503   :  { %v7621_v56 = vpop.f32.mrb[162].mxu0 }
 0x504   :  { %v4966_v33 = vpop.f32.mrb[163].mxu0  ;;  %v5635_v55 = vsel %vm55_vm0, %v7621_v56, 0.0 }
 0x505   :  { %v5628_v0 = vsel %vm55_vm0, %v4966_v33, 0.0 }
 0x507   :  { %v7624_v4 = vpop.f32.mrb[164].mxu0 }
 0x508   :  { %v4976_v52 = vpop.f32.mrb[165].mxu0  ;;  %v5649_v3 = vsel %vm55_vm0, %v7624_v4, 0.0 }
 0x509   :  { %v5642_v12 = vsel %vm55_vm0, %v4976_v52, 0.0 }
 0x50b   :  { %v7627_v35 = vpop.f32.mrb[166].mxu0 }
 0x50c   :  { %v4986_v47 = vpop.f32.mrb[167].mxu0  ;;  %v5663_v16 = vsel %vm55_vm0, %v7627_v35, 0.0 }
 0x50d   :  { %v5656_v24 = vsel %vm55_vm0, %v4986_v47, 0.0 }
 0x513   :  { %v7630_v50 = vpop.f32.mrb[168].mxu0 }
 0x514   :  { %v4996_v28 = vpop.f32.mrb[169].mxu0  ;;  %v5677_v45 = vsel %vm55_vm0, %v7630_v50, 0.0 }
 0x515   :  { %v5670_v25 = vsel %vm55_vm0, %v4996_v28, 0.0 }
 0x51b   :  { %v7633_v48 = vpop.f32.mrb[170].mxu0 }
 0x51c   :  { %v5006_v63 = vpop.f32.mrb[171].mxu0  ;;  %v5691_v37 = vsel %vm55_vm0, %v7633_v48, 0.0 }
 0x51d   :  { %v5684_v53 = vsel %vm55_vm0, %v5006_v63, 0.0 }
 0x520   :  { %v7644_v36 = vpop.f32.mrb[160].mxu1 }
 0x521   :  { %v5622_v8 = vsel %vm55_vm0, %v7644_v36, 0.0  ;;  %v5149_v40 = vpop.f32.mrb[161].mxu1 }
 0x522   :  { %v5623_v29 = vadd.f32 %v5622_v8, %v5621_v19  ;;  %v5615_v49 = vsel %vm55_vm0, %v5149_v40, 0.0 }
 0x523   :  { %v5616_v7 = vadd.f32 %v5615_v49, %v5614_v2  ;;  %v7636_v44 = vpop.f32.mrb[172].mxu0 }
 0x524   :  { %v5016_v54 = vpop.f32.mrb[173].mxu0  ;;  %v5705_v47 = vsel %vm55_vm0, %v7636_v44, 0.0 }
 0x525   :  { %v5698_v48 = vsel %vm55_vm0, %v5016_v54, 0.0 }
 0x528   :  { %v7647_v59 = vpop.f32.mrb[162].mxu1 }
 0x529   :  { %v5636_v51 = vsel %vm55_vm0, %v7647_v59, 0.0  ;;  %v5159_v20 = vpop.f32.mrb[163].mxu1 }
 0x52a   :  { %v5637_v9 = vadd.f32 %v5636_v51, %v5635_v55  ;;  %v5629_v23 = vsel %vm55_vm0, %v5159_v20, 0.0 }
 0x52b   :  { %v5630_v17 = vadd.f32 %v5629_v23, %v5628_v0  ;;  %v7639_v34 = vpop.f32.mrb[174].mxu0 }
 0x52c   :  { %v5026_v10 = vpop.f32.mrb[175].mxu0  ;;  %v5719_v44 = vsel %vm55_vm0, %v7639_v34, 0.0 }
 0x52d   :  { %v5712_v54 = vsel %vm55_vm0, %v5026_v10, 0.0 }
 0x530   :  { %v7650_v32 = vpop.f32.mrb[164].mxu1 }
 0x531   :  { %v5650_v60 = vsel %vm55_vm0, %v7650_v32, 0.0  ;;  %v5169_v41 = vpop.f32.mrb[165].mxu1 }
 0x532   :  { %v5651_v15 = vadd.f32 %v5650_v60, %v5649_v3  ;;  %v5643_v31 = vsel %vm55_vm0, %v5169_v41, 0.0 }
 0x533   :  { %v5644_v57 = vadd.f32 %v5643_v31, %v5642_v12 }
 0x538   :  { %v7653_v27 = vpop.f32.mrb[166].mxu1 }
 0x539   :  { %v5664_v18 = vsel %vm55_vm0, %v7653_v27, 0.0  ;;  %v5179_v30 = vpop.f32.mrb[167].mxu1 }
 0x53a   :  { %v5665_v22 = vadd.f32 %v5664_v18, %v5663_v16  ;;  %v5657_v39 = vsel %vm55_vm0, %v5179_v30, 0.0 }
 0x53b   :  { %v5658_v46 = vadd.f32 %v5657_v39, %v5656_v24 }
 0x53c   :  { %v7656_v21 = vpop.f32.mrb[168].mxu1 }
 0x53d   :  { %v5678_v11 = vsel %vm55_vm0, %v7656_v21, 0.0  ;;  %v5189_v62 = vpop.f32.mrb[169].mxu1 }
 0x53e   :  { %v5679_v1 = vadd.f32 %v5678_v11, %v5677_v45  ;;  %v5671_v5 = vsel %vm55_vm0, %v5189_v62, 0.0 }
 0x53f   :  { %v5672_v42 = vadd.f32 %v5671_v5, %v5670_v25 }
 0x540   :  { %v7659_v43 = vpop.f32.mrb[170].mxu1  ;;  %v7670_v14 = vpop.f32.mrb[176].mxu0 }
 0x541   :  { %v5692_v26 = vsel %vm55_vm0, %v7659_v43, 0.0  ;;  %v5624_v6 = vsel %vm55_vm0, %v7670_v14, 0.0  ;;  %v5199_v13 = vpop.f32.mrb[171].mxu1  ;;  %v5342_v61 = vpop.f32.mrb[177].mxu0 }
 0x542   :  { %v5693_v58 = vadd.f32 %v5692_v26, %v5691_v37  ;;  %v5625_v38 = vadd.f32 %v5624_v6, %v5623_v29  ;;  %v5685_v56 = vsel %vm55_vm0, %v5199_v13, 0.0  ;;  %v5617_v33 = vsel %vm55_vm0, %v5342_v61, 0.0 }
 0x543   :  { %v5686_v4 = vadd.f32 %v5685_v56, %v5684_v53  ;;  %v5618_v52 = vadd.f32 %v5617_v33, %v5616_v7 }
 0x544   :  { %v7662_v35 = vpop.f32.mrb[172].mxu1 }
 0x545   :  { %v5706_v50 = vsel %vm55_vm0, %v7662_v35, 0.0  ;;  %v5209_v28 = vpop.f32.mrb[173].mxu1 }
 0x546   :  { %v5707_v63 = vadd.f32 %v5706_v50, %v5705_v47  ;;  %v5699_v36 = vsel %vm55_vm0, %v5209_v28, 0.0 }
 0x547   :  { %v5700_v19 = vadd.f32 %v5699_v36, %v5698_v48 }
 0x548   :  { %v7673_v8 = vpop.f32.mrb[178].mxu0 }
 0x549   :  { %v5638_v40 = vsel %vm55_vm0, %v7673_v8, 0.0  ;;  %v5352_v2 = vpop.f32.mrb[179].mxu0 }
 0x54a   :  { %v5639_v29 = vadd.f32 %v5638_v40, %v5637_v9  ;;  %v5631_v49 = vsel %vm55_vm0, %v5352_v2, 0.0 }
 0x54b   :  { %v5632_v7 = vadd.f32 %v5631_v49, %v5630_v17  ;;  %v7665_v59 = vpop.f32.mrb[174].mxu1 }
 0x54c   :  { %v5720_v55 = vsel %vm55_vm0, %v7665_v59, 0.0  ;;  %v5219_v51 = vpop.f32.mrb[175].mxu1 }
 0x54d   :  { %v5721_v20 = vadd.f32 %v5720_v55, %v5719_v44  ;;  %v5713_v0 = vsel %vm55_vm0, %v5219_v51, 0.0 }
 0x54e   :  { %v5714_v23 = vadd.f32 %v5713_v0, %v5712_v54 }
 0x550   :  { %v7676_v32 = vpop.f32.mrb[180].mxu0 }
 0x551   :  { %v5652_v3 = vsel %vm55_vm0, %v7676_v32, 0.0  ;;  %v5362_v60 = vpop.f32.mrb[181].mxu0 }
 0x552   :  { %v5653_v9 = vadd.f32 %v5652_v3, %v5651_v15  ;;  %v5645_v41 = vsel %vm55_vm0, %v5362_v60, 0.0 }
 0x553   :  { %v5646_v17 = vadd.f32 %v5645_v41, %v5644_v57 }
 0x558   :  { %v7679_v12 = vpop.f32.mrb[182].mxu0 }
 0x559   :  { %v5666_v34 = vsel %vm55_vm0, %v7679_v12, 0.0  ;;  %v5372_v31 = vpop.f32.mrb[183].mxu0 }
 0x55a   :  { %v10456_v27 = vadd.f32 %v5666_v34, %v5665_v22  ;;  %v5659_v10 = vsel %vm55_vm0, %v5372_v31, 0.0 }
 0x55b   :  { %v10459_v16 = vadd.f32 %v5659_v10, %v5658_v46  ;;  %v10472_v46 = vld [vmem:[%s10589_s5] ss:$0 sm:$0xff] }
 0x55c   :  { %v7682_v18 = vpop.f32.mrb[184].mxu0 }
 0x55d   :  { %v5680_v30 = vsel %vm55_vm0, %v7682_v18, 0.0  ;;  %v5382_v24 = vpop.f32.mrb[185].mxu0 }
 0x55e   :  { %v10462_v39 = vadd.f32 %v5680_v30, %v5679_v1  ;;  %v5673_v15 = vsel %vm55_vm0, %v5382_v24, 0.0 }
 0x55f   :  { %v10465_v21 = vadd.f32 %v5673_v15, %v5672_v42 }
 0x560   :  { %v7685_v57 = vpop.f32.mrb[186].mxu0  ;;  %v7696_v45 = vpop.f32.mrb[176].mxu1 }
 0x561   :  { %v5694_v11 = vsel %vm55_vm0, %v7685_v57, 0.0  ;;  %v5626_v22 = vsel %vm55_vm0, %v7696_v45, 0.0  ;;  %v5392_v62 = vpop.f32.mrb[187].mxu0  ;;  %v5535_v25 = vpop.f32.mrb[177].mxu1 }
 0x562   :  { %v10474_v5 = vadd.f32 %v5694_v11, %v5693_v58  ;;  %v5627_v1 = vadd.f32 %v5626_v22, %v5625_v38  ;;  %v5687_v43 = vsel %vm55_vm0, %v5392_v62, 0.0  ;;  %v5619_v42 = vsel %vm55_vm0, %v5535_v25, 0.0 }
 0x563   :  { %v10478_v14 = vadd.f32 %v5687_v43, %v5686_v4  ;;  %v5620_v37 = vadd.f32 %v5619_v42, %v5618_v52 }
 0x564   :  { %v5734_v53 = vadd.f32 %v10472_v46, %v5627_v1  ;;  %v7688_v26 = vpop.f32.mrb[188].mxu0 }
 0x565   :  { %v5733_v6 = vadd.f32 %v10472_v46, %v5620_v37  ;;  %v5708_v13 = vsel %vm55_vm0, %v7688_v26, 0.0  ;;  %v5402_v61 = vpop.f32.mrb[189].mxu0 }
 0x566   :  { %5750 = vst.msk [vmem:[%s10590_s6 + $0x8] sm:$0xff] %vm55_vm0, %v5734_v53  ;;  %v5709_v58 = vadd.f32 %v5708_v13, %v5707_v63  ;;  %v5701_v38 = vsel %vm55_vm0, %v5402_v61, 0.0 }
 0x567   :  { %5749 = vst.msk [vmem:[%s10590_s6] sm:$0xff] %vm55_vm0, %v5733_v6  ;;  %v5702_v56 = vadd.f32 %v5701_v38, %v5700_v19 }
 0x568   :  { %v7699_v33 = vpop.f32.mrb[178].mxu1 }
 0x569   :  { %v5640_v4 = vsel %vm55_vm0, %v7699_v33, 0.0  ;;  %v5545_v52 = vpop.f32.mrb[179].mxu1 }
 0x56a   :  { %v5641_v35 = vadd.f32 %v5640_v4, %v5639_v29  ;;  %v5633_v47 = vsel %vm55_vm0, %v5545_v52, 0.0 }
 0x56b   :  { %v5634_v50 = vadd.f32 %v5633_v47, %v5632_v7  ;;  %v7691_v28 = vpop.f32.mrb[190].mxu0 }
 0x56c   :  { %v5736_v48 = vadd.f32 %v10472_v46, %v5641_v35  ;;  %v5722_v63 = vsel %vm55_vm0, %v7691_v28, 0.0  ;;  %v5412_v36 = vpop.f32.mrb[191].mxu0 }
 0x56d   :  { %v5735_v8 = vadd.f32 %v10472_v46, %v5634_v50  ;;  %v5723_v40 = vadd.f32 %v5722_v63, %v5721_v20  ;;  %v5715_v2 = vsel %vm55_vm0, %v5412_v36, 0.0 }
 0x56e   :  { %5752 = vst.msk [vmem:[%s10590_s6 + $0x18] sm:$0xff] %vm55_vm0, %v5736_v48  ;;  %v5716_v19 = vadd.f32 %v5715_v2, %v5714_v23 }
 0x56f   :  { %5751 = vst.msk [vmem:[%s10590_s6 + $0x10] sm:$0xff] %vm55_vm0, %v5735_v8 }
 0x570   :  { %v7702_v29 = vpop.f32.mrb[180].mxu1 }
 0x571   :  { %v5654_v49 = vsel %vm55_vm0, %v7702_v29, 0.0  ;;  %v5555_v7 = vpop.f32.mrb[181].mxu1 }
 0x572   :  { %v5655_v59 = vadd.f32 %v5654_v49, %v5653_v9  ;;  %v5647_v44 = vsel %vm55_vm0, %v5555_v7, 0.0 }
 0x573   :  { %v5648_v55 = vadd.f32 %v5647_v44, %v5646_v17 }
 0x574   :  { %v5738_v51 = vadd.f32 %v10472_v46, %v5655_v59 }
 0x575   :  { %v5737_v54 = vadd.f32 %v10472_v46, %v5648_v55 }
 0x576   :  { %5754 = vst.msk [vmem:[%s10590_s6 + $0x28] sm:$0xff] %vm55_vm0, %v5738_v51 }
 0x577   :  { %5753 = vst.msk [vmem:[%s10590_s6 + $0x20] sm:$0xff] %vm55_vm0, %v5737_v54 }
 0x57b   :  { %v7705_v20 = vpop.f32.mrb[182].mxu1 }
 0x57c   :  { %v5668_v0 = vsel %vm55_vm0, %v7705_v20, 0.0  ;;  %v5565_v23 = vpop.f32.mrb[183].mxu1 }
 0x57d   :  { %v5669_v32 = vadd.f32 %v5668_v0, %v10456_v27  ;;  %v5661_v3 = vsel %vm55_vm0, %v5565_v23, 0.0 }
 0x57e   :  { %v5662_v60 = vadd.f32 %v5661_v3, %v10459_v16 }
 0x57f   :  { %v5740_v9 = vadd.f32 %v10472_v46, %v5669_v32  ;;  %v7708_v41 = vpop.f32.mrb[184].mxu1 }
 0x580   :  { %v5739_v17 = vadd.f32 %v10472_v46, %v5662_v60  ;;  %v5682_v12 = vsel %vm55_vm0, %v7708_v41, 0.0  ;;  %v5575_v34 = vpop.f32.mrb[185].mxu1 }
 0x581   :  { %5756 = vst.msk [vmem:[%s10590_s6 + $0x38] sm:$0xff] %vm55_vm0, %v5740_v9  ;;  %v5683_v31 = vadd.f32 %v5682_v12, %v10462_v39  ;;  %v5675_v27 = vsel %vm55_vm0, %v5575_v34, 0.0 }
 0x582   :  { %5755 = vst.msk [vmem:[%s10590_s6 + $0x30] sm:$0xff] %vm55_vm0, %v5739_v17  ;;  %v5676_v10 = vadd.f32 %v5675_v27, %v10465_v21 }
 0x583   :  { %v5742_v16 = vadd.f32 %v10472_v46, %v5683_v31  ;;  %v7711_v18 = vpop.f32.mrb[186].mxu1 }
 0x584   :  { %v5741_v30 = vadd.f32 %v10472_v46, %v5676_v10  ;;  %v5696_v24 = vsel %vm55_vm0, %v7711_v18, 0.0  ;;  %v5585_v15 = vpop.f32.mrb[187].mxu1 }
 0x585   :  { %5758 = vst.msk [vmem:[%s10590_s6 + $0x48] sm:$0xff] %vm55_vm0, %v5742_v16  ;;  %v5697_v39 = vadd.f32 %v5696_v24, %v10474_v5  ;;  %v5689_v57 = vsel %vm55_vm0, %v5585_v15, 0.0 }
 0x586   :  { %5757 = vst.msk [vmem:[%s10590_s6 + $0x40] sm:$0xff] %vm55_vm0, %v5741_v30  ;;  %v5690_v21 = vadd.f32 %v5689_v57, %v10478_v14 }
 0x587   :  { %v5744_v45 = vadd.f32 %v10472_v46, %v5697_v39  ;;  %v7714_v11 = vpop.f32.mrb[188].mxu1 }
 0x588   :  { %v5743_v22 = vadd.f32 %v10472_v46, %v5690_v21  ;;  %v5710_v62 = vsel %vm55_vm0, %v7714_v11, 0.0  ;;  %v5595_v25 = vpop.f32.mrb[189].mxu1 }
 0x589   :  { %5760 = vst.msk [vmem:[%s10590_s6 + $0x58] sm:$0xff] %vm55_vm0, %v5744_v45  ;;  %v5711_v5 = vadd.f32 %v5710_v62, %v5709_v58  ;;  %v5703_v1 = vsel %vm55_vm0, %v5595_v25, 0.0 }
 0x58a   :  { %5759 = vst.msk [vmem:[%s10590_s6 + $0x50] sm:$0xff] %vm55_vm0, %v5743_v22  ;;  %v5704_v43 = vadd.f32 %v5703_v1, %v5702_v56 }
 0x58b   :  { %v5746_v42 = vadd.f32 %v10472_v46, %v5711_v5  ;;  %v7717_v14 = vpop.f32.mrb[190].mxu1 }
 0x58c   :  { %v5745_v37 = vadd.f32 %v10472_v46, %v5704_v43  ;;  %v5724_v53 = vsel %vm55_vm0, %v7717_v14, 0.0  ;;  %v5605_v26 = vpop.f32.mrb[191].mxu1 }
 0x58d   :  { %5762 = vst.msk [vmem:[%s10590_s6 + $0x68] sm:$0xff] %vm55_vm0, %v5746_v42  ;;  %v5725_v6 = vadd.f32 %v5724_v53, %v5723_v40  ;;  %v5717_v13 = vsel %vm55_vm0, %v5605_v26, 0.0 }
 0x58e   :  { %5761 = vst.msk [vmem:[%s10590_s6 + $0x60] sm:$0xff] %vm55_vm0, %v5745_v37  ;;  %v5718_v61 = vadd.f32 %v5717_v13, %v5716_v19 }
 0x58f   :  { %v5748_v58 = vadd.f32 %v10472_v46, %v5725_v6 }
 0x590   :  { %v5747_v38 = vadd.f32 %v10472_v46, %v5718_v61 }
 0x591   :  { %5764 = vst.msk [vmem:[%s10590_s6 + $0x78] sm:$0xff] %vm55_vm0, %v5748_v58 }
 0x592   :  { %5763 = vst.msk [vmem:[%s10590_s6 + $0x70] sm:$0xff] %vm55_vm0, %v5747_v38 }

</bundles_post_ra>
